<compile_context>
chip_gen: v7x
topology: tpu7x:2x2x1
jax: 0.10.0
libtpu: 0.0.40
codegen_flags: <defaults>
</compile_context>

<pallas_src>
import jax
import jax.numpy as jnp
from jax.experimental import pallas as pl
from jax.experimental.pallas import tpu as pltpu

F32 = jnp.float32
BF16 = jnp.bfloat16
LANES = 128


# ----------------------------------------------------------------------------
# Constant row-operator matrices (avg-pool / nearest-upsample on NHWC-flattened rows)
# ----------------------------------------------------------------------------
def _pool_matrix(n, h, w, k):
    """(n*(h//k)*(w//k), n*h*w) average-pooling operator."""
    ho, wo = h // k, w // k
    ni = jnp.arange(n)[:, None, None]
    ii = jnp.arange(h)[None, :, None]
    jj = jnp.arange(w)[None, None, :]
    out_row = (ni * ho * wo + (ii // k) * wo + (jj // k)).reshape(-1)
    onehot = jax.nn.one_hot(out_row, n * ho * wo, dtype=F32)
    return onehot.T / float(k * k)          # values 0 / 0.25: exact in bf16


def _upsample_matrix(n, h, w, k):
    """(n*(h*k)*(w*k), n*h*w) nearest-neighbour upsampling operator."""
    ho, wo = h * k, w * k
    ni = jnp.arange(n)[:, None, None]
    ii = jnp.arange(ho)[None, :, None]
    jj = jnp.arange(wo)[None, None, :]
    src_row = (ni * h * w + (ii // k) * w + (jj // k)).reshape(-1)
    return jax.nn.one_hot(src_row, n * h * w, dtype=F32)   # values 0/1: exact in bf16


# ----------------------------------------------------------------------------
# Slab packing: row-concatenate equal-width arrays, 16-row-aligned segments.
# ----------------------------------------------------------------------------
def _pack_rows(named_arrays, dtype=BF16, row_align=16):
    seg, parts, off = {}, [], 0
    for name, a in named_arrays:
        r = a.shape[0]
        pad = (-r) % row_align
        parts.append(jnp.pad(a, ((0, pad), (0, 0))))
        seg[name] = (off, r)
        off += r + pad
    return jnp.concatenate(parts, axis=0).astype(dtype), seg


def _embed(w, rows, cols=LANES):
    """Place a natural-size weight into a zero (rows, cols) slab segment."""
    r, c = w.shape
    return jnp.zeros((rows, cols), F32).at[:r, :c].set(w)


def _dense_init(key, cin, cout, scale=0.1):
    kw, kb = jax.random.split(key)
    w = jax.random.normal(kw, (cin, cout), F32) * scale
    b = jax.random.normal(kb, (1, cout), F32) * 0.01
    return w, b


# ----------------------------------------------------------------------------
# Fused kernel (closure over the static slab layout)
# ----------------------------------------------------------------------------
def _make_kernel(layout):
    wseg = layout["wseg"]
    brow = layout["bias_row"]
    op128 = layout["op128"]
    op32 = layout["op32"]
    op8 = layout["op8"]
    n1, n2, n3 = layout["n1"], layout["n2"], layout["n3"]   # real element counts

    def kernel(x0_ref, w_ref, b_ref, ops128_ref, ops32_ref, ops8_ref, pfin_ref,
               mask_ref, loss_ref):

        def W(name):                        # static row-slice view of the weight slab
            off, rows = wseg[name]
            return w_ref[off:off + rows, :]

        def B(name):                        # (1, 128) f32 bias row
            r = brow[name]
            return b_ref[r:r + 1, :]

        def OP(ref, seg, name):             # static row-slice of an operator slab
            off, rows = seg[name]
            return ref[off:off + rows, :]

        def mm(a, b):                       # bf16 operands, f32 accumulation (MXU)
            return jnp.dot(a.astype(BF16), b.astype(BF16),
                           preferred_element_type=F32)

        def conv(x, wn, bn, relu=True):     # 1x1 conv stand-in on (rows, C) slabs
            y = mm(x, W(wn)) + B(bn)
            return jnp.maximum(y, 0.0) if relu else y

        # ---- feature extractor stand-in: 1x1 convs + 2x avg pools (pools = row matmuls)
        x0 = x0_ref[...]                                     # (512, 8)   bf16
        f_in = conv(x0, "w1", "b1")                          # (512, 128) real 16
        f1 = conv(mm(pfin_ref[...], f_in), "w2", "b2")       # (128, 128) real 32
        p_f1 = OP(ops128_ref, op128, "p_f1")                 # (32, 128)
        pf1 = mm(p_f1, f1)                                   # (32, 128)  real 32
        f2 = conv(pf1, "w3", "b3")                           # (32, 128)  real 64
        p_f2 = OP(ops32_ref, op32, "p_f2")                   # (8, 32)
        pf2 = mm(p_f2, f2)                                   # (8, 128)   real 64
        f3 = conv(pf2, "w4", "b4")                           # (8, 128)
        f_out = conv(f3, "w5", "b5")                         # (8, 128)

        # ---- RD4AD_bn stand-in: concat(pool4(f1), pool2(f2), f3) -> 1x1 conv + ReLU
        #      pool4 = pool2 o pool2 reuses pf1/p_f2; concat -> one wide-K matmul.
        g1 = mm(p_f2, pf1)                                   # (8, 128)   real 32
        z = conv(jnp.concatenate([g1, pf2, f3], axis=-1), "wb", "bb")   # (8, 128)

        # ---- RD4AD_decoder stand-in: 1x1 conv at LOW res, nearest upsample after
        u2_z = OP(ops8_ref, op8, "u2_z")                     # (32, 8)
        u4_z = OP(ops8_ref, op8, "u4_z")                     # (128, 8)
        d3 = mm(z, W("wd3")) + B("bd3")                      # (8, 128)
        d2 = mm(u2_z, mm(z, W("wd2"))) + B("bd2")            # (32, 128)  real 64
        d1 = mm(u4_z, mm(z, W("wd1"))) + B("bd1")            # (128, 128) real 32

        # ---- loss_fucntion(train=True) + diffmap: L2-normalize over channels, MSE
        #      (elementwise math stays f32; zero-padded lanes contribute nothing)
        def normalize(x):
            ssq = jnp.sum(x * x, axis=-1, keepdims=True)
            return x * jax.lax.rsqrt(jnp.maximum(ssq, 1e-24))   # == x / max(||x||,1e-12)

        def diff_and_mean(a, b, real_elems):
            d = normalize(a) - normalize(b)
            d = d * d
            s = jnp.sum(jnp.sum(d, axis=-1, keepdims=True), axis=0, keepdims=True)
            return d, s * (1.0 / real_elems)

        diff1, m1 = diff_and_mean(f1, d1, n1)                # (128, 128) real (.,32)
        diff2, m2 = diff_and_mean(f2, d2, n2)                # (32, 128)  real (.,64)
        diff3, m3 = diff_and_mean(f3, d3, n3)                # (8, 128)
        loss = m1 + m2 + m3                                  # sum of per-scale MSE means
        loss_ref[...] = jnp.broadcast_to(loss, loss_ref.shape)   # lane-dense (1,128)

        # ---- segmentation Decoder() head stand-in, evaluated at LOW resolution:
        #      up(X) @ W == up(X @ W), and up8/up4 factor through the single 2x u_d1.
        c3 = mm(jnp.concatenate([f_out, diff3], axis=-1), W("wh3"))   # (8, 128)
        c1 = mm(diff1, W("wh_d1"))                                    # (128, 128)
        c2 = mm(diff2, W("wh_d2"))                                    # (32, 128)
        u2_f2f1 = OP(ops32_ref, op32, "u2_f2f1")                      # (128, 32)
        s_f1 = c1 + mm(u4_z, c3) + mm(u2_f2f1, c2)                    # on the f1 grid
        head = (mm(f_in, W("wh_fin"))
                + mm(OP(ops128_ref, op128, "u_d1"), s_f1)
                + B("bh"))                                            # (512, 128), col 0 real
        mask_ref[...] = head

    return kernel


# ----------------------------------------------------------------------------
# Model builder: packs weights / operators into slabs and returns a jitted forward.
# ----------------------------------------------------------------------------
def build_unsupervised(key, n, c, h, w):
    assert c <= 8 and h % 16 == 0 and w % 16 == 0
    h0, w0 = h // 2, w // 2                 # f_in grid (after the first 2x pool)
    rows_in = n * h0 * w0                   # 512
    rows_f1 = n * (h0 // 2) * (w0 // 2)     # 128
    rows_f2 = n * (h0 // 4) * (w0 // 4)     # 32
    rows_f3 = n * (h0 // 8) * (w0 // 8)     # 8

    # --- synthetic stand-in weights (natural sizes), then padded/fused for the slab
    ks = jax.random.split(key, 10)
    w1, b1 = _dense_init(ks[0], c, 16)
    w1 = jnp.pad(w1, ((0, 8 - c), (0, 0)))                  # image channels padded 3->8
    w2, b2 = _dense_init(ks[1], 16, 32)
    w3, b3 = _dense_init(ks[2], 32, 64)
    w4, b4 = _dense_init(ks[3], 64, 128)
    w5, b5 = _dense_init(ks[4], 128, 128)
    wb, bb = _dense_init(ks[5], 32 + 64 + 128, 128)          # bottleneck concat -> 128
    wd1, bd1 = _dense_init(ks[6], 128, 32)
    wd2, bd2 = _dense_init(ks[7], 128, 64)
    wd3, bd3 = _dense_init(ks[8], 128, 128)
    wh, bh = _dense_init(ks[9], 128 + 16 + 32 + 64 + 128, 1)  # head concat(368) -> 1
    wh_fout, wh_fin, wh_d1, wh_d2, wh_d3 = (
        wh[:128], wh[128:144], wh[144:176], wh[176:240], wh[240:368])

    # Bottleneck weight re-laid-out for the 128-wide (zero-padded) activation slabs.
    wb_fused = jnp.zeros((3 * LANES, LANES), F32)
    wb_fused = wb_fused.at[0:32].set(wb[0:32])               # g1   (real 32 ch)
    wb_fused = wb_fused.at[128:192].set(wb[32:96])           # pf2  (real 64 ch)
    wb_fused = wb_fused.at[256:384].set(wb[96:224])          # f3   (real 128 ch)

    # Head weights: f_out/diff3 share M=8 -> fuse into one wide-K weight.
    wh3 = jnp.zeros((2 * LANES, LANES), F32)
    wh3 = wh3.at[0:128, 0:1].set(wh_fout)
    wh3 = wh3.at[128:256, 0:1].set(wh_d3)

    weight_list = [
        ("w1", _embed(w1, 8)),
        ("w2", _embed(w2, 128)), ("w3", _embed(w3, 128)),
        ("w4", _embed(w4, 128)), ("w5", _embed(w5, 128)),
        ("wb", wb_fused),
        ("wd1", _embed(wd1, 128)), ("wd2", _embed(wd2, 128)), ("wd3", _embed(wd3, 128)),
        ("wh3", wh3),
        ("wh_d1", _embed(wh_d1, 128)), ("wh_d2", _embed(wh_d2, 128)),
        ("wh_fin", _embed(wh_fin, 128)),
    ]
    w_slab, wseg = _pack_rows(weight_list, dtype=BF16)

    # Bias slab: one bias per 8-row stride (f32; added to f32 accumulators).
    bias_list = [("b1", b1), ("b2", b2), ("b3", b3), ("b4", b4), ("b5", b5),
                 ("bb", bb), ("bd1", bd1), ("bd2", bd2), ("bd3", bd3), ("bh", bh)]
    b_slab = jnp.zeros((8 * len(bias_list), LANES), F32)
    bias_row = {}
    for i, (nm, b) in enumerate(bias_list):
        b_slab = b_slab.at[8 * i, :b.shape[1]].set(b[0])
        bias_row[nm] = 8 * i

    # Pool / upsample operators (only 2x primitives; 4x/8x are composed in-kernel).
    p_fin = _pool_matrix(n, h0, w0, 2).astype(BF16)               # (128, 512)
    p_f1 = _pool_matrix(n, h0 // 2, w0 // 2, 2)                   # (32, 128)
    p_f2 = _pool_matrix(n, h0 // 4, w0 // 4, 2)                   # (8, 32)
    u2_z = _upsample_matrix(n, h0 // 8, w0 // 8, 2)               # (32, 8)
    u4_z = _upsample_matrix(n, h0 // 8, w0 // 8, 4)               # (128, 8)
    u2_f2f1 = _upsample_matrix(n, h0 // 4, w0 // 4, 2)            # (128, 32)
    u_d1 = _upsample_matrix(n, h0 // 2, w0 // 2, 2)               # (512, 128)

    ops128_slab, op128_seg = _pack_rows([("u_d1", u_d1), ("p_f1", p_f1)], BF16)
    ops32_slab, op32_seg = _pack_rows([("u2_f2f1", u2_f2f1), ("p_f2", p_f2)], BF16)
    ops8_slab, op8_seg = _pack_rows([("u4_z", u4_z), ("u2_z", u2_z)], BF16)

    layout = dict(wseg=wseg, bias_row=bias_row,
                  op128=op128_seg, op32=op32_seg, op8=op8_seg,
                  n1=rows_f1 * 32, n2=rows_f2 * 64, n3=rows_f3 * 128)
    arrays = dict(w=w_slab, b=b_slab, ops128=ops128_slab, ops32=ops32_slab,
                  ops8=ops8_slab, p_fin=p_fin)

    kernel = _make_kernel(layout)
    vmem_spec = pl.BlockSpec(memory_space=pltpu.MemorySpace.VMEM)

    def forward(arrs, normal_img):
        # NCHW -> NHWC once, initial 2x2 avg pool, pad channels c -> 8, flatten, bf16.
        x = jnp.transpose(normal_img, (0, 2, 3, 1))
        x = x.reshape(n, h0, 2, w0, 2, c).mean(axis=(2, 4))
        x = jnp.pad(x, ((0, 0), (0, 0), (0, 0), (0, 8 - c)))
        x0 = x.reshape(rows_in, 8).astype(BF16)

        mask2d, loss_row = pl.pallas_call(
            kernel,
            in_specs=[vmem_spec] * 7,
            out_specs=(vmem_spec, vmem_spec),
            out_shape=(jax.ShapeDtypeStruct((rows_in, LANES), F32),
                       jax.ShapeDtypeStruct((1, LANES), F32)),
        )(x0, arrs["w"], arrs["b"], arrs["ops128"], arrs["ops32"],
          arrs["ops8"], arrs["p_fin"])

        predicted_mask = jnp.transpose(
            mask2d[:, :1].reshape(n, h0, w0, 1), (0, 3, 1, 2))   # (N, 1, H/2, W/2)
        distill_loss = loss_row[0, 0]
        return predicted_mask, distill_loss

    return arrays, jax.jit(forward)


# ----------------------------------------------------------------------------
if __name__ == "__main__":
    key = jax.random.PRNGKey(0)
    k_param, k_img = jax.random.split(key)

    N, C, H, W = 2, 3, 32, 32
    arrays, forward = build_unsupervised(k_param, N, C, H, W)
    normal_img = jax.random.normal(k_img, (N, C, H, W), F32)

    predicted_mask, distill_loss = forward(arrays, normal_img)
    jax.block_until_ready(predicted_mask)
    jax.block_until_ready(distill_loss)

    assert predicted_mask.shape == (N, 1, H // 2, W // 2)
    assert distill_loss.shape == ()
    assert bool(jnp.isfinite(distill_loss))
    print("KERNEL_OK")
</pallas_src>

<mosaic_0001>
module attributes {stable_mosaic.version = 11 : i64} {
  func.func @kernel(%arg0: memref<512x8xbf16, #tpu.memory_space<vmem>>, %arg1: memref<1936x128xbf16, #tpu.memory_space<vmem>>, %arg2: memref<80x128xf32, #tpu.memory_space<vmem>>, %arg3: memref<544x128xbf16, #tpu.memory_space<vmem>>, %arg4: memref<144x32xbf16, #tpu.memory_space<vmem>>, %arg5: memref<160x8xbf16, #tpu.memory_space<vmem>>, %arg6: memref<128x512xbf16, #tpu.memory_space<vmem>>, %arg7: memref<512x128xf32, #tpu.memory_space<vmem>>, %arg8: memref<1x128xf32, #tpu.memory_space<vmem>>) attributes {dimension_semantics = [], scalar_prefetch = 0 : i64, scratch_operands = 0 : i64, tpu.core_type = #tpu.core_type<tc>} {
    %c0 = arith.constant 0 : index
    %c0_0 = arith.constant 0 : index
    %0 = vector.load %arg0[%c0, %c0_0] : memref<512x8xbf16, #tpu.memory_space<vmem>>, vector<512x8xbf16>
    %c0_1 = arith.constant 0 : index
    %c0_2 = arith.constant 0 : index
    %1 = vector.load %arg1[%c0_1, %c0_2] : memref<1936x128xbf16, #tpu.memory_space<vmem>>, vector<8x128xbf16>
    %cst = arith.constant dense<0.000000e+00> : vector<512x128xf32>
    %2 = tpu.matmul %0, %1, %cst {dimension_numbers = #tpu.dot_dimension_numbers<[1], [0], [0], [1], [0, 0, 1, 1], [], []>} : vector<512x8xbf16>, vector<8x128xbf16>, vector<512x128xf32> -> vector<512x128xf32>
    %c0_3 = arith.constant 0 : index
    %c0_4 = arith.constant 0 : index
    %3 = vector.load %arg2[%c0_3, %c0_4] : memref<80x128xf32, #tpu.memory_space<vmem>>, vector<1x128xf32>
    %4 = vector.broadcast %3 : vector<1x128xf32> to vector<512x128xf32>
    %5 = arith.addf %2, %4 : vector<512x128xf32>
    %cst_5 = arith.constant 0.000000e+00 : f32
    %6 = vector.broadcast %cst_5 : f32 to vector<512x128xf32>
    %7 = arith.maximumf %5, %6 : vector<512x128xf32>
    %c0_6 = arith.constant 0 : index
    %c0_7 = arith.constant 0 : index
    %8 = vector.load %arg6[%c0_6, %c0_7] : memref<128x512xbf16, #tpu.memory_space<vmem>>, vector<128x512xbf16>
    %9 = arith.truncf %7 : vector<512x128xf32> to vector<512x128xbf16>
    %cst_8 = arith.constant dense<0.000000e+00> : vector<128x128xf32>
    %10 = tpu.matmul %8, %9, %cst_8 {dimension_numbers = #tpu.dot_dimension_numbers<[1], [0], [0], [1], [0, 0, 1, 1], [], []>} : vector<128x512xbf16>, vector<512x128xbf16>, vector<128x128xf32> -> vector<128x128xf32>
    %c16 = arith.constant 16 : index
    %c0_9 = arith.constant 0 : index
    %11 = vector.load %arg1[%c16, %c0_9] : memref<1936x128xbf16, #tpu.memory_space<vmem>>, vector<128x128xbf16>
    %12 = arith.truncf %10 : vector<128x128xf32> to vector<128x128xbf16>
    %cst_10 = arith.constant dense<0.000000e+00> : vector<128x128xf32>
    %13 = tpu.matmul %12, %11, %cst_10 {dimension_numbers = #tpu.dot_dimension_numbers<[1], [0], [0], [1], [0, 0, 1, 1], [], []>} : vector<128x128xbf16>, vector<128x128xbf16>, vector<128x128xf32> -> vector<128x128xf32>
    %c8 = arith.constant 8 : index
    %c0_11 = arith.constant 0 : index
    %14 = vector.load %arg2[%c8, %c0_11] : memref<80x128xf32, #tpu.memory_space<vmem>>, vector<1x128xf32>
    %15 = vector.broadcast %14 : vector<1x128xf32> to vector<128x128xf32>
    %16 = arith.addf %13, %15 : vector<128x128xf32>
    %cst_12 = arith.constant 0.000000e+00 : f32
    %17 = vector.broadcast %cst_12 : f32 to vector<128x128xf32>
    %18 = arith.maximumf %16, %17 : vector<128x128xf32>
    %c512 = arith.constant 512 : index
    %c0_13 = arith.constant 0 : index
    %19 = vector.load %arg3[%c512, %c0_13] : memref<544x128xbf16, #tpu.memory_space<vmem>>, vector<32x128xbf16>
    %20 = arith.truncf %18 : vector<128x128xf32> to vector<128x128xbf16>
    %cst_14 = arith.constant dense<0.000000e+00> : vector<32x128xf32>
    %21 = tpu.matmul %19, %20, %cst_14 {dimension_numbers = #tpu.dot_dimension_numbers<[1], [0], [0], [1], [0, 0, 1, 1], [], []>} : vector<32x128xbf16>, vector<128x128xbf16>, vector<32x128xf32> -> vector<32x128xf32>
    %c144 = arith.constant 144 : index
    %c0_15 = arith.constant 0 : index
    %22 = vector.load %arg1[%c144, %c0_15] : memref<1936x128xbf16, #tpu.memory_space<vmem>>, vector<128x128xbf16>
    %23 = arith.truncf %21 : vector<32x128xf32> to vector<32x128xbf16>
    %cst_16 = arith.constant dense<0.000000e+00> : vector<32x128xf32>
    %24 = tpu.matmul %23, %22, %cst_16 {dimension_numbers = #tpu.dot_dimension_numbers<[1], [0], [0], [1], [0, 0, 1, 1], [], []>} : vector<32x128xbf16>, vector<128x128xbf16>, vector<32x128xf32> -> vector<32x128xf32>
    %c16_17 = arith.constant 16 : index
    %c0_18 = arith.constant 0 : index
    %25 = vector.load %arg2[%c16_17, %c0_18] : memref<80x128xf32, #tpu.memory_space<vmem>>, vector<1x128xf32>
    %26 = vector.broadcast %25 : vector<1x128xf32> to vector<32x128xf32>
    %27 = arith.addf %24, %26 : vector<32x128xf32>
    %cst_19 = arith.constant 0.000000e+00 : f32
    %28 = vector.broadcast %cst_19 : f32 to vector<32x128xf32>
    %29 = arith.maximumf %27, %28 : vector<32x128xf32>
    %c128 = arith.constant 128 : index
    %c0_20 = arith.constant 0 : index
    %30 = vector.load %arg4[%c128, %c0_20] : memref<144x32xbf16, #tpu.memory_space<vmem>>, vector<8x32xbf16>
    %31 = arith.truncf %29 : vector<32x128xf32> to vector<32x128xbf16>
    %cst_21 = arith.constant dense<0.000000e+00> : vector<8x128xf32>
    %32 = tpu.matmul %30, %31, %cst_21 {dimension_numbers = #tpu.dot_dimension_numbers<[1], [0], [0], [1], [0, 0, 1, 1], [], []>} : vector<8x32xbf16>, vector<32x128xbf16>, vector<8x128xf32> -> vector<8x128xf32>
    %c272 = arith.constant 272 : index
    %c0_22 = arith.constant 0 : index
    %33 = vector.load %arg1[%c272, %c0_22] : memref<1936x128xbf16, #tpu.memory_space<vmem>>, vector<128x128xbf16>
    %34 = arith.truncf %32 : vector<8x128xf32> to vector<8x128xbf16>
    %cst_23 = arith.constant dense<0.000000e+00> : vector<8x128xf32>
    %35 = tpu.matmul %34, %33, %cst_23 {dimension_numbers = #tpu.dot_dimension_numbers<[1], [0], [0], [1], [0, 0, 1, 1], [], []>} : vector<8x128xbf16>, vector<128x128xbf16>, vector<8x128xf32> -> vector<8x128xf32>
    %c24 = arith.constant 24 : index
    %c0_24 = arith.constant 0 : index
    %36 = vector.load %arg2[%c24, %c0_24] : memref<80x128xf32, #tpu.memory_space<vmem>>, vector<1x128xf32>
    %37 = vector.broadcast %36 : vector<1x128xf32> to vector<8x128xf32>
    %38 = arith.addf %35, %37 : vector<8x128xf32>
    %cst_25 = arith.constant 0.000000e+00 : f32
    %39 = vector.broadcast %cst_25 : f32 to vector<8x128xf32>
    %40 = arith.maximumf %38, %39 : vector<8x128xf32>
    %c400 = arith.constant 400 : index
    %c0_26 = arith.constant 0 : index
    %41 = vector.load %arg1[%c400, %c0_26] : memref<1936x128xbf16, #tpu.memory_space<vmem>>, vector<128x128xbf16>
    %42 = arith.truncf %40 : vector<8x128xf32> to vector<8x128xbf16>
    %cst_27 = arith.constant dense<0.000000e+00> : vector<8x128xf32>
    %43 = tpu.matmul %42, %41, %cst_27 {dimension_numbers = #tpu.dot_dimension_numbers<[1], [0], [0], [1], [0, 0, 1, 1], [], []>} : vector<8x128xbf16>, vector<128x128xbf16>, vector<8x128xf32> -> vector<8x128xf32>
    %c32 = arith.constant 32 : index
    %c0_28 = arith.constant 0 : index
    %44 = vector.load %arg2[%c32, %c0_28] : memref<80x128xf32, #tpu.memory_space<vmem>>, vector<1x128xf32>
    %45 = vector.broadcast %44 : vector<1x128xf32> to vector<8x128xf32>
    %46 = arith.addf %43, %45 : vector<8x128xf32>
    %cst_29 = arith.constant 0.000000e+00 : f32
    %47 = vector.broadcast %cst_29 : f32 to vector<8x128xf32>
    %48 = arith.maximumf %46, %47 : vector<8x128xf32>
    %49 = arith.truncf %21 : vector<32x128xf32> to vector<32x128xbf16>
    %cst_30 = arith.constant dense<0.000000e+00> : vector<8x128xf32>
    %50 = tpu.matmul %30, %49, %cst_30 {dimension_numbers = #tpu.dot_dimension_numbers<[1], [0], [0], [1], [0, 0, 1, 1], [], []>} : vector<8x32xbf16>, vector<32x128xbf16>, vector<8x128xf32> -> vector<8x128xf32>
    %51 = tpu.concatenate %50, %32, %40 in 1 : vector<8x128xf32>, vector<8x128xf32>, vector<8x128xf32> -> vector<8x384xf32>
    %c528 = arith.constant 528 : index
    %c0_31 = arith.constant 0 : index
    %52 = vector.load %arg1[%c528, %c0_31] : memref<1936x128xbf16, #tpu.memory_space<vmem>>, vector<384x128xbf16>
    %53 = arith.truncf %51 : vector<8x384xf32> to vector<8x384xbf16>
    %cst_32 = arith.constant dense<0.000000e+00> : vector<8x128xf32>
    %54 = tpu.matmul %53, %52, %cst_32 {dimension_numbers = #tpu.dot_dimension_numbers<[1], [0], [0], [1], [0, 0, 1, 1], [], []>} : vector<8x384xbf16>, vector<384x128xbf16>, vector<8x128xf32> -> vector<8x128xf32>
    %c40 = arith.constant 40 : index
    %c0_33 = arith.constant 0 : index
    %55 = vector.load %arg2[%c40, %c0_33] : memref<80x128xf32, #tpu.memory_space<vmem>>, vector<1x128xf32>
    %56 = vector.broadcast %55 : vector<1x128xf32> to vector<8x128xf32>
    %57 = arith.addf %54, %56 : vector<8x128xf32>
    %cst_34 = arith.constant 0.000000e+00 : f32
    %58 = vector.broadcast %cst_34 : f32 to vector<8x128xf32>
    %59 = arith.maximumf %57, %58 : vector<8x128xf32>
    %c128_35 = arith.constant 128 : index
    %c0_36 = arith.constant 0 : index
    %60 = vector.load %arg5[%c128_35, %c0_36] : memref<160x8xbf16, #tpu.memory_space<vmem>>, vector<32x8xbf16>
    %c0_37 = arith.constant 0 : index
    %c0_38 = arith.constant 0 : index
    %61 = vector.load %arg5[%c0_37, %c0_38] : memref<160x8xbf16, #tpu.memory_space<vmem>>, vector<128x8xbf16>
    %c1168 = arith.constant 1168 : index
    %c0_39 = arith.constant 0 : index
    %62 = vector.load %arg1[%c1168, %c0_39] : memref<1936x128xbf16, #tpu.memory_space<vmem>>, vector<128x128xbf16>
    %63 = arith.truncf %59 : vector<8x128xf32> to vector<8x128xbf16>
    %cst_40 = arith.constant dense<0.000000e+00> : vector<8x128xf32>
    %64 = tpu.matmul %63, %62, %cst_40 {dimension_numbers = #tpu.dot_dimension_numbers<[1], [0], [0], [1], [0, 0, 1, 1], [], []>} : vector<8x128xbf16>, vector<128x128xbf16>, vector<8x128xf32> -> vector<8x128xf32>
    %c64 = arith.constant 64 : index
    %c0_41 = arith.constant 0 : index
    %65 = vector.load %arg2[%c64, %c0_41] : memref<80x128xf32, #tpu.memory_space<vmem>>, vector<1x128xf32>
    %66 = vector.broadcast %65 : vector<1x128xf32> to vector<8x128xf32>
    %67 = arith.addf %64, %66 : vector<8x128xf32>
    %c1040 = arith.constant 1040 : index
    %c0_42 = arith.constant 0 : index
    %68 = vector.load %arg1[%c1040, %c0_42] : memref<1936x128xbf16, #tpu.memory_space<vmem>>, vector<128x128xbf16>
    %69 = arith.truncf %59 : vector<8x128xf32> to vector<8x128xbf16>
    %cst_43 = arith.constant dense<0.000000e+00> : vector<8x128xf32>
    %70 = tpu.matmul %69, %68, %cst_43 {dimension_numbers = #tpu.dot_dimension_numbers<[1], [0], [0], [1], [0, 0, 1, 1], [], []>} : vector<8x128xbf16>, vector<128x128xbf16>, vector<8x128xf32> -> vector<8x128xf32>
    %71 = arith.truncf %70 : vector<8x128xf32> to vector<8x128xbf16>
    %cst_44 = arith.constant dense<0.000000e+00> : vector<32x128xf32>
    %72 = tpu.matmul %60, %71, %cst_44 {dimension_numbers = #tpu.dot_dimension_numbers<[1], [0], [0], [1], [0, 0, 1, 1], [], []>} : vector<32x8xbf16>, vector<8x128xbf16>, vector<32x128xf32> -> vector<32x128xf32>
    %c56 = arith.constant 56 : index
    %c0_45 = arith.constant 0 : index
    %73 = vector.load %arg2[%c56, %c0_45] : memref<80x128xf32, #tpu.memory_space<vmem>>, vector<1x128xf32>
    %74 = vector.broadcast %73 : vector<1x128xf32> to vector<32x128xf32>
    %75 = arith.addf %72, %74 : vector<32x128xf32>
    %c912 = arith.constant 912 : index
    %c0_46 = arith.constant 0 : index
    %76 = vector.load %arg1[%c912, %c0_46] : memref<1936x128xbf16, #tpu.memory_space<vmem>>, vector<128x128xbf16>
    %77 = arith.truncf %59 : vector<8x128xf32> to vector<8x128xbf16>
    %cst_47 = arith.constant dense<0.000000e+00> : vector<8x128xf32>
    %78 = tpu.matmul %77, %76, %cst_47 {dimension_numbers = #tpu.dot_dimension_numbers<[1], [0], [0], [1], [0, 0, 1, 1], [], []>} : vector<8x128xbf16>, vector<128x128xbf16>, vector<8x128xf32> -> vector<8x128xf32>
    %79 = arith.truncf %78 : vector<8x128xf32> to vector<8x128xbf16>
    %cst_48 = arith.constant dense<0.000000e+00> : vector<128x128xf32>
    %80 = tpu.matmul %61, %79, %cst_48 {dimension_numbers = #tpu.dot_dimension_numbers<[1], [0], [0], [1], [0, 0, 1, 1], [], []>} : vector<128x8xbf16>, vector<8x128xbf16>, vector<128x128xf32> -> vector<128x128xf32>
    %c48 = arith.constant 48 : index
    %c0_49 = arith.constant 0 : index
    %81 = vector.load %arg2[%c48, %c0_49] : memref<80x128xf32, #tpu.memory_space<vmem>>, vector<1x128xf32>
    %82 = vector.broadcast %81 : vector<1x128xf32> to vector<128x128xf32>
    %83 = arith.addf %80, %82 : vector<128x128xf32>
    %84 = arith.mulf %18, %18 : vector<128x128xf32>
    %cst_50 = arith.constant dense<0.000000e+00> : vector<128xf32>
    %85 = vector.multi_reduction <add>, %84, %cst_50 [1] : vector<128x128xf32> to vector<128xf32>
    %86 = vector.shape_cast %85 : vector<128xf32> to vector<128x1xf32>
    %cst_51 = arith.constant 1.000000e-24 : f32
    %87 = vector.broadcast %cst_51 : f32 to vector<128x1xf32>
    %88 = arith.maximumf %86, %87 : vector<128x1xf32>
    %89 = math.rsqrt %88 : vector<128x1xf32>
    %90 = vector.broadcast %89 : vector<128x1xf32> to vector<128x128xf32>
    %91 = arith.mulf %18, %90 : vector<128x128xf32>
    %92 = arith.mulf %83, %83 : vector<128x128xf32>
    %cst_52 = arith.constant dense<0.000000e+00> : vector<128xf32>
    %93 = vector.multi_reduction <add>, %92, %cst_52 [1] : vector<128x128xf32> to vector<128xf32>
    %94 = vector.shape_cast %93 : vector<128xf32> to vector<128x1xf32>
    %cst_53 = arith.constant 1.000000e-24 : f32
    %95 = vector.broadcast %cst_53 : f32 to vector<128x1xf32>
    %96 = arith.maximumf %94, %95 : vector<128x1xf32>
    %97 = math.rsqrt %96 : vector<128x1xf32>
    %98 = vector.broadcast %97 : vector<128x1xf32> to vector<128x128xf32>
    %99 = arith.mulf %83, %98 : vector<128x128xf32>
    %100 = arith.subf %91, %99 : vector<128x128xf32>
    %101 = arith.mulf %100, %100 : vector<128x128xf32>
    %cst_54 = arith.constant dense<0.000000e+00> : vector<128xf32>
    %102 = vector.multi_reduction <add>, %101, %cst_54 [1] : vector<128x128xf32> to vector<128xf32>
    %103 = vector.shape_cast %102 : vector<128xf32> to vector<128x1xf32>
    %cst_55 = arith.constant dense<0.000000e+00> : vector<1xf32>
    %104 = vector.multi_reduction <add>, %103, %cst_55 [0] : vector<128x1xf32> to vector<1xf32>
    %105 = vector.shape_cast %104 : vector<1xf32> to vector<1x1xf32>
    %cst_56 = arith.constant 2.44140625E-4 : f32
    %106 = vector.broadcast %cst_56 : f32 to vector<1x1xf32>
    %107 = arith.mulf %105, %106 : vector<1x1xf32>
    %108 = arith.mulf %29, %29 : vector<32x128xf32>
    %cst_57 = arith.constant dense<0.000000e+00> : vector<32xf32>
    %109 = vector.multi_reduction <add>, %108, %cst_57 [1] : vector<32x128xf32> to vector<32xf32>
    %110 = vector.shape_cast %109 : vector<32xf32> to vector<32x1xf32>
    %cst_58 = arith.constant 1.000000e-24 : f32
    %111 = vector.broadcast %cst_58 : f32 to vector<32x1xf32>
    %112 = arith.maximumf %110, %111 : vector<32x1xf32>
    %113 = math.rsqrt %112 : vector<32x1xf32>
    %114 = vector.broadcast %113 : vector<32x1xf32> to vector<32x128xf32>
    %115 = arith.mulf %29, %114 : vector<32x128xf32>
    %116 = arith.mulf %75, %75 : vector<32x128xf32>
    %cst_59 = arith.constant dense<0.000000e+00> : vector<32xf32>
    %117 = vector.multi_reduction <add>, %116, %cst_59 [1] : vector<32x128xf32> to vector<32xf32>
    %118 = vector.shape_cast %117 : vector<32xf32> to vector<32x1xf32>
    %cst_60 = arith.constant 1.000000e-24 : f32
    %119 = vector.broadcast %cst_60 : f32 to vector<32x1xf32>
    %120 = arith.maximumf %118, %119 : vector<32x1xf32>
    %121 = math.rsqrt %120 : vector<32x1xf32>
    %122 = vector.broadcast %121 : vector<32x1xf32> to vector<32x128xf32>
    %123 = arith.mulf %75, %122 : vector<32x128xf32>
    %124 = arith.subf %115, %123 : vector<32x128xf32>
    %125 = arith.mulf %124, %124 : vector<32x128xf32>
    %cst_61 = arith.constant dense<0.000000e+00> : vector<32xf32>
    %126 = vector.multi_reduction <add>, %125, %cst_61 [1] : vector<32x128xf32> to vector<32xf32>
    %127 = vector.shape_cast %126 : vector<32xf32> to vector<32x1xf32>
    %cst_62 = arith.constant dense<0.000000e+00> : vector<1xf32>
    %128 = vector.multi_reduction <add>, %127, %cst_62 [0] : vector<32x1xf32> to vector<1xf32>
    %129 = vector.shape_cast %128 : vector<1xf32> to vector<1x1xf32>
    %cst_63 = arith.constant 4.8828125E-4 : f32
    %130 = vector.broadcast %cst_63 : f32 to vector<1x1xf32>
    %131 = arith.mulf %129, %130 : vector<1x1xf32>
    %132 = arith.mulf %40, %40 : vector<8x128xf32>
    %cst_64 = arith.constant dense<0.000000e+00> : vector<8xf32>
    %133 = vector.multi_reduction <add>, %132, %cst_64 [1] : vector<8x128xf32> to vector<8xf32>
    %134 = vector.shape_cast %133 : vector<8xf32> to vector<8x1xf32>
    %cst_65 = arith.constant 1.000000e-24 : f32
    %135 = vector.broadcast %cst_65 : f32 to vector<8x1xf32>
    %136 = arith.maximumf %134, %135 : vector<8x1xf32>
    %137 = math.rsqrt %136 : vector<8x1xf32>
    %138 = vector.broadcast %137 : vector<8x1xf32> to vector<8x128xf32>
    %139 = arith.mulf %40, %138 : vector<8x128xf32>
    %140 = arith.mulf %67, %67 : vector<8x128xf32>
    %cst_66 = arith.constant dense<0.000000e+00> : vector<8xf32>
    %141 = vector.multi_reduction <add>, %140, %cst_66 [1] : vector<8x128xf32> to vector<8xf32>
    %142 = vector.shape_cast %141 : vector<8xf32> to vector<8x1xf32>
    %cst_67 = arith.constant 1.000000e-24 : f32
    %143 = vector.broadcast %cst_67 : f32 to vector<8x1xf32>
    %144 = arith.maximumf %142, %143 : vector<8x1xf32>
    %145 = math.rsqrt %144 : vector<8x1xf32>
    %146 = vector.broadcast %145 : vector<8x1xf32> to vector<8x128xf32>
    %147 = arith.mulf %67, %146 : vector<8x128xf32>
    %148 = arith.subf %139, %147 : vector<8x128xf32>
    %149 = arith.mulf %148, %148 : vector<8x128xf32>
    %cst_68 = arith.constant dense<0.000000e+00> : vector<8xf32>
    %150 = vector.multi_reduction <add>, %149, %cst_68 [1] : vector<8x128xf32> to vector<8xf32>
    %151 = vector.shape_cast %150 : vector<8xf32> to vector<8x1xf32>
    %cst_69 = arith.constant dense<0.000000e+00> : vector<1xf32>
    %152 = vector.multi_reduction <add>, %151, %cst_69 [0] : vector<8x1xf32> to vector<1xf32>
    %153 = vector.shape_cast %152 : vector<1xf32> to vector<1x1xf32>
    %cst_70 = arith.constant 9.765625E-4 : f32
    %154 = vector.broadcast %cst_70 : f32 to vector<1x1xf32>
    %155 = arith.mulf %153, %154 : vector<1x1xf32>
    %156 = arith.addf %107, %131 : vector<1x1xf32>
    %157 = arith.addf %156, %155 : vector<1x1xf32>
    %158 = vector.shape_cast %157 : vector<1x1xf32> to vector<1x1xf32>
    %159 = vector.broadcast %158 : vector<1x1xf32> to vector<1x128xf32>
    %c0_71 = arith.constant 0 : index
    %c0_72 = arith.constant 0 : index
    %160 = vector.load %arg8[%c0_71, %c0_72] : memref<1x128xf32, #tpu.memory_space<vmem>>, vector<1x128xf32>
    tpu.vector_store %arg8[%c0_71, %c0_72], %159 {strides = array<i32>} : memref<1x128xf32, #tpu.memory_space<vmem>>, vector<1x128xf32>,
    %161 = tpu.concatenate %48, %149 in 1 : vector<8x128xf32>, vector<8x128xf32> -> vector<8x256xf32>
    %c1296 = arith.constant 1296 : index
    %c0_73 = arith.constant 0 : index
    %162 = vector.load %arg1[%c1296, %c0_73] : memref<1936x128xbf16, #tpu.memory_space<vmem>>, vector<256x128xbf16>
    %163 = arith.truncf %161 : vector<8x256xf32> to vector<8x256xbf16>
    %cst_74 = arith.constant dense<0.000000e+00> : vector<8x128xf32>
    %164 = tpu.matmul %163, %162, %cst_74 {dimension_numbers = #tpu.dot_dimension_numbers<[1], [0], [0], [1], [0, 0, 1, 1], [], []>} : vector<8x256xbf16>, vector<256x128xbf16>, vector<8x128xf32> -> vector<8x128xf32>
    %c1552 = arith.constant 1552 : index
    %c0_75 = arith.constant 0 : index
    %165 = vector.load %arg1[%c1552, %c0_75] : memref<1936x128xbf16, #tpu.memory_space<vmem>>, vector<128x128xbf16>
    %166 = arith.truncf %101 : vector<128x128xf32> to vector<128x128xbf16>
    %cst_76 = arith.constant dense<0.000000e+00> : vector<128x128xf32>
    %167 = tpu.matmul %166, %165, %cst_76 {dimension_numbers = #tpu.dot_dimension_numbers<[1], [0], [0], [1], [0, 0, 1, 1], [], []>} : vector<128x128xbf16>, vector<128x128xbf16>, vector<128x128xf32> -> vector<128x128xf32>
    %c1680 = arith.constant 1680 : index
    %c0_77 = arith.constant 0 : index
    %168 = vector.load %arg1[%c1680, %c0_77] : memref<1936x128xbf16, #tpu.memory_space<vmem>>, vector<128x128xbf16>
    %169 = arith.truncf %125 : vector<32x128xf32> to vector<32x128xbf16>
    %cst_78 = arith.constant dense<0.000000e+00> : vector<32x128xf32>
    %170 = tpu.matmul %169, %168, %cst_78 {dimension_numbers = #tpu.dot_dimension_numbers<[1], [0], [0], [1], [0, 0, 1, 1], [], []>} : vector<32x128xbf16>, vector<128x128xbf16>, vector<32x128xf32> -> vector<32x128xf32>
    %c0_79 = arith.constant 0 : index
    %c0_80 = arith.constant 0 : index
    %171 = vector.load %arg4[%c0_79, %c0_80] : memref<144x32xbf16, #tpu.memory_space<vmem>>, vector<128x32xbf16>
    %172 = arith.truncf %164 : vector<8x128xf32> to vector<8x128xbf16>
    %cst_81 = arith.constant dense<0.000000e+00> : vector<128x128xf32>
    %173 = tpu.matmul %61, %172, %cst_81 {dimension_numbers = #tpu.dot_dimension_numbers<[1], [0], [0], [1], [0, 0, 1, 1], [], []>} : vector<128x8xbf16>, vector<8x128xbf16>, vector<128x128xf32> -> vector<128x128xf32>
    %174 = arith.addf %167, %173 : vector<128x128xf32>
    %175 = arith.truncf %170 : vector<32x128xf32> to vector<32x128xbf16>
    %cst_82 = arith.constant dense<0.000000e+00> : vector<128x128xf32>
    %176 = tpu.matmul %171, %175, %cst_82 {dimension_numbers = #tpu.dot_dimension_numbers<[1], [0], [0], [1], [0, 0, 1, 1], [], []>} : vector<128x32xbf16>, vector<32x128xbf16>, vector<128x128xf32> -> vector<128x128xf32>
    %177 = arith.addf %174, %176 : vector<128x128xf32>
    %c1808 = arith.constant 1808 : index
    %c0_83 = arith.constant 0 : index
    %178 = vector.load %arg1[%c1808, %c0_83] : memref<1936x128xbf16, #tpu.memory_space<vmem>>, vector<128x128xbf16>
    %179 = arith.truncf %7 : vector<512x128xf32> to vector<512x128xbf16>
    %cst_84 = arith.constant dense<0.000000e+00> : vector<512x128xf32>
    %180 = tpu.matmul %179, %178, %cst_84 {dimension_numbers = #tpu.dot_dimension_numbers<[1], [0], [0], [1], [0, 0, 1, 1], [], []>} : vector<512x128xbf16>, vector<128x128xbf16>, vector<512x128xf32> -> vector<512x128xf32>
    %c0_85 = arith.constant 0 : index
    %c0_86 = arith.constant 0 : index
    %181 = vector.load %arg3[%c0_85, %c0_86] : memref<544x128xbf16, #tpu.memory_space<vmem>>, vector<512x128xbf16>
    %182 = arith.truncf %177 : vector<128x128xf32> to vector<128x128xbf16>
    %cst_87 = arith.constant dense<0.000000e+00> : vector<512x128xf32>
    %183 = tpu.matmul %181, %182, %cst_87 {dimension_numbers = #tpu.dot_dimension_numbers<[1], [0], [0], [1], [0, 0, 1, 1], [], []>} : vector<512x128xbf16>, vector<128x128xbf16>, vector<512x128xf32> -> vector<512x128xf32>
    %184 = arith.addf %180, %183 : vector<512x128xf32>
    %c72 = arith.constant 72 : index
    %c0_88 = arith.constant 0 : index
    %185 = vector.load %arg2[%c72, %c0_88] : memref<80x128xf32, #tpu.memory_space<vmem>>, vector<1x128xf32>
    %186 = vector.broadcast %185 : vector<1x128xf32> to vector<512x128xf32>
    %187 = arith.addf %184, %186 : vector<512x128xf32>
    %c0_89 = arith.constant 0 : index
    %c0_90 = arith.constant 0 : index
    %188 = vector.load %arg7[%c0_89, %c0_90] : memref<512x128xf32, #tpu.memory_space<vmem>>, vector<512x128xf32>
    tpu.vector_store %arg7[%c0_89, %c0_90], %187 {strides = array<i32>} : memref<512x128xf32, #tpu.memory_space<vmem>>, vector<512x128xf32>,
    return
  }
}

</mosaic_0001>

<bundles_post_ra>
// kernel: forward.1
= control target key start
LH: loop header
LB: loop body
LE: loop exit
PB: predicated region body
PF: predicated region fallthrough
CT: control target
= control target key end

     0   :  { %vm357_vm0 = vcmask 1043456   ;;  %vm260_vm1 = vcmask 64512   ;;  %s8404_s0 = inlined_call_operand.vmem [shape: bf16[512,8], index: 0, kind: input, shape index: {}]   ;;  %s8405_s1 = inlined_call_operand.vmem [shape: bf16[1936,128], index: 1, kind: input, shape index: {}]   ;;  %s8406_s2 = inlined_call_operand.vmem [shape: f32[80,128], index: 2, kind: input, shape index: {}]   ;;  %s8407_s3 = inlined_call_operand.vmem [shape: bf16[544,128], index: 3, kind: input, shape index: {}]   ;;  %s8408_s4 = inlined_call_operand.vmem [shape: bf16[144,32], index: 4, kind: input, shape index: {}]   ;;  %s8409_s5 = inlined_call_operand.vmem [shape: bf16[160,8], index: 5, kind: input, shape index: {}]   ;;  %s8410_s6 = inlined_call_operand.vmem [shape: bf16[128,512], index: 6, kind: input, shape index: {}]   ;;  %s8411_s7 = inlined_call_operand.vmem [shape: f32[512,128], index: 7, kind: output, shape index: {0}]   ;;  %s8412_s8 = inlined_call_operand.hbm [shape: f32[1,128], index: 8, kind: output, shape index: {1}]  }
   0x1   :  { %v94_v0 = vld [vmem:[%s8405_s1] sm:$0xf]  ;;  %v6270_v3 = vld [vmem:[%s8404_s0 + $0x8] sm:$0xff]   ;;  %v6271_v4 = vld [vmem:[%s8404_s0 + $0x10] sm:$0xff]  }
   0x2   :  { %v6269_v1 = vld [vmem:[%s8404_s0] sm:$0xff]   ;;  %6262 = vmatprep.subr.msk.bf16.mxu1 %vm357_vm0, %v94_v0  ;;  %v359_v2 = vsel %vm357_vm0, %v94_v0, 0  ;;  %v6272_v5 = vld [vmem:[%s8404_s0 + $0x18] sm:$0xff]   ;;  %v6274_v7 = vld [vmem:[%s8404_s0 + $0x28] sm:$0xff]  }
   0x3   :  { %5619 = vmatpush3.bf16.msra.mxu1 %v359_v2  ;;  %5620 = vmatprep.mubr.msk.bf16.mxu1 %vm260_vm1, %v6269_v1  ;;  %v6273_v6 = vld [vmem:[%s8404_s0 + $0x20] sm:$0xff]   ;;  %v6275_v8 = vld [vmem:[%s8404_s0 + $0x30] sm:$0xff]   ;;  %v6276_v9 = vld [vmem:[%s8404_s0 + $0x38] sm:$0xff]  }
   0x4   :  { %v6277_v10 = vld [vmem:[%s8404_s0 + $0x40] sm:$0xff]   ;;  %v6278_v11 = vld [vmem:[%s8404_s0 + $0x48] sm:$0xff]   ;;  %v6279_v12 = vld [vmem:[%s8404_s0 + $0x50] sm:$0xff]  }
   0x5   :  { %v6280_v13 = vld [vmem:[%s8404_s0 + $0x58] sm:$0xff]   ;;  %v6281_v14 = vld [vmem:[%s8404_s0 + $0x60] sm:$0xff]   ;;  %v6282_v15 = vld [vmem:[%s8404_s0 + $0x68] sm:$0xff]  }
   0x6   :  { %5621 = vmatmul.mubr.msk.bf16.vlgmr.msra.gmra.mrb[0].mxu1 %vm260_vm1, %v6270_v3  ;;  %v6283_v16 = vld [vmem:[%s8404_s0 + $0x70] sm:$0xff]   ;;  %v6284_v17 = vld [vmem:[%s8404_s0 + $0x78] sm:$0xff]   ;;  %v6285_v18 = vld [vmem:[%s8404_s0 + $0x80] sm:$0xff]  }
   0x7   :  { %5624 = vmatprep.mubr.msk.bf16.mxu1 %vm260_vm1, %v6271_v4  ;;  %v6286_v19 = vld [vmem:[%s8404_s0 + $0x88] sm:$0xff]   ;;  %v6287_v20 = vld [vmem:[%s8404_s0 + $0x90] sm:$0xff]   ;;  %v6288_v21 = vld [vmem:[%s8404_s0 + $0x98] sm:$0xff]  }
   0x8   :  { %v6289_v22 = vld [vmem:[%s8404_s0 + $0xa0] sm:$0xff]   ;;  %v6290_v23 = vld [vmem:[%s8404_s0 + $0xa8] sm:$0xff]   ;;  %v6291_v24 = vld [vmem:[%s8404_s0 + $0xb0] sm:$0xff]  }
   0x9   :  { %v6292_v25 = vld [vmem:[%s8404_s0 + $0xb8] sm:$0xff]   ;;  %v6293_v26 = vld [vmem:[%s8404_s0 + $0xc0] sm:$0xff]   ;;  %v6294_v27 = vld [vmem:[%s8404_s0 + $0xc8] sm:$0xff]  }
   0xa   :  { %v6295_v28 = vld [vmem:[%s8404_s0 + $0xd0] sm:$0xff]   ;;  %v6296_v29 = vld [vmem:[%s8404_s0 + $0xd8] sm:$0xff]   ;;  %v6297_v30 = vld [vmem:[%s8404_s0 + $0xe0] sm:$0xff]  }
   0xb   :  { %v6298_v31 = vld [vmem:[%s8404_s0 + $0xe8] sm:$0xff]   ;;  %v6299_v32 = vld [vmem:[%s8404_s0 + $0xf0] sm:$0xff]   ;;  %v6300_v33 = vld [vmem:[%s8404_s0 + $0xf8] sm:$0xff]  }
   0xe   :  { %5625 = vmatmul.mubr.msk.bf16.gmra.mrb[4].mxu1 %vm260_vm1, %v6272_v5 }
   0xf   :  { %5628 = vmatprep.mubr.msk.bf16.mxu1 %vm260_vm1, %v6273_v6 }
  0x16   :  { %5629 = vmatmul.mubr.msk.bf16.gmra.mrb[8].mxu1 %vm260_vm1, %v6274_v7 }
  0x17   :  { %5632 = vmatprep.mubr.msk.bf16.mxu1 %vm260_vm1, %v6275_v8 }
  0x1e   :  { %5633 = vmatmul.mubr.msk.bf16.gmra.mrb[12].mxu1 %vm260_vm1, %v6276_v9 }
  0x1f   :  { %5636 = vmatprep.mubr.msk.bf16.mxu1 %vm260_vm1, %v6277_v10 }
  0x26   :  { %5637 = vmatmul.mubr.msk.bf16.gmra.mrb[16].mxu1 %vm260_vm1, %v6278_v11 }
  0x27   :  { %5640 = vmatprep.mubr.msk.bf16.mxu1 %vm260_vm1, %v6279_v12 }
  0x2e   :  { %5641 = vmatmul.mubr.msk.bf16.gmra.mrb[20].mxu1 %vm260_vm1, %v6280_v13 }
  0x2f   :  { %5644 = vmatprep.mubr.msk.bf16.mxu1 %vm260_vm1, %v6281_v14 }
  0x36   :  { %5645 = vmatmul.mubr.msk.bf16.gmra.mrb[24].mxu1 %vm260_vm1, %v6282_v15 }
  0x37   :  { %5648 = vmatprep.mubr.msk.bf16.mxu1 %vm260_vm1, %v6283_v16 }
  0x3e   :  { %5649 = vmatmul.mubr.msk.bf16.gmra.mrb[28].mxu1 %vm260_vm1, %v6284_v17 }
  0x3f   :  { %5652 = vmatprep.mubr.msk.bf16.mxu1 %vm260_vm1, %v6285_v18 }
  0x46   :  { %5653 = vmatmul.mubr.msk.bf16.gmra.mrb[32].mxu1 %vm260_vm1, %v6286_v19 }
  0x47   :  { %5656 = vmatprep.mubr.msk.bf16.mxu1 %vm260_vm1, %v6287_v20 }
  0x4e   :  { %5657 = vmatmul.mubr.msk.bf16.gmra.mrb[36].mxu1 %vm260_vm1, %v6288_v21 }
  0x4f   :  { %5660 = vmatprep.mubr.msk.bf16.mxu1 %vm260_vm1, %v6289_v22 }
  0x56   :  { %5661 = vmatmul.mubr.msk.bf16.gmra.mrb[40].mxu1 %vm260_vm1, %v6290_v23 }
  0x57   :  { %5664 = vmatprep.mubr.msk.bf16.mxu1 %vm260_vm1, %v6291_v24 }
  0x5e   :  { %5665 = vmatmul.mubr.msk.bf16.gmra.mrb[44].mxu1 %vm260_vm1, %v6292_v25 }
  0x5f   :  { %5668 = vmatprep.mubr.msk.bf16.mxu1 %vm260_vm1, %v6293_v26 }
  0x66   :  { %5669 = vmatmul.mubr.msk.bf16.gmra.mrb[48].mxu1 %vm260_vm1, %v6294_v27 }
  0x67   :  { %5672 = vmatprep.mubr.msk.bf16.mxu1 %vm260_vm1, %v6295_v28 }
  0x6e   :  { %5673 = vmatmul.mubr.msk.bf16.gmra.mrb[52].mxu1 %vm260_vm1, %v6296_v29 }
  0x6f   :  { %5676 = vmatprep.mubr.msk.bf16.mxu1 %vm260_vm1, %v6297_v30 }
  0x76   :  { %5677 = vmatmul.mubr.msk.bf16.gmra.mrb[56].mxu1 %vm260_vm1, %v6298_v31 }
  0x77   :  { %5680 = vmatprep.mubr.msk.bf16.mxu1 %vm260_vm1, %v6299_v32 }
  0x7e   :  { %5681 = vmatmul.mubr.msk.bf16.gmra.mrb[60].mxu1 %vm260_vm1, %v6300_v33 }
  0x7f   :  { %14 = vsyncpa [#allocation3], 0  ;;  %v6303_v34 = vld [vmem:[%s8410_s6 + $0x4] ss:$16 sps:$4 sm:$0xff]   ;;  %v6816_v35 = vld [vmem:[%s8406_s2] ss:$0 sm:$0xff] }
  0x80   :  { %970 = vmatprep.mubr.bf16.mxu1 %v6303_v34  ;;  %vm6630_vm2 = vmmov 0   ;;  %vm1522_vm3 = vcmask 261120  }
  0xd9   :  { %v5622_v36 = vpop.f32.mrb[0].mxu1 }
  0xda   :  { %v404_v37 = vadd.f32 %v5622_v36, %v6816_v35  ;;  %v395_v38 = vpop.f32.mrb[1].mxu1 }
  0xdb   :  { %v396_v39 = vadd.f32 %v6816_v35, %v395_v38  ;;  %v5623_v40 = vpop.f32.mrb[2].mxu1 }
  0xdc   :  { %v407_v41 = vadd.f32 %v5623_v40, %v6816_v35  ;;  %v398_v42 = vpop.f32.mrb[3].mxu1  ;;  %v652_v44 = vmax.f32 %v404_v37, 0.0 }
  0xdd   :  { %v399_v43 = vadd.f32 %v6816_v35, %v398_v42  ;;  %v650_v46 = vmax.f32 %v396_v39, 0.0 }
  0xde   :  { %v653_v45 = vmax.f32 %v407_v41, 0.0 }
  0xdf   :  { %v651_v47 = vmax.f32 %v399_v43, 0.0 }
  0xe0   :  { %v6822_v48 = vpack.c.bf16 %v653_v45, %v652_v44 }
  0xe1   :  { %v6824_v49 = vpack.c.bf16 %v651_v47, %v650_v46  ;;  %v5626_v50 = vpop.f32.mrb[4].mxu1 }
  0xe2   :  { %8456 = vst [vmem:[#allocation5_spill] sm:$0xff] %v6822_v48  ;;  %v420_v51 = vadd.f32 %v5626_v50, %v6816_v35  ;;  %v411_v52 = vpop.f32.mrb[5].mxu1 }
  0xe3   :  { %8457 = vst [vmem:[#allocation6_spill] sm:$0xff] %v6824_v49  ;;  %v412_v53 = vadd.f32 %v6816_v35, %v411_v52  ;;  %v5627_v54 = vpop.f32.mrb[6].mxu1 }
  0xe4   :  { %v423_v55 = vadd.f32 %v5627_v54, %v6816_v35  ;;  %v414_v56 = vpop.f32.mrb[7].mxu1  ;;  %v656_v58 = vmax.f32 %v420_v51, 0.0 }
  0xe5   :  { %v415_v57 = vadd.f32 %v6816_v35, %v414_v56  ;;  %v654_v60 = vmax.f32 %v412_v53, 0.0 }
  0xe6   :  { %v657_v59 = vmax.f32 %v423_v55, 0.0 }
  0xe7   :  { %v655_v61 = vmax.f32 %v415_v57, 0.0 }
  0xe8   :  { %v6830_v62 = vpack.c.bf16 %v657_v59, %v656_v58 }
  0xe9   :  { %v6832_v63 = vpack.c.bf16 %v655_v61, %v654_v60  ;;  %v5630_v0 = vpop.f32.mrb[8].mxu1 }
  0xea   :  { %8458 = vst [vmem:[#allocation7_spill] sm:$0xff] %v6830_v62  ;;  %v436_v1 = vadd.f32 %v5630_v0, %v6816_v35  ;;  %v427_v2 = vpop.f32.mrb[9].mxu1 }
  0xeb   :  { %8459 = vst [vmem:[#allocation8_spill] sm:$0xff] %v6832_v63  ;;  %v428_v3 = vadd.f32 %v6816_v35, %v427_v2  ;;  %v5631_v4 = vpop.f32.mrb[10].mxu1 }
  0xec   :  { %v439_v5 = vadd.f32 %v5631_v4, %v6816_v35  ;;  %v430_v6 = vpop.f32.mrb[11].mxu1  ;;  %v660_v8 = vmax.f32 %v436_v1, 0.0 }
  0xed   :  { %v431_v7 = vadd.f32 %v6816_v35, %v430_v6  ;;  %v658_v10 = vmax.f32 %v428_v3, 0.0 }
  0xee   :  { %v661_v9 = vmax.f32 %v439_v5, 0.0 }
  0xef   :  { %v659_v11 = vmax.f32 %v431_v7, 0.0 }
  0xf0   :  { %v6838_v12 = vpack.c.bf16 %v661_v9, %v660_v8 }
  0xf1   :  { %v6840_v13 = vpack.c.bf16 %v659_v11, %v658_v10  ;;  %v5634_v14 = vpop.f32.mrb[12].mxu1 }
  0xf2   :  { %8460 = vst [vmem:[#allocation9_spill] sm:$0xff] %v6838_v12  ;;  %v452_v15 = vadd.f32 %v5634_v14, %v6816_v35  ;;  %v443_v16 = vpop.f32.mrb[13].mxu1 }
  0xf3   :  { %8461 = vst [vmem:[#allocation10_spill] sm:$0xff] %v6840_v13  ;;  %v444_v17 = vadd.f32 %v6816_v35, %v443_v16  ;;  %v5635_v18 = vpop.f32.mrb[14].mxu1 }
  0xf4   :  { %v455_v19 = vadd.f32 %v5635_v18, %v6816_v35  ;;  %v446_v20 = vpop.f32.mrb[15].mxu1  ;;  %v664_v22 = vmax.f32 %v452_v15, 0.0 }
  0xf5   :  { %v447_v21 = vadd.f32 %v6816_v35, %v446_v20  ;;  %v662_v24 = vmax.f32 %v444_v17, 0.0 }
  0xf6   :  { %v665_v23 = vmax.f32 %v455_v19, 0.0 }
  0xf7   :  { %v663_v25 = vmax.f32 %v447_v21, 0.0 }
  0xf8   :  { %v6846_v26 = vpack.c.bf16 %v665_v23, %v664_v22 }
  0xf9   :  { %v6848_v27 = vpack.c.bf16 %v663_v25, %v662_v24  ;;  %v5638_v28 = vpop.f32.mrb[16].mxu1 }
  0xfa   :  { %8462 = vst [vmem:[#allocation11_spill] sm:$0xff] %v6846_v26  ;;  %v468_v29 = vadd.f32 %v5638_v28, %v6816_v35  ;;  %v459_v30 = vpop.f32.mrb[17].mxu1 }
  0xfb   :  { %8463 = vst [vmem:[#allocation12_spill] sm:$0xff] %v6848_v27  ;;  %v460_v31 = vadd.f32 %v6816_v35, %v459_v30  ;;  %v5639_v32 = vpop.f32.mrb[18].mxu1 }
  0xfc   :  { %v471_v33 = vadd.f32 %v5639_v32, %v6816_v35  ;;  %v462_v34 = vpop.f32.mrb[19].mxu1  ;;  %v668_v37 = vmax.f32 %v468_v29, 0.0 }
  0xfd   :  { %v463_v36 = vadd.f32 %v6816_v35, %v462_v34  ;;  %v666_v39 = vmax.f32 %v460_v31, 0.0 }
  0xfe   :  { %v669_v38 = vmax.f32 %v471_v33, 0.0 }
  0xff   :  { %v667_v40 = vmax.f32 %v463_v36, 0.0 }
 0x100   :  { %v6854_v41 = vpack.c.bf16 %v669_v38, %v668_v37 }
 0x101   :  { %v6856_v42 = vpack.c.bf16 %v667_v40, %v666_v39  ;;  %v5642_v43 = vpop.f32.mrb[20].mxu1  ;;  %v6301_v40 = vld [vmem:[%s8410_s6] ss:$16 sps:$4 sm:$0xff]  }
 0x102   :  { %8464 = vst [vmem:[#allocation13_spill] sm:$0xff] %v6854_v41  ;;  %v484_v44 = vadd.f32 %v5642_v43, %v6816_v35  ;;  %v475_v45 = vpop.f32.mrb[21].mxu1 }
 0x103   :  { %8465 = vst [vmem:[#allocation14_spill] sm:$0xff] %v6856_v42  ;;  %v476_v46 = vadd.f32 %v6816_v35, %v475_v45  ;;  %v5643_v47 = vpop.f32.mrb[22].mxu1  ;;  %5213 = vmatprep.subr.bf16.mxu1 %v6856_v42  ;;  %v6304_v45 = vld [vmem:[%s8410_s6 + $0x24] ss:$16 sps:$4 sm:$0xff]  }
 0x104   :  { %v487_v50 = vadd.f32 %v5643_v47, %v6816_v35  ;;  %v478_v51 = vpop.f32.mrb[23].mxu1  ;;  %5214 = vmatpush3.bf16.msra.mxu1 %v6824_v49  ;;  %v672_v53 = vmax.f32 %v484_v44, 0.0 }
 0x105   :  { %v479_v52 = vadd.f32 %v6816_v35, %v478_v51  ;;  %5215 = vmatprep.subr.bf16.mxu1 %v6854_v41  ;;  %v670_v55 = vmax.f32 %v476_v46, 0.0 }
 0x106   :  { %v673_v54 = vmax.f32 %v487_v50, 0.0 }
 0x107   :  { %v671_v56 = vmax.f32 %v479_v52, 0.0 }
 0x108   :  { %v6865_v57 = vpack.c.bf16 %v673_v54, %v672_v53  ;;  %5216 = vmatpush3.bf16.msra.mxu1 %v6822_v48 }
 0x109   :  { %v6868_v58 = vpack.c.bf16 %v671_v56, %v670_v55  ;;  %v5646_v59 = vpop.f32.mrb[24].mxu1 }
 0x10a   :  { %8466 = vst [vmem:[#allocation15_spill] sm:$0xff] %v6865_v57  ;;  %v500_v60 = vadd.f32 %v5646_v59, %v6816_v35  ;;  %v491_v61 = vpop.f32.mrb[25].mxu1 }
 0x10b   :  { %8467 = vst [vmem:[#allocation16_spill] sm:$0xff] %v6868_v58  ;;  %v492_v0 = vadd.f32 %v6816_v35, %v491_v61  ;;  %v5647_v1 = vpop.f32.mrb[26].mxu1  ;;  %5217 = vmatprep.subr.bf16.mxu1 %v6868_v58 }
 0x10c   :  { %v503_v2 = vadd.f32 %v5647_v1, %v6816_v35  ;;  %v494_v3 = vpop.f32.mrb[27].mxu1  ;;  %5218 = vmatpush3.bf16.msra.mxu1 %v6832_v63  ;;  %v676_v5 = vmax.f32 %v500_v60, 0.0 }
 0x10d   :  { %v495_v4 = vadd.f32 %v6816_v35, %v494_v3  ;;  %5219 = vmatprep.subr.bf16.mxu1 %v6865_v57  ;;  %v674_v7 = vmax.f32 %v492_v0, 0.0  ;;  %v6306_v0 = vld [vmem:[%s8410_s6 + $0x20] ss:$16 sps:$4 sm:$0xff]  }
 0x10e   :  { %v677_v6 = vmax.f32 %v503_v2, 0.0 }
 0x10f   :  { %v675_v8 = vmax.f32 %v495_v4, 0.0  ;;  %v6307_v4 = vld [vmem:[%s8410_s6 + $0x44] ss:$16 sps:$4 sm:$0xff]  }
 0x110   :  { %v6877_v9 = vpack.c.bf16 %v677_v6, %v676_v5  ;;  %5220 = vmatpush3.bf16.msra.mxu1 %v6830_v62 }
 0x111   :  { %v6880_v10 = vpack.c.bf16 %v675_v8, %v674_v7  ;;  %v5650_v11 = vpop.f32.mrb[28].mxu1 }
 0x112   :  { %8468 = vst [vmem:[#allocation17_spill] sm:$0xff] %v6877_v9  ;;  %v516_v14 = vadd.f32 %v5650_v11, %v6816_v35  ;;  %v507_v15 = vpop.f32.mrb[29].mxu1 }
 0x113   :  { %8469 = vst [vmem:[#allocation18_spill] sm:$0xff] %v6880_v10  ;;  %v508_v16 = vadd.f32 %v6816_v35, %v507_v15  ;;  %v5651_v17 = vpop.f32.mrb[30].mxu1  ;;  %5221 = vmatprep.subr.bf16.mxu1 %v6880_v10 }
 0x114   :  { %v519_v18 = vadd.f32 %v5651_v17, %v6816_v35  ;;  %v510_v19 = vpop.f32.mrb[31].mxu1  ;;  %5222 = vmatpush3.bf16.msra.mxu1 %v6840_v13  ;;  %v680_v21 = vmax.f32 %v516_v14, 0.0 }
 0x115   :  { %v511_v20 = vadd.f32 %v6816_v35, %v510_v19  ;;  %5223 = vmatprep.subr.bf16.mxu1 %v6877_v9  ;;  %v678_v23 = vmax.f32 %v508_v16, 0.0 }
 0x116   :  { %v681_v22 = vmax.f32 %v519_v18, 0.0 }
 0x117   :  { %v679_v24 = vmax.f32 %v511_v20, 0.0 }
 0x118   :  { %v6889_v25 = vpack.c.bf16 %v681_v22, %v680_v21  ;;  %5224 = vmatpush3.bf16.msra.mxu1 %v6838_v12  ;;  %v6309_v21 = vld [vmem:[%s8410_s6 + $0x40] ss:$16 sps:$4 sm:$0xff]  }
 0x119   :  { %v6892_v28 = vpack.c.bf16 %v679_v24, %v678_v23  ;;  %v5654_v29 = vpop.f32.mrb[32].mxu1  ;;  %v6310_v24 = vld [vmem:[%s8410_s6 + $0x64] ss:$16 sps:$4 sm:$0xff]  }
 0x11a   :  { %8470 = vst [vmem:[#allocation19_spill] sm:$0xff] %v6889_v25  ;;  %v532_v30 = vadd.f32 %v5654_v29, %v6816_v35  ;;  %v523_v31 = vpop.f32.mrb[33].mxu1 }
 0x11b   :  { %8471 = vst [vmem:[#allocation20_spill] sm:$0xff] %v6892_v28  ;;  %5225 = vmatprep.subr.bf16.mxu1 %v6892_v28  ;;  %v524_v32 = vadd.f32 %v6816_v35, %v523_v31  ;;  %v5655_v33 = vpop.f32.mrb[34].mxu1 }
 0x11c   :  { %5226 = vmatpush3.bf16.msra.mxu1 %v6848_v27  ;;  %v535_v34 = vadd.f32 %v5655_v33, %v6816_v35  ;;  %v526_v36 = vpop.f32.mrb[35].mxu1  ;;  %v684_v38 = vmax.f32 %v532_v30, 0.0 }
 0x11d   :  { %5227 = vmatprep.subr.bf16.mxu1 %v6889_v25  ;;  %v527_v37 = vadd.f32 %v6816_v35, %v526_v36  ;;  %v682_v43 = vmax.f32 %v524_v32, 0.0 }
 0x11e   :  { %v685_v39 = vmax.f32 %v535_v34, 0.0 }
 0x11f   :  { %v683_v44 = vmax.f32 %v527_v37, 0.0 }
 0x120   :  { %5228 = vmatpush3.bf16.msra.mxu1 %v6846_v26  ;;  %v6908_v46 = vpack.c.bf16 %v685_v39, %v684_v38 }
 0x121   :  { %v6910_v47 = vpack.c.bf16 %v683_v44, %v682_v43  ;;  %v5658_v50 = vpop.f32.mrb[36].mxu1 }
 0x122   :  { %8472 = vst [vmem:[#allocation21_spill] sm:$0xff] %v6908_v46  ;;  %v548_v51 = vadd.f32 %v5658_v50, %v6816_v35  ;;  %v539_v52 = vpop.f32.mrb[37].mxu1 }
 0x123   :  { %8473 = vst [vmem:[#allocation22_spill] sm:$0xff] %v6910_v47  ;;  %971 = vmatmul.mubr.bf16.vlgmr.msra.gmra.mrb[64].mxu1 %v6301_v40  ;;  %v540_v53 = vadd.f32 %v6816_v35, %v539_v52  ;;  %v5659_v54 = vpop.f32.mrb[38].mxu1 }
 0x124   :  { %978 = vmatprep.mubr.bf16.mxu1 %v6304_v45  ;;  %v551_v55 = vadd.f32 %v5659_v54, %v6816_v35  ;;  %v542_v56 = vpop.f32.mrb[39].mxu1  ;;  %v688_v60 = vmax.f32 %v548_v51, 0.0  ;;  %v6312_v45 = vld [vmem:[%s8410_s6 + $0x60] ss:$16 sps:$4 sm:$0xff]   ;;  %v6313_v51 = vld [vmem:[%s8410_s6 + $0x84] ss:$16 sps:$4 sm:$0xff]  }
 0x125   :  { %v543_v59 = vadd.f32 %v6816_v35, %v542_v56  ;;  %v686_v1 = vmax.f32 %v540_v53, 0.0 }
 0x126   :  { %v689_v61 = vmax.f32 %v551_v55, 0.0 }
 0x127   :  { %v687_v2 = vmax.f32 %v543_v59, 0.0 }
 0x128   :  { %v6919_v3 = vpack.c.bf16 %v689_v61, %v688_v60 }
 0x129   :  { %v6924_v5 = vpack.c.bf16 %v687_v2, %v686_v1  ;;  %v5662_v6 = vpop.f32.mrb[40].mxu1 }
 0x12a   :  { %8474 = vst [vmem:[#allocation23_spill] sm:$0xff] %v6919_v3  ;;  %v564_v7 = vadd.f32 %v5662_v6, %v6816_v35  ;;  %v555_v8 = vpop.f32.mrb[41].mxu1 }
 0x12b   :  { %8475 = vst [vmem:[#allocation24_spill] sm:$0xff] %v6924_v5  ;;  %979 = vmatmul.mubr.bf16.gmra.mrb[68].mxu1 %v6306_v0  ;;  %v556_v11 = vadd.f32 %v6816_v35, %v555_v8  ;;  %v5663_v14 = vpop.f32.mrb[42].mxu1 }
 0x12c   :  { %986 = vmatprep.mubr.bf16.mxu1 %v6307_v4  ;;  %v567_v15 = vadd.f32 %v5663_v14, %v6816_v35  ;;  %v558_v16 = vpop.f32.mrb[43].mxu1  ;;  %v692_v18 = vmax.f32 %v564_v7, 0.0  ;;  %v6315_v7 = vld [vmem:[%s8410_s6 + $0x80] ss:$16 sps:$4 sm:$0xff]  }
 0x12d   :  { %v559_v17 = vadd.f32 %v6816_v35, %v558_v16  ;;  %v690_v20 = vmax.f32 %v556_v11, 0.0  ;;  %v6316_v11 = vld [vmem:[%s8410_s6 + $0xa4] ss:$16 sps:$4 sm:$0xff]  }
 0x12e   :  { %v693_v19 = vmax.f32 %v567_v15, 0.0 }
 0x12f   :  { %v691_v22 = vmax.f32 %v559_v17, 0.0 }
 0x130   :  { %v6933_v23 = vpack.c.bf16 %v693_v19, %v692_v18 }
 0x131   :  { %v6938_v29 = vpack.c.bf16 %v691_v22, %v690_v20  ;;  %v5666_v30 = vpop.f32.mrb[44].mxu1 }
 0x132   :  { %8476 = vst [vmem:[#allocation25_spill] sm:$0xff] %v6933_v23  ;;  %v580_v31 = vadd.f32 %v5666_v30, %v6816_v35  ;;  %v571_v32 = vpop.f32.mrb[45].mxu1 }
 0x133   :  { %8477 = vst [vmem:[#allocation26_spill] sm:$0xff] %v6938_v29  ;;  %987 = vmatmul.mubr.bf16.gmra.mrb[72].mxu1 %v6309_v21  ;;  %v572_v33 = vadd.f32 %v6816_v35, %v571_v32  ;;  %v5667_v34 = vpop.f32.mrb[46].mxu1 }
 0x134   :  { %v583_v36 = vadd.f32 %v5667_v34, %v6816_v35  ;;  %v574_v37 = vpop.f32.mrb[47].mxu1  ;;  %994 = vmatprep.mubr.bf16.mxu1 %v6310_v24  ;;  %v696_v39 = vmax.f32 %v580_v31, 0.0 }
 0x135   :  { %v575_v38 = vadd.f32 %v6816_v35, %v574_v37  ;;  %v694_v43 = vmax.f32 %v572_v33, 0.0  ;;  %v6318_v33 = vld [vmem:[%s8410_s6 + $0xa0] ss:$16 sps:$4 sm:$0xff]  }
 0x136   :  { %v697_v40 = vmax.f32 %v583_v36, 0.0  ;;  %v6319_v36 = vld [vmem:[%s8410_s6 + $0xc4] ss:$16 sps:$4 sm:$0xff]  }
 0x137   :  { %v695_v44 = vmax.f32 %v575_v38, 0.0 }
 0x138   :  { %v6947_v50 = vpack.c.bf16 %v697_v40, %v696_v39 }
 0x139   :  { %v6952_v52 = vpack.c.bf16 %v695_v44, %v694_v43  ;;  %v5670_v53 = vpop.f32.mrb[48].mxu1 }
 0x13a   :  { %8478 = vst [vmem:[#allocation27_spill] sm:$0xff] %v6947_v50  ;;  %v596_v54 = vadd.f32 %v5670_v53, %v6816_v35  ;;  %v587_v55 = vpop.f32.mrb[49].mxu1 }
 0x13b   :  { %8479 = vst [vmem:[#allocation28_spill] sm:$0xff] %v6952_v52  ;;  %v588_v56 = vadd.f32 %v6816_v35, %v587_v55  ;;  %v5671_v59 = vpop.f32.mrb[50].mxu1  ;;  %995 = vmatmul.mubr.bf16.gmra.mrb[76].mxu1 %v6312_v45 }
 0x13c   :  { %v599_v60 = vadd.f32 %v5671_v59, %v6816_v35  ;;  %v590_v61 = vpop.f32.mrb[51].mxu1  ;;  %1002 = vmatprep.mubr.bf16.mxu1 %v6313_v51  ;;  %v700_v1 = vmax.f32 %v596_v54, 0.0 }
 0x13d   :  { %v591_v0 = vadd.f32 %v6816_v35, %v590_v61  ;;  %v698_v4 = vmax.f32 %v588_v56, 0.0 }
 0x13e   :  { %v701_v2 = vmax.f32 %v599_v60, 0.0  ;;  %v6321_v60 = vld [vmem:[%s8410_s6 + $0xc0] ss:$16 sps:$4 sm:$0xff]  }
 0x13f   :  { %v699_v6 = vmax.f32 %v591_v0, 0.0  ;;  %v6322_v0 = vld [vmem:[%s8410_s6 + $0xe4] ss:$16 sps:$4 sm:$0xff]  }
 0x140   :  { %v6961_v8 = vpack.c.bf16 %v701_v2, %v700_v1 }
 0x141   :  { %v6966_v14 = vpack.c.bf16 %v699_v6, %v698_v4  ;;  %v5674_v15 = vpop.f32.mrb[52].mxu1 }
 0x142   :  { %8480 = vst [vmem:[#allocation29_spill] sm:$0xff] %v6961_v8  ;;  %v612_v16 = vadd.f32 %v5674_v15, %v6816_v35  ;;  %v603_v17 = vpop.f32.mrb[53].mxu1 }
 0x143   :  { %8481 = vst [vmem:[#allocation30_spill] sm:$0xff] %v6966_v14  ;;  %v604_v18 = vadd.f32 %v6816_v35, %v603_v17  ;;  %v5675_v19 = vpop.f32.mrb[54].mxu1  ;;  %1003 = vmatmul.mubr.bf16.gmra.mrb[80].mxu1 %v6315_v7  ;;  %5277 = vmatprep.subr.bf16.mxu1 %v6966_v14 }
 0x144   :  { %v615_v20 = vadd.f32 %v5675_v19, %v6816_v35  ;;  %v606_v21 = vpop.f32.mrb[55].mxu1  ;;  %5278 = vmatpush3.bf16.msra.mxu1 %v6910_v47  ;;  %1010 = vmatprep.mubr.bf16.mxu1 %v6316_v11  ;;  %v704_v24 = vmax.f32 %v612_v16, 0.0 }
 0x145   :  { %v607_v22 = vadd.f32 %v6816_v35, %v606_v21  ;;  %5279 = vmatprep.subr.bf16.mxu1 %v6961_v8  ;;  %v702_v31 = vmax.f32 %v604_v18, 0.0 }
 0x146   :  { %v705_v30 = vmax.f32 %v615_v20, 0.0 }
 0x147   :  { %v703_v32 = vmax.f32 %v607_v22, 0.0  ;;  %v6324_v22 = vld [vmem:[%s8410_s6 + $0xe0] ss:$16 sps:$4 sm:$0xff]  }
 0x148   :  { %v6978_v34 = vpack.c.bf16 %v705_v30, %v704_v24  ;;  %5280 = vmatpush3.bf16.msra.mxu1 %v6908_v46  ;;  %v6327_v30 = vld [vmem:[%s8410_s6 + $0xc] ss:$16 sps:$4 sm:$0xff]  }
 0x149   :  { %v6984_v37 = vpack.c.bf16 %v703_v32, %v702_v31  ;;  %v5678_v38 = vpop.f32.mrb[56].mxu1  ;;  %v6328_v32 = vld [vmem:[%s8410_s6 + $0x2c] ss:$16 sps:$4 sm:$0xff]  }
 0x14a   :  { %8482 = vst [vmem:[#allocation31_spill] sm:$0xff] %v6978_v34  ;;  %v628_v39 = vadd.f32 %v5678_v38, %v6816_v35  ;;  %v619_v40 = vpop.f32.mrb[57].mxu1  ;;  %v6333_v38 = vld [vmem:[%s8410_s6 + $0x48] ss:$16 sps:$4 sm:$0xff]  }
 0x14b   :  { %8483 = vst [vmem:[#allocation32_spill] sm:$0xff] %v6984_v37  ;;  %v620_v43 = vadd.f32 %v6816_v35, %v619_v40  ;;  %v5679_v44 = vpop.f32.mrb[58].mxu1  ;;  %1011 = vmatmul.mubr.bf16.gmra.mrb[84].mxu1 %v6318_v33  ;;  %5281 = vmatprep.subr.bf16.mxu1 %v6984_v37  ;;  %v6330_v33 = vld [vmem:[%s8410_s6 + $0x28] ss:$16 sps:$4 sm:$0xff]  }
 0x14c   :  { %v631_v45 = vadd.f32 %v5679_v44, %v6816_v35  ;;  %v622_v51 = vpop.f32.mrb[59].mxu1  ;;  %5282 = vmatpush3.bf16.msra.mxu1 %v6924_v5  ;;  %1018 = vmatprep.mubr.bf16.mxu1 %v6319_v36  ;;  %v708_v54 = vmax.f32 %v628_v39, 0.0  ;;  %v6331_v36 = vld [vmem:[%s8410_s6 + $0x4c] ss:$16 sps:$4 sm:$0xff]   ;;  %v6336_v40 = vld [vmem:[%s8410_s6 + $0x68] ss:$16 sps:$4 sm:$0xff]  }
 0x14d   :  { %v623_v53 = vadd.f32 %v6816_v35, %v622_v51  ;;  %5283 = vmatprep.subr.bf16.mxu1 %v6978_v34  ;;  %v706_v56 = vmax.f32 %v620_v43, 0.0  ;;  %v6334_v39 = vld [vmem:[%s8410_s6 + $0x6c] ss:$16 sps:$4 sm:$0xff]   ;;  %v6339_v44 = vld [vmem:[%s8410_s6 + $0x88] ss:$16 sps:$4 sm:$0xff]  }
 0x14e   :  { %v709_v55 = vmax.f32 %v631_v45, 0.0  ;;  %v6337_v43 = vld [vmem:[%s8410_s6 + $0x8c] ss:$16 sps:$4 sm:$0xff]   ;;  %v6342_v51 = vld [vmem:[%s8410_s6 + $0xa8] ss:$16 sps:$4 sm:$0xff]  }
 0x14f   :  { %v707_v59 = vmax.f32 %v623_v53, 0.0  ;;  %v6340_v45 = vld [vmem:[%s8410_s6 + $0xac] ss:$16 sps:$4 sm:$0xff]  }
 0x150   :  { %v6996_v61 = vpack.c.bf16 %v709_v55, %v708_v54  ;;  %5284 = vmatpush3.bf16.msra.mxu1 %v6919_v3  ;;  %v6343_v53 = vld [vmem:[%s8410_s6 + $0xcc] ss:$16 sps:$4 sm:$0xff]   ;;  %v6345_v54 = vld [vmem:[%s8410_s6 + $0xc8] ss:$16 sps:$4 sm:$0xff]  }
 0x151   :  { %v7002_v1 = vpack.c.bf16 %v707_v59, %v706_v56  ;;  %v5682_v2 = vpop.f32.mrb[60].mxu1  ;;  %v6346_v55 = vld [vmem:[%s8410_s6 + $0xec] ss:$16 sps:$4 sm:$0xff]   ;;  %v6348_v59 = vld [vmem:[%s8410_s6 + $0xe8] ss:$16 sps:$4 sm:$0xff]  }
 0x152   :  { %8484 = vst [vmem:[#allocation33_spill] sm:$0xff] %v6996_v61  ;;  %v644_v4 = vadd.f32 %v5682_v2, %v6816_v35  ;;  %v635_v6 = vpop.f32.mrb[61].mxu1  ;;  %v6349_v56 = vld [vmem:[%s8405_s1 + $0x8] sm:$0xff]   ;;  %v6352_v2 = vld [vmem:[%s8405_s1 + $0x20] sm:$0xff]  }
 0x153   :  { %8485 = vst [vmem:[#allocation34_spill] sm:$0xff] %v7002_v1  ;;  %v636_v7 = vadd.f32 %v6816_v35, %v635_v6  ;;  %v5683_v11 = vpop.f32.mrb[62].mxu1  ;;  %1019 = vmatmul.mubr.bf16.gmra.mrb[88].mxu1 %v6321_v60  ;;  %5285 = vmatprep.subr.bf16.mxu1 %v7002_v1  ;;  %v6350_v60 = vld [vmem:[%s8405_s1 + $0x10] sm:$0xff]  }
 0x154   :  { %v647_v15 = vadd.f32 %v5683_v11, %v6816_v35  ;;  %v638_v16 = vpop.f32.mrb[63].mxu1  ;;  %5286 = vmatpush3.bf16.msra.mxu1 %v6938_v29  ;;  %1026 = vmatprep.mubr.bf16.mxu1 %v6322_v0  ;;  %v712_v18 = vmax.f32 %v644_v4, 0.0  ;;  %v6351_v0 = vld [vmem:[%s8405_s1 + $0x18] sm:$0xff]   ;;  %v6353_v4 = vld [vmem:[%s8405_s1 + $0x28] sm:$0xff]   ;;  %v6354_v6 = vld [vmem:[%s8405_s1 + $0x30] sm:$0xff]  }
 0x155   :  { %v639_v17 = vadd.f32 %v6816_v35, %v638_v16  ;;  %5287 = vmatprep.subr.bf16.mxu1 %v6996_v61  ;;  %v710_v20 = vmax.f32 %v636_v7, 0.0  ;;  %v6325_v35 = vld [vmem:[%s8410_s6 + $0x8] ss:$16 sps:$4 sm:$0xff]   ;;  %5684 = vmatprep.subr.bf16.mxu0 %v6349_v56  ;;  %v6356_v11 = vld [vmem:[%s8405_s1 + $0x40] sm:$0xff]  }
 0x156   :  { %v713_v19 = vmax.f32 %v647_v15, 0.0  ;;  %5685 = vmatpush3.bf16.msra.mxu0 %v6349_v56  ;;  %v6355_v7 = vld [vmem:[%s8405_s1 + $0x38] sm:$0xff]  }
 0x157   :  { %v711_v21 = vmax.f32 %v639_v17, 0.0  ;;  %5686 = vmatprep.subr.bf16.mxu0 %v6350_v60 }
 0x158   :  { %v7014_v24 = vpack.c.bf16 %v713_v19, %v712_v18  ;;  %5288 = vmatpush3.bf16.msra.mxu1 %v6933_v23 }
 0x159   :  { %v7020_v31 = vpack.c.bf16 %v711_v21, %v710_v20 }
 0x15a   :  { %8486 = vst [vmem:[#allocation35_spill] sm:$0xff] %v7014_v24  ;;  %5687 = vmatpush3.bf16.msra.mxu0 %v6350_v60 }
 0x15b   :  { %8487 = vst [vmem:[#allocation36_spill] sm:$0xff] %v7020_v31  ;;  %1027 = vmatmul.mubr.bf16.gmra.mrb[92].mxu1 %v6324_v22  ;;  %5289 = vmatprep.subr.bf16.mxu1 %v7020_v31 }
 0x15c   :  { %5290 = vmatpush3.bf16.msra.mxu1 %v6952_v52  ;;  %1067 = vmatprep.mubr.bf16.mxu1 %v6327_v30 }
 0x15d   :  { %5291 = vmatprep.subr.bf16.mxu1 %v7014_v24  ;;  %5688 = vmatprep.subr.bf16.mxu0 %v6351_v0 }
 0x15e   :  { %5689 = vmatpush3.bf16.msra.mxu0 %v6351_v0 }
 0x15f   :  { %5690 = vmatprep.subr.bf16.mxu0 %v6352_v2 }
 0x160   :  { %5292 = vmatpush3.bf16.msra.mxu1 %v6947_v50 }
 0x162   :  { %5691 = vmatpush3.bf16.msra.mxu0 %v6352_v2 }
 0x163   :  { %1068 = vmatmul.mubr.bf16.vlgmr.msra.gmra.mrb[96].mxu1 %v6325_v35  ;;  %5692 = vmatprep.subr.bf16.mxu0 %v6353_v4 }
 0x164   :  { %1075 = vmatprep.mubr.bf16.mxu1 %v6328_v32 }
 0x166   :  { %5693 = vmatpush3.bf16.msra.mxu0 %v6353_v4 }
 0x167   :  { %5694 = vmatprep.subr.bf16.mxu0 %v6354_v6 }
 0x16a   :  { %5695 = vmatpush3.bf16.msra.mxu0 %v6354_v6 }
 0x16b   :  { %1076 = vmatmul.mubr.bf16.gmra.mrb[100].mxu1 %v6330_v33  ;;  %5696 = vmatprep.subr.bf16.mxu0 %v6355_v7 }
 0x16c   :  { %1083 = vmatprep.mubr.bf16.mxu1 %v6331_v36 }
 0x16e   :  { %5697 = vmatpush3.bf16.msra.mxu0 %v6355_v7 }
 0x16f   :  { %5698 = vmatprep.subr.bf16.mxu0 %v6356_v11 }
 0x172   :  { %5699 = vmatpush3.bf16.msra.mxu0 %v6356_v11 }
 0x173   :  { %1084 = vmatmul.mubr.bf16.gmra.mrb[104].mxu1 %v6333_v38 }
 0x174   :  { %1091 = vmatprep.mubr.bf16.mxu1 %v6334_v39 }
 0x17b   :  { %1092 = vmatmul.mubr.bf16.gmra.mrb[108].mxu1 %v6336_v40 }
 0x17c   :  { %1099 = vmatprep.mubr.bf16.mxu1 %v6337_v43 }
 0x183   :  { %1100 = vmatmul.mubr.bf16.gmra.mrb[112].mxu1 %v6339_v44 }
 0x184   :  { %1107 = vmatprep.mubr.bf16.mxu1 %v6340_v45 }
 0x18b   :  { %1108 = vmatmul.mubr.bf16.gmra.mrb[116].mxu1 %v6342_v51 }
 0x18c   :  { %1115 = vmatprep.mubr.bf16.mxu1 %v6343_v53 }
 0x193   :  { %1116 = vmatmul.mubr.bf16.gmra.mrb[120].mxu1 %v6345_v54 }
 0x194   :  { %1123 = vmatprep.mubr.bf16.mxu1 %v6346_v55 }
 0x19b   :  { %1124 = vmatmul.mubr.bf16.gmra.mrb[124].mxu1 %v6348_v59 }
 0x1f6   :  { %v5229_v15 = vpop.f32.mrb[64].mxu1 }
 0x1f7   :  { %v5230_v16 = vpop.f32.mrb[65].mxu1 }
 0x1f8   :  { %v5231_v17 = vadd.f32 %v5230_v16, %v5229_v15  ;;  %v5232_v18 = vpop.f32.mrb[66].mxu1 }
 0x1f9   :  { %v5233_v19 = vpop.f32.mrb[67].mxu1 }
 0x1fa   :  { %v5234_v20 = vadd.f32 %v5233_v19, %v5232_v18 }
 0x1fe   :  { %v5235_v21 = vpop.f32.mrb[68].mxu1 }
 0x1ff   :  { %v5236_v22 = vpop.f32.mrb[69].mxu1 }
 0x200   :  { %v5237_v30 = vadd.f32 %v5236_v22, %v5235_v21  ;;  %v5238_v35 = vpop.f32.mrb[70].mxu1 }
 0x201   :  { %v5239_v32 = vpop.f32.mrb[71].mxu1 }
 0x202   :  { %v5240_v33 = vadd.f32 %v5239_v32, %v5238_v35 }
 0x206   :  { %v5241_v36 = vpop.f32.mrb[72].mxu1 }
 0x207   :  { %v5242_v38 = vpop.f32.mrb[73].mxu1 }
 0x208   :  { %v5243_v39 = vadd.f32 %v5242_v38, %v5241_v36  ;;  %v5244_v40 = vpop.f32.mrb[74].mxu1 }
 0x209   :  { %v5245_v43 = vpop.f32.mrb[75].mxu1 }
 0x20a   :  { %v5246_v44 = vadd.f32 %v5245_v43, %v5244_v40 }
 0x20e   :  { %v5247_v45 = vpop.f32.mrb[76].mxu1 }
 0x20f   :  { %v5248_v51 = vpop.f32.mrb[77].mxu1 }
 0x210   :  { %v7095_v53 = vadd.f32 %v5248_v51, %v5247_v45  ;;  %v5250_v54 = vpop.f32.mrb[78].mxu1 }
 0x211   :  { %v5251_v55 = vpop.f32.mrb[79].mxu1 }
 0x212   :  { %v5252_v56 = vadd.f32 %v5251_v55, %v5250_v54 }
 0x216   :  { %v5253_v59 = vpop.f32.mrb[80].mxu1 }
 0x217   :  { %v5254_v60 = vpop.f32.mrb[81].mxu1 }
 0x218   :  { %v7097_v0 = vadd.f32 %v5254_v60, %v5253_v59  ;;  %v5256_v2 = vpop.f32.mrb[82].mxu1 }
 0x219   :  { %v5257_v4 = vpop.f32.mrb[83].mxu1 }
 0x21a   :  { %v7099_v6 = vadd.f32 %v5257_v4, %v5256_v2 }
 0x21e   :  { %v5259_v7 = vpop.f32.mrb[84].mxu1 }
 0x21f   :  { %v5260_v11 = vpop.f32.mrb[85].mxu1 }
 0x220   :  { %v7101_v15 = vadd.f32 %v5260_v11, %v5259_v7  ;;  %v5262_v16 = vpop.f32.mrb[86].mxu1 }
 0x221   :  { %v5263_v18 = vpop.f32.mrb[87].mxu1 }
 0x222   :  { %v7103_v19 = vadd.f32 %v5263_v18, %v5262_v16 }
 0x226   :  { %v5265_v21 = vpop.f32.mrb[88].mxu1 }
 0x227   :  { %v5266_v22 = vpop.f32.mrb[89].mxu1 }
 0x228   :  { %v7105_v35 = vadd.f32 %v5266_v22, %v5265_v21  ;;  %v5268_v32 = vpop.f32.mrb[90].mxu1 }
 0x229   :  { %v5269_v36 = vpop.f32.mrb[91].mxu1 }
 0x22a   :  { %v7107_v38 = vadd.f32 %v5269_v36, %v5268_v32 }
 0x22e   :  { %v5271_v40 = vpop.f32.mrb[92].mxu1 }
 0x22f   :  { %v5272_v43 = vpop.f32.mrb[93].mxu1 }
 0x230   :  { %v7109_v45 = vadd.f32 %v5272_v43, %v5271_v40  ;;  %v5274_v51 = vpop.f32.mrb[94].mxu1 }
 0x231   :  { %v5275_v54 = vpop.f32.mrb[95].mxu1 }
 0x232   :  { %v7111_v55 = vadd.f32 %v5275_v54, %v5274_v51 }
 0x236   :  { %v5293_v59 = vpop.f32.mrb[96].mxu1 }
 0x237   :  { %v5294_v60 = vpop.f32.mrb[97].mxu1 }
 0x238   :  { %v5295_v2 = vadd.f32 %v5294_v60, %v5293_v59  ;;  %v5296_v4 = vpop.f32.mrb[98].mxu1 }
 0x239   :  { %v5297_v7 = vpop.f32.mrb[99].mxu1 }
 0x23a   :  { %v5298_v11 = vadd.f32 %v5297_v7, %v5296_v4  ;;  %v1070_v16 = vadd.f32 %v5295_v2, %v5231_v17 }
 0x23c   :  { %v1073_v18 = vadd.f32 %v5298_v11, %v5234_v20 }
 0x23e   :  { %v5299_v21 = vpop.f32.mrb[100].mxu1  ;;  %v1148_v22 = vpack.c.bf16 %v1073_v18, %v1070_v16 }
 0x23f   :  { %v5300_v32 = vpop.f32.mrb[101].mxu1 }
 0x240   :  { %v5301_v36 = vadd.f32 %v5300_v32, %v5299_v21  ;;  %v5302_v24 = vpop.f32.mrb[102].mxu1  ;;  %5700 = vmatprep.mubr.bf16.mxu0 %v1148_v22 }
 0x241   :  { %v5303_v40 = vpop.f32.mrb[103].mxu1 }
 0x242   :  { %v1078_v43 = vadd.f32 %v5301_v36, %v5237_v30  ;;  %v5304_v31 = vadd.f32 %v5303_v40, %v5302_v24 }
 0x244   :  { %v1081_v61 = vadd.f32 %v5304_v31, %v5240_v33 }
 0x246   :  { %v1149_v51 = vpack.c.bf16 %v1081_v61, %v1078_v43  ;;  %v5305_v54 = vpop.f32.mrb[104].mxu1 }
 0x247   :  { %v5306_v1 = vpop.f32.mrb[105].mxu1 }
 0x248   :  { %5701 = vmatmul.mubr.bf16.vlgmr.msra.gmra.mrb[0].mxu0 %v1149_v51  ;;  %v5307_v59 = vadd.f32 %v5306_v1, %v5305_v54  ;;  %v5308_v60 = vpop.f32.mrb[106].mxu1 }
 0x249   :  { %v5309_v34 = vpop.f32.mrb[107].mxu1 }
 0x24a   :  { %v1086_v4 = vadd.f32 %v5307_v59, %v5243_v39  ;;  %v5310_v17 = vadd.f32 %v5309_v34, %v5308_v60 }
 0x24c   :  { %v1089_v20 = vadd.f32 %v5310_v17, %v5246_v44 }
 0x24e   :  { %v5311_v2 = vpop.f32.mrb[108].mxu1  ;;  %v1150_v7 = vpack.c.bf16 %v1089_v20, %v1086_v4 }
 0x24f   :  { %v5312_v11 = vpop.f32.mrb[109].mxu1 }
 0x250   :  { %v5313_v16 = vadd.f32 %v5312_v11, %v5311_v2  ;;  %v5314_v18 = vpop.f32.mrb[110].mxu1  ;;  %5704 = vmatprep.mubr.bf16.mxu0 %v1150_v7 }
 0x251   :  { %v5315_v21 = vpop.f32.mrb[111].mxu1 }
 0x252   :  { %v1094_v24 = vadd.f32 %v5313_v16, %v7095_v53  ;;  %v5316_v31 = vadd.f32 %v5315_v21, %v5314_v18 }
 0x254   :  { %v1097_v61 = vadd.f32 %v5316_v31, %v5252_v56 }
 0x256   :  { %v1151_v30 = vpack.c.bf16 %v1097_v61, %v1094_v24  ;;  %v5317_v33 = vpop.f32.mrb[112].mxu1 }
 0x257   :  { %v5318_v22 = vpop.f32.mrb[113].mxu1 }
 0x258   :  { %5705 = vmatmul.mubr.bf16.gmra.mrb[4].mxu0 %v1151_v30  ;;  %v5319_v1 = vadd.f32 %v5318_v22, %v5317_v33  ;;  %v5320_v32 = vpop.f32.mrb[114].mxu1 }
 0x259   :  { %v5321_v39 = vpop.f32.mrb[115].mxu1 }
 0x25a   :  { %v1102_v34 = vadd.f32 %v5319_v1, %v7097_v0  ;;  %v5322_v44 = vadd.f32 %v5321_v39, %v5320_v32  ;;  %v6360_v32 = vld [vmem:[%s8405_s1 + $0x50] sm:$0xff]   ;;  %v6363_v39 = vld [vmem:[%s8405_s1 + $0x68] sm:$0xff]  }
 0x25c   :  { %v1105_v36 = vadd.f32 %v5322_v44, %v7099_v6  ;;  %v6365_v44 = vld [vmem:[%s8405_s1 + $0x78] sm:$0xff]  }
 0x25e   :  { %v5323_v40 = vpop.f32.mrb[116].mxu1  ;;  %v1152_v43 = vpack.c.bf16 %v1105_v36, %v1102_v34  ;;  %v6364_v34 = vld [vmem:[%s8405_s1 + $0x70] sm:$0xff]   ;;  %v4971_v36 = vld [vmem:[%s8406_s2 + $0x8] ss:$0 sm:$0xff] }
 0x25f   :  { %v5324_v51 = vpop.f32.mrb[117].mxu1 }
 0x260   :  { %v5325_v54 = vadd.f32 %v5324_v51, %v5323_v40  ;;  %v5326_v59 = vpop.f32.mrb[118].mxu1  ;;  %5708 = vmatprep.mubr.bf16.mxu0 %v1152_v43 }
 0x261   :  { %v5327_v53 = vpop.f32.mrb[119].mxu1 }
 0x262   :  { %v1110_v56 = vadd.f32 %v5325_v54, %v7101_v15  ;;  %v5328_v60 = vadd.f32 %v5327_v53, %v5326_v59 }
 0x264   :  { %v1113_v4 = vadd.f32 %v5328_v60, %v7103_v19 }
 0x266   :  { %v1153_v17 = vpack.c.bf16 %v1113_v4, %v1110_v56  ;;  %v5329_v20 = vpop.f32.mrb[120].mxu1 }
 0x267   :  { %v5330_v2 = vpop.f32.mrb[121].mxu1 }
 0x268   :  { %5709 = vmatmul.mubr.bf16.gmra.mrb[8].mxu0 %v1153_v17  ;;  %v5331_v0 = vadd.f32 %v5330_v2, %v5329_v20  ;;  %v5332_v7 = vpop.f32.mrb[122].mxu1 }
 0x269   :  { %v5333_v11 = vpop.f32.mrb[123].mxu1 }
 0x26a   :  { %v1118_v6 = vadd.f32 %v5331_v0, %v7105_v35  ;;  %v5334_v16 = vadd.f32 %v5333_v11, %v5332_v7  ;;  %v6357_v35 = vld [vmem:[%s8407_s3 + $0x100] sm:$0xff]  }
 0x26b   :  { %5732 = vmatprep.mubr.bf16.mxu1 %v6357_v35 }
 0x26c   :  { %v1121_v18 = vadd.f32 %v5334_v16, %v7107_v38  ;;  %v6359_v38 = vld [vmem:[%s8405_s1 + $0x48] sm:$0xff]  }
 0x26d   :  { %5736 = vmatprep.subr.bf16.mxu0 %v6359_v38 }
 0x26e   :  { %v5335_v21 = vpop.f32.mrb[124].mxu1  ;;  %v1154_v24 = vpack.c.bf16 %v1121_v18, %v1118_v6  ;;  %5737 = vmatpush3.bf16.msra.mxu0 %v6359_v38 }
 0x26f   :  { %v5336_v31 = vpop.f32.mrb[125].mxu1  ;;  %5738 = vmatprep.subr.bf16.mxu0 %v6360_v32 }
 0x270   :  { %v5337_v61 = vadd.f32 %v5336_v31, %v5335_v21  ;;  %v5338_v15 = vpop.f32.mrb[126].mxu1  ;;  %5712 = vmatprep.mubr.bf16.mxu0 %v1154_v24 }
 0x271   :  { %v5339_v30 = vpop.f32.mrb[127].mxu1 }
 0x272   :  { %v1126_v19 = vadd.f32 %v5337_v61, %v7109_v45  ;;  %v5340_v33 = vadd.f32 %v5339_v30, %v5338_v15  ;;  %v6361_v45 = vld [vmem:[%s8405_s1 + $0x58] sm:$0xff]   ;;  %5739 = vmatpush3.bf16.msra.mxu0 %v6360_v32 }
 0x273   :  { %5740 = vmatprep.subr.bf16.mxu0 %v6361_v45 }
 0x274   :  { %v1129_v22 = vadd.f32 %v5340_v33, %v7111_v55  ;;  %v6362_v55 = vld [vmem:[%s8405_s1 + $0x60] sm:$0xff]  }
 0x276   :  { %v1155_v1 = vpack.c.bf16 %v1129_v22, %v1126_v19  ;;  %5741 = vmatpush3.bf16.msra.mxu0 %v6361_v45 }
 0x277   :  { %5742 = vmatprep.subr.bf16.mxu0 %v6362_v55 }
 0x278   :  { %5713 = vmatmul.mubr.bf16.gmra.mrb[12].mxu0 %v1155_v1 }
 0x27a   :  { %5743 = vmatpush3.bf16.msra.mxu0 %v6362_v55 }
 0x27b   :  { %5744 = vmatprep.subr.bf16.mxu0 %v6363_v39 }
 0x27e   :  { %5745 = vmatpush3.bf16.msra.mxu0 %v6363_v39 }
 0x27f   :  { %5746 = vmatprep.subr.bf16.mxu0 %v6364_v34 }
 0x282   :  { %5747 = vmatpush3.bf16.msra.mxu0 %v6364_v34 }
 0x283   :  { %5748 = vmatprep.subr.bf16.mxu0 %v6365_v44 }
 0x286   :  { %5749 = vmatpush3.bf16.msra.mxu0 %v6365_v44 }
 0x31b   :  { %v5702_v40 = vpop.f32.mrb[0].mxu0 }
 0x31c   :  { %v1243_v43 = vpop.f32.mrb[1].mxu0  ;;  %v1252_v56 = vadd.f32 %v5702_v40, %v4971_v36 }
 0x31d   :  { %v1244_v51 = vadd.f32 %v4971_v36, %v1243_v43  ;;  %v5703_v54 = vpop.f32.mrb[2].mxu0 }
 0x31e   :  { %v1255_v59 = vadd.f32 %v5703_v54, %v4971_v36  ;;  %v1246_v53 = vpop.f32.mrb[3].mxu0  ;;  %v7155_v2 = vmax.f32 %v1252_v56, 0.0 }
 0x31f   :  { %v1247_v60 = vadd.f32 %v4971_v36, %v1246_v53  ;;  %v7149_v4 = vmax.f32 %v1244_v51, 0.0 }
 0x320   :  { %v7151_v17 = vmax.f32 %v1255_v59, 0.0 }
 0x321   :  { %v7153_v20 = vmax.f32 %v1247_v60, 0.0 }
 0x322   :  { %v1327_v7 = vpack.c.bf16 %v7151_v17, %v7155_v2 }
 0x323   :  { %v1326_v0 = vpack.c.bf16 %v7153_v20, %v7149_v4 }
 0x325   :  { %5716 = vmatprep.subr.bf16.mxu1 %v1326_v0 }
 0x326   :  { %5717 = vmatpush3.bf16.msra.mxu1 %v1326_v0 }
 0x327   :  { %5718 = vmatprep.subr.bf16.mxu1 %v1327_v7 }
 0x32a   :  { %5719 = vmatpush3.bf16.msra.mxu1 %v1327_v7 }
 0x32b   :  { %v5706_v11 = vpop.f32.mrb[4].mxu0 }
 0x32c   :  { %v1259_v6 = vpop.f32.mrb[5].mxu0  ;;  %v1268_v31 = vadd.f32 %v5706_v11, %v4971_v36 }
 0x32d   :  { %v1260_v16 = vadd.f32 %v4971_v36, %v1259_v6  ;;  %v5707_v18 = vpop.f32.mrb[6].mxu0 }
 0x32e   :  { %v1271_v21 = vadd.f32 %v5707_v18, %v4971_v36  ;;  %v1262_v24 = vpop.f32.mrb[7].mxu0  ;;  %v7167_v33 = vmax.f32 %v1268_v31, 0.0 }
 0x32f   :  { %v1263_v61 = vadd.f32 %v4971_v36, %v1262_v24  ;;  %v7161_v15 = vmax.f32 %v1260_v16, 0.0 }
 0x330   :  { %v7163_v30 = vmax.f32 %v1271_v21, 0.0 }
 0x331   :  { %v7165_v19 = vmax.f32 %v1263_v61, 0.0 }
 0x332   :  { %v1329_v1 = vpack.c.bf16 %v7163_v30, %v7167_v33 }
 0x333   :  { %v1328_v22 = vpack.c.bf16 %v7165_v19, %v7161_v15 }
 0x335   :  { %5720 = vmatprep.subr.bf16.mxu1 %v1328_v22 }
 0x336   :  { %5721 = vmatpush3.bf16.msra.mxu1 %v1328_v22 }
 0x337   :  { %5722 = vmatprep.subr.bf16.mxu1 %v1329_v1 }
 0x33a   :  { %5723 = vmatpush3.bf16.msra.mxu1 %v1329_v1 }
 0x33b   :  { %v5710_v35 = vpop.f32.mrb[8].mxu0 }
 0x33c   :  { %v1275_v38 = vpop.f32.mrb[9].mxu0  ;;  %v1284_v34 = vadd.f32 %v5710_v35, %v4971_v36  ;;  %v6366_v35 = vld [vmem:[%s8405_s1 + $0x80] sm:$0xff]  }
 0x33d   :  { %v1276_v32 = vadd.f32 %v4971_v36, %v1275_v38  ;;  %v5711_v45 = vpop.f32.mrb[10].mxu0  ;;  %5750 = vmatprep.subr.bf16.mxu0 %v6366_v35 }
 0x33e   :  { %v1287_v55 = vadd.f32 %v5711_v45, %v4971_v36  ;;  %v1278_v39 = vpop.f32.mrb[11].mxu0  ;;  %v7179_v54 = vmax.f32 %v1284_v34, 0.0  ;;  %5751 = vmatpush3.bf16.msra.mxu0 %v6366_v35 }
 0x33f   :  { %v1279_v44 = vadd.f32 %v4971_v36, %v1278_v39  ;;  %v7173_v40 = vmax.f32 %v1276_v32, 0.0 }
 0x340   :  { %v7175_v43 = vmax.f32 %v1287_v55, 0.0 }
 0x341   :  { %v7177_v51 = vmax.f32 %v1279_v44, 0.0  ;;  %v8418_v44 = vmov 0.0  }
 0x342   :  { %v1331_v53 = vpack.c.bf16 %v7175_v43, %v7179_v54  ;;  %5764 = vmatprep.subr.bf16.mxu0 %v8418_v44 }
 0x343   :  { %v1330_v59 = vpack.c.bf16 %v7177_v51, %v7173_v40 }
 0x345   :  { %5724 = vmatprep.subr.bf16.mxu1 %v1330_v59 }
 0x346   :  { %5725 = vmatpush3.bf16.msra.mxu1 %v1330_v59  ;;  %v4982_v59 = vld [vmem:[%s8406_s2 + $0x10] ss:$0 sm:$0xff] }
 0x347   :  { %5726 = vmatprep.subr.bf16.mxu1 %v1331_v53 }
 0x34a   :  { %5727 = vmatpush3.bf16.msra.mxu1 %v1331_v53 }
 0x34b   :  { %v5714_v56 = vpop.f32.mrb[12].mxu0 }
 0x34c   :  { %v1291_v60 = vpop.f32.mrb[13].mxu0  ;;  %v1300_v16 = vadd.f32 %v5714_v56, %v4971_v36 }
 0x34d   :  { %v1292_v0 = vadd.f32 %v4971_v36, %v1291_v60  ;;  %v5715_v7 = vpop.f32.mrb[14].mxu0 }
 0x34e   :  { %v1303_v11 = vadd.f32 %v5715_v7, %v4971_v36  ;;  %v1294_v6 = vpop.f32.mrb[15].mxu0  ;;  %v7191_v61 = vmax.f32 %v1300_v16, 0.0 }
 0x34f   :  { %v1295_v18 = vadd.f32 %v4971_v36, %v1294_v6  ;;  %v7185_v21 = vmax.f32 %v1292_v0, 0.0  ;;  %v6358_v36 = vld [vmem:[%s8407_s3 + $0x108] sm:$0xff]  }
 0x350   :  { %v7187_v24 = vmax.f32 %v1303_v11, 0.0  ;;  %8491 = vst [vmem:[#allocation40_spill] sm:$0xff] %v7191_v61 }
 0x351   :  { %8488 = vst [vmem:[#allocation37_spill] sm:$0xff] %v7185_v21  ;;  %v7189_v31 = vmax.f32 %v1295_v18, 0.0 }
 0x352   :  { %8489 = vst [vmem:[#allocation38_spill] sm:$0xff] %v7187_v24  ;;  %v1333_v1 = vpack.c.bf16 %v7187_v24, %v7191_v61 }
 0x353   :  { %8490 = vst [vmem:[#allocation39_spill] sm:$0xff] %v7189_v31  ;;  %v1332_v22 = vpack.c.bf16 %v7189_v31, %v7185_v21 }
 0x355   :  { %5728 = vmatprep.subr.bf16.mxu1 %v1332_v22 }
 0x356   :  { %5729 = vmatpush3.bf16.msra.mxu1 %v1332_v22 }
 0x357   :  { %5730 = vmatprep.subr.bf16.mxu1 %v1333_v1 }
 0x35a   :  { %5731 = vmatpush3.bf16.msra.mxu1 %v1333_v1 }
 0x35b   :  { %5756 = vmatprep.subr.bf16.mxu1 %v8418_v44 }
 0x35d   :  { %5733 = vmatmul.mubr.bf16.vlgmr.msra.gmra.mrb[128].mxu1 %v6358_v36 }
 0x35e   :  { %5760 = vmatprep.mubr.msk.bf16.mxu1 %vm6630_vm2, %v8418_v44 }
 0x430   :  { %v5734_v38 = vpop.f32.mrb[128].mxu1 }
 0x431   :  { %v1380_v32 = vpop.f32.mrb[129].mxu1 }
 0x432   :  { %v5735_v45 = vpop.f32.mrb[130].mxu1 }
 0x433   :  { %v7203_v55 = vpack.c.bf16 %v5735_v45, %v5734_v38  ;;  %v1383_v39 = vpop.f32.mrb[131].mxu1 }
 0x434   :  { %v7205_v34 = vpack.c.bf16 %v1383_v39, %v1380_v32 }
 0x436   :  { %5752 = vmatprep.mubr.bf16.mxu0 %v7205_v34 }
 0x437   :  { %5753 = vmatmul.mubr.bf16.vlgmr.msra.gmra.mrb[16].mxu0 %v7203_v55 }
 0x438   :  { %5780 = vmatprep.mubr.msk.bf16.mxu0 %vm6630_vm2, %v8418_v44 }
 0x50a   :  { %v5754_v53 = vpop.f32.mrb[16].mxu0 }
 0x50b   :  { %v1500_v56 = vpop.f32.mrb[17].mxu0  ;;  %v1509_v18 = vadd.f32 %v5754_v53, %v4982_v59  ;;  %v6367_v53 = vld [vmem:[%s8405_s1 + $0x88] sm:$0xff]  }
 0x50c   :  { %v1501_v60 = vadd.f32 %v4982_v59, %v1500_v56  ;;  %v5755_v0 = vpop.f32.mrb[18].mxu0  ;;  %5765 = vmatpush3.bf16.msra.mxu0 %v6367_v53  ;;  %v6368_v56 = vld [vmem:[%s8405_s1 + $0x90] sm:$0xff]  }
 0x50d   :  { %v1503_v7 = vpop.f32.mrb[19].mxu0  ;;  %v1512_v6 = vadd.f32 %v5755_v0, %v4982_v59  ;;  %v7228_v38 = vmax.f32 %v1509_v18, 0.0  ;;  %5766 = vmatprep.subr.bf16.mxu0 %v8418_v44  ;;  %v6370_v0 = vld [vmem:[%s8405_s1 + $0xa0] sm:$0xff]   ;;  %v6380_v53 = vld [vmem:[%s8405_s1 + $0xf0] sm:$0xff]  }
 0x50e   :  { %v7218_v11 = vmax.f32 %v1501_v60, 0.0  ;;  %v1504_v16 = vadd.f32 %v4982_v59, %v1503_v7  ;;  %v1519_v59 = vld [vmem:[%s8408_s4 + $0x40] sm:$0xf]  ;;  %v6369_v60 = vld [vmem:[%s8405_s1 + $0x98] sm:$0xff]   ;;  %v6371_v7 = vld [vmem:[%s8405_s1 + $0xa8] sm:$0xff]  }
 0x50f   :  { %v7224_v36 = vmax.f32 %v1512_v6, 0.0  ;;  %v6372_v6 = vld [vmem:[%s8405_s1 + $0xb0] sm:$0xff]   ;;  %v6374_v18 = vld [vmem:[%s8405_s1 + $0xc0] sm:$0xff]  }
 0x510   :  { %v7220_v22 = vmax.f32 %v1504_v16, 0.0  ;;  %v2967_v1 = vmul.f32 %v7218_v11, %v7218_v11  ;;  %5767 = vmatpush3.bf16.msra.mxu0 %v6368_v56  ;;  %v6373_v16 = vld [vmem:[%s8405_s1 + $0xb8] sm:$0xff]  }
 0x511   :  { %v1521_v45 = vpack.c.bf16 %v7224_v36, %v7228_v38  ;;  %v2970_v39 = vmul.f32 %v7224_v36, %v7224_v36  ;;  %5768 = vmatprep.subr.bf16.mxu0 %v8418_v44  ;;  %v6381_v56 = vld [vmem:[%s8405_s1 + $0xf8] sm:$0xff]  }
 0x512   :  { %v1520_v35 = vpack.c.bf16 %v7220_v22, %v7218_v11  ;;  %2971 = vadd.xlane.f32.xlu1 %v2967_v1  ;;  %v2968_v32 = vmul.f32 %v7220_v22, %v7220_v22  ;;  %v6375_v1 = vld [vmem:[%s8405_s1 + $0xc8] sm:$0xff]  }
 0x514   :  { %5757 = vmatpush3.bf16.msra.mxu1 %v1520_v35  ;;  %5769 = vmatpush3.bf16.msra.mxu0 %v6369_v60  ;;  %v6376_v35 = vld [vmem:[%s8405_s1 + $0xd0] sm:$0xff]  }
 0x515   :  { %5758 = vmatprep.subr.bf16.mxu1 %v8418_v44  ;;  %5770 = vmatprep.subr.bf16.mxu0 %v8418_v44 }
 0x516   :  { %2973 = vadd.xlane.f32.xlu1 %v2968_v32  ;;  %v6377_v32 = vld [vmem:[%s8405_s1 + $0xd8] sm:$0xff]  }
 0x518   :  { %5759 = vmatpush3.bf16.msra.mxu1 %v1521_v45  ;;  %5771 = vmatpush3.bf16.msra.mxu0 %v6370_v0  ;;  %v6378_v45 = vld [vmem:[%s8405_s1 + $0xe0] sm:$0xff]  }
 0x519   :  { %5784 = vmatprep.subr.bf16.mxu1 %v8418_v44  ;;  %5772 = vmatprep.subr.bf16.mxu0 %v8418_v44 }
 0x51a   :  { %2977 = vadd.xlane.f32.xlu1 %v2970_v39  ;;  %v6379_v39 = vld [vmem:[%s8405_s1 + $0xe8] sm:$0xff]  }
 0x51b   :  { %5761 = vmatmul.mubr.msk.bf16.vlgmr.msra.gmra.mrb[132].mxu1 %vm1522_vm3, %v1519_v59 }
 0x51c   :  { %5800 = vmatprep.mubr.msk.bf16.mxu1 %vm6630_vm2, %v8418_v44  ;;  %5773 = vmatpush3.bf16.msra.mxu0 %v6371_v7 }
 0x51d   :  { %5774 = vmatprep.subr.bf16.mxu0 %v8418_v44  ;;  %5785 = vmatpush3.bf16.msra.mxu1 %v6375_v1  ;;  %v6399_v1 = vld [vmem:[%s8405_s1 + $0x1a8] sm:$0xff]  }
 0x51e   :  { %5786 = vmatprep.subr.bf16.mxu1 %v8418_v44 }
 0x520   :  { %5775 = vmatpush3.bf16.msra.mxu0 %v6372_v6 }
 0x521   :  { %5776 = vmatprep.subr.bf16.mxu0 %v8418_v44  ;;  %5787 = vmatpush3.bf16.msra.mxu1 %v6376_v35  ;;  %v6402_v35 = vld [vmem:[%s8405_s1 + $0x1b0] sm:$0xff]  }
 0x522   :  { %5788 = vmatprep.subr.bf16.mxu1 %v8418_v44 }
 0x524   :  { %5777 = vmatpush3.bf16.msra.mxu0 %v6373_v16 }
 0x525   :  { %5778 = vmatprep.subr.bf16.mxu0 %v8418_v44  ;;  %5789 = vmatpush3.bf16.msra.mxu1 %v6377_v32  ;;  %v6405_v32 = vld [vmem:[%s8405_s1 + $0x1b8] sm:$0xff]  }
 0x526   :  { %5790 = vmatprep.subr.bf16.mxu1 %v8418_v44 }
 0x528   :  { %5779 = vmatpush3.bf16.msra.mxu0 %v6374_v18  ;;  %v6387_v18 = vld [vmem:[%s8405_s1 + $0x188] sm:$0xff]  }
 0x529   :  { %5804 = vmatprep.subr.bf16.mxu0 %v8418_v44  ;;  %5791 = vmatpush3.bf16.msra.mxu1 %v6378_v45  ;;  %v6382_v45 = vld [vmem:[%s8405_s1 + $0x100] sm:$0xff]  }
 0x52a   :  { %5792 = vmatprep.subr.bf16.mxu1 %v8418_v44 }
 0x52d   :  { %5793 = vmatpush3.bf16.msra.mxu1 %v6379_v39  ;;  %v6406_v39 = vld [vmem:[%s8405_s1 + $0x1c0] sm:$0xff]  }
 0x52e   :  { %5794 = vmatprep.subr.bf16.mxu1 %v8418_v44 }
 0x531   :  { %5795 = vmatpush3.bf16.msra.mxu1 %v6380_v53  ;;  %v6383_v53 = vld [vmem:[%s8405_s1 + $0x148] sm:$0xff]  }
 0x532   :  { %5796 = vmatprep.subr.bf16.mxu1 %v8418_v44 }
 0x535   :  { %5797 = vmatpush3.bf16.msra.mxu1 %v6381_v56  ;;  %v4992_v56 = vld [vmem:[%s8406_s2 + $0x18] ss:$0 sm:$0xff] }
 0x536   :  { %5798 = vmatprep.subr.bf16.mxu1 %v8418_v44 }
 0x539   :  { %5799 = vmatpush3.bf16.msra.mxu1 %v6382_v45 }
 0x53a   :  { %5401 = vmatprep.subr.bf16.mxu1 %v6383_v53 }
 0x5ee   :  { %v1560_v60 = vpop.f32.mrb[132].mxu1 }
 0x5ef   :  { %v1582_v0 = vpack.c.bf16 %v1560_v60, %v1560_v60  ;;  %v5762_v7 = vpop.f32.mrb[133].mxu1 }
 0x5f0   :  { %v1563_v6 = vpop.f32.mrb[134].mxu1 }
 0x5f1   :  { %5781 = vmatmul.mubr.bf16.vlgmr.msra.gmra.mrb[20].mxu0 %v1582_v0  ;;  %v5763_v16 = vpop.f32.mrb[135].mxu1 }
 0x5f2   :  { %5805 = vmatpush3.bf16.msra.mxu0 %v7205_v34  ;;  %5808 = vmatprep.mubr.msk.bf16.mxu0 %vm6630_vm2, %v8418_v44  ;;  %v6390_v34 = vld [vmem:[%s8405_s1 + $0x190] sm:$0xff]  }
 0x5f3   :  { %5806 = vmatprep.subr.bf16.mxu0 %v8418_v44 }
 0x5f6   :  { %5807 = vmatpush3.bf16.msra.mxu0 %v7203_v55  ;;  %v6393_v55 = vld [vmem:[%s8405_s1 + $0x198] sm:$0xff]  }
 0x5f7   :  { %5812 = vmatprep.subr.bf16.mxu0 %v8418_v44 }
 0x5f9   :  { %5809 = vmatmul.mubr.msk.bf16.vlgmr.msra.gmra.mrb[24].mxu0 %vm1522_vm3, %v1519_v59  ;;  %v6396_v59 = vld [vmem:[%s8405_s1 + $0x1a0] sm:$0xff]  }
 0x5fa   :  { %5828 = vmatprep.mubr.msk.bf16.mxu0 %vm6630_vm2, %v8418_v44  ;;  %5813 = vmatpush3.bf16.msra.mxu0 %v6387_v18 }
 0x5fb   :  { %5814 = vmatprep.subr.bf16.mxu0 %v8418_v44 }
 0x5fe   :  { %5815 = vmatpush3.bf16.msra.mxu0 %v6390_v34 }
 0x5ff   :  { %5816 = vmatprep.subr.bf16.mxu0 %v8418_v44 }
 0x602   :  { %5817 = vmatpush3.bf16.msra.mxu0 %v6393_v55  ;;  %v6384_v55 = vld [vmem:[%s8405_s1 + $0x108] sm:$0xff]  }
 0x603   :  { %5818 = vmatprep.subr.bf16.mxu0 %v8418_v44 }
 0x606   :  { %5819 = vmatpush3.bf16.msra.mxu0 %v6396_v59 }
 0x607   :  { %5820 = vmatprep.subr.bf16.mxu0 %v8418_v44 }
 0x60a   :  { %5821 = vmatpush3.bf16.msra.mxu0 %v6399_v1 }
 0x60b   :  { %5822 = vmatprep.subr.bf16.mxu0 %v8418_v44 }
 0x60e   :  { %5823 = vmatpush3.bf16.msra.mxu0 %v6402_v35  ;;  %v6385_v35 = vld [vmem:[%s8405_s1 + $0x150] sm:$0xff]  }
 0x60f   :  { %5824 = vmatprep.subr.bf16.mxu0 %v8418_v44 }
 0x612   :  { %5825 = vmatpush3.bf16.msra.mxu0 %v6405_v32  ;;  %v6386_v32 = vld [vmem:[%s8405_s1 + $0x110] sm:$0xff]  }
 0x613   :  { %5826 = vmatprep.subr.bf16.mxu0 %v8418_v44 }
 0x616   :  { %5827 = vmatpush3.bf16.msra.mxu0 %v6406_v39  ;;  %v6388_v39 = vld [vmem:[%s8405_s1 + $0x158] sm:$0xff]  }
 0x617   :  { %5852 = vmatprep.subr.bf16.mxu0 %v8418_v44 }
 0x6c4   :  { %v1670_v60 = vpop.f32.mrb[20].mxu0 }
 0x6c5   :  { %v1671_v7 = vadd.f32 %v4992_v56, %v1670_v60  ;;  %v5782_v6 = vpop.f32.mrb[21].mxu0 }
 0x6c6   :  { %v1673_v16 = vpop.f32.mrb[22].mxu0  ;;  %v6392_v6 = vld [vmem:[%s8405_s1 + $0x120] sm:$0xff]  }
 0x6c7   :  { %v7354_v18 = vmax.f32 %v1671_v7, 0.0  ;;  %v5783_v34 = vpop.f32.mrb[23].mxu0  ;;  %v6391_v7 = vld [vmem:[%s8405_s1 + $0x160] sm:$0xff]   ;;  %v6394_v16 = vld [vmem:[%s8405_s1 + $0x168] sm:$0xff]  }
 0x6c8   :  { %v6395_v34 = vld [vmem:[%s8405_s1 + $0x128] sm:$0xff]  }
 0x6c9   :  { %v1693_v59 = vpack.c.bf16 %v7354_v18, %v7354_v18  ;;  %v3041_v1 = vmul.f32 %v7354_v18, %v7354_v18 }
 0x6cb   :  { %3042 = vadd.xlane.f32.xlu0 %v3041_v1  ;;  %5801 = vmatmul.mubr.bf16.vlgmr.msra.gmra.mrb[136].mxu1 %v1693_v59  ;;  %v6398_v1 = vld [vmem:[%s8405_s1 + $0x130] sm:$0xff]  }
 0x6cc   :  { %5402 = vmatpush3.bf16.msra.mxu1 %v6384_v55  ;;  %2058 = vmatprep.mubr.bf16.mxu1 %v1582_v0  ;;  %v1822_v45 = vpop.f32.mrb[24].mxu0  ;;  %v6389_v0 = vld [vmem:[%s8405_s1 + $0x118] sm:$0xff]   ;;  %v6397_v55 = vld [vmem:[%s8405_s1 + $0x170] sm:$0xff]  }
 0x6cd   :  { %5403 = vmatprep.subr.bf16.mxu1 %v6385_v35  ;;  %5829 = vmatmul.mubr.bf16.vlgmr.msra.gmra.mrb[28].mxu0 %v1693_v59  ;;  %v5810_v53 = vpop.f32.mrb[25].mxu0  ;;  %v6408_v59 = vld [vmem:[%s8405_s1 + $0x208] sm:$0xff]   ;;  %v6400_v35 = vld [vmem:[%s8405_s1 + $0x178] sm:$0xff]  }
 0x6ce   :  { %v1825_v56 = vpop.f32.mrb[26].mxu0  ;;  %5868 = vmatprep.mubr.msk.bf16.mxu0 %vm6630_vm2, %v8418_v44  ;;  %5853 = vmatpush3.bf16.msra.mxu0 %v6408_v59  ;;  %v6403_v53 = vld [vmem:[%s8405_s1 + $0x180] sm:$0xff]   ;;  %v6416_v59 = vld [vmem:[%s8405_s1 + $0x228] sm:$0xff]  }
 0x6cf   :  { %v5811_v60 = vpop.f32.mrb[27].mxu0  ;;  %5854 = vmatprep.subr.bf16.mxu0 %v8418_v44  ;;  %v6412_v56 = vld [vmem:[%s8405_s1 + $0x218] sm:$0xff]  }
 0x6d0   :  { %5404 = vmatpush3.bf16.msra.mxu1 %v6386_v32  ;;  %v6410_v32 = vld [vmem:[%s8405_s1 + $0x210] sm:$0xff]   ;;  %v6404_v60 = vld [vmem:[%s8405_s1 + $0x140] sm:$0xff]  }
 0x6d1   :  { %5405 = vmatprep.subr.bf16.mxu1 %v6388_v39  ;;  %v6401_v39 = vld [vmem:[%s8405_s1 + $0x138] sm:$0xff]  }
 0x6d2   :  { %5855 = vmatpush3.bf16.msra.mxu0 %v6410_v32  ;;  %v6420_v32 = vld [vmem:[%s8405_s1 + $0x238] sm:$0xff]  }
 0x6d3   :  { %5856 = vmatprep.subr.bf16.mxu0 %v8418_v44 }
 0x6d4   :  { %5406 = vmatpush3.bf16.msra.mxu1 %v6389_v0  ;;  %v6414_v0 = vld [vmem:[%s8405_s1 + $0x220] sm:$0xff]  }
 0x6d5   :  { %5407 = vmatprep.subr.bf16.mxu1 %v6391_v7  ;;  %v1876_v7 = vpack.c.bf16 %v1822_v45, %v1822_v45  ;;  %v6411_v45 = vld [vmem:[%s8405_s1 + $0x258] sm:$0xff]  }
 0x6d6   :  { %5857 = vmatpush3.bf16.msra.mxu0 %v6412_v56  ;;  %v6421_v56 = vld [vmem:[%s8405_s1 + $0x280] sm:$0xff]  }
 0x6d7   :  { %5858 = vmatprep.subr.bf16.mxu0 %v8418_v44 }
 0x6d8   :  { %5408 = vmatpush3.bf16.msra.mxu1 %v6392_v6  ;;  %v6407_v6 = vld [vmem:[%s8405_s1 + $0x248] sm:$0xff]  }
 0x6d9   :  { %5409 = vmatprep.subr.bf16.mxu1 %v6394_v16  ;;  %v6409_v16 = vld [vmem:[%s8405_s1 + $0x250] sm:$0xff]  }
 0x6da   :  { %5859 = vmatpush3.bf16.msra.mxu0 %v6414_v0 }
 0x6db   :  { %5860 = vmatprep.subr.bf16.mxu0 %v8418_v44 }
 0x6dc   :  { %5410 = vmatpush3.bf16.msra.mxu1 %v6395_v34  ;;  %v6413_v34 = vld [vmem:[%s8405_s1 + $0x260] sm:$0xff]  }
 0x6dd   :  { %5411 = vmatprep.subr.bf16.mxu1 %v6397_v55  ;;  %v6415_v55 = vld [vmem:[%s8405_s1 + $0x268] sm:$0xff]  }
 0x6de   :  { %5861 = vmatpush3.bf16.msra.mxu0 %v6416_v59 }
 0x6df   :  { %5862 = vmatprep.subr.bf16.mxu0 %v8418_v44 }
 0x6e0   :  { %5412 = vmatpush3.bf16.msra.mxu1 %v6398_v1  ;;  %v6418_v1 = vld [vmem:[%s8405_s1 + $0x230] sm:$0xff]  }
 0x6e1   :  { %5413 = vmatprep.subr.bf16.mxu1 %v6400_v35  ;;  %v6417_v35 = vld [vmem:[%s8405_s1 + $0x270] sm:$0xff]  }
 0x6e2   :  { %5863 = vmatpush3.bf16.msra.mxu0 %v6418_v1 }
 0x6e3   :  { %5864 = vmatprep.subr.bf16.mxu0 %v8418_v44 }
 0x6e4   :  { %5414 = vmatpush3.bf16.msra.mxu1 %v6401_v39  ;;  %v6419_v39 = vld [vmem:[%s8405_s1 + $0x278] sm:$0xff]  }
 0x6e5   :  { %5415 = vmatprep.subr.bf16.mxu1 %v6403_v53  ;;  %v6422_v53 = vld [vmem:[%s8405_s1 + $0x240] sm:$0xff]  }
 0x6e6   :  { %5865 = vmatpush3.bf16.msra.mxu0 %v6420_v32 }
 0x6e7   :  { %5866 = vmatprep.subr.bf16.mxu0 %v8418_v44 }
 0x6e8   :  { %5416 = vmatpush3.bf16.msra.mxu1 %v6404_v60 }
 0x6e9   :  { %5832 = vmatprep.subr.bf16.mxu1 %v8418_v44 }
 0x6ea   :  { %5867 = vmatpush3.bf16.msra.mxu0 %v6422_v53 }
 0x6eb   :  { %2059 = vmatmul.mubr.bf16.vlgmr.msra.gmra.mrb[140].mxu1 %v1876_v7  ;;  %5878 = vmatprep.subr.bf16.mxu0 %v8418_v44 }
 0x6ec   :  { %5833 = vmatpush3.bf16.msra.mxu1 %v6407_v6  ;;  %5848 = vmatprep.mubr.msk.bf16.mxu1 %vm6630_vm2, %v8418_v44 }
 0x6ed   :  { %5834 = vmatprep.subr.bf16.mxu1 %v8418_v44 }
 0x6f0   :  { %5835 = vmatpush3.bf16.msra.mxu1 %v6409_v16 }
 0x6f1   :  { %5836 = vmatprep.subr.bf16.mxu1 %v8418_v44 }
 0x6f4   :  { %5837 = vmatpush3.bf16.msra.mxu1 %v6411_v45 }
 0x6f5   :  { %5838 = vmatprep.subr.bf16.mxu1 %v8418_v44 }
 0x6f8   :  { %5839 = vmatpush3.bf16.msra.mxu1 %v6413_v34 }
 0x6f9   :  { %5840 = vmatprep.subr.bf16.mxu1 %v8418_v44 }
 0x6fc   :  { %5841 = vmatpush3.bf16.msra.mxu1 %v6415_v55 }
 0x6fd   :  { %5842 = vmatprep.subr.bf16.mxu1 %v8418_v44 }
 0x700   :  { %5843 = vmatpush3.bf16.msra.mxu1 %v6417_v35  ;;  %v5011_v35 = vld [vmem:[%s8406_s2 + $0x28] ss:$0 sm:$0xff] }
 0x701   :  { %5844 = vmatprep.subr.bf16.mxu1 %v8418_v44 }
 0x704   :  { %5845 = vmatpush3.bf16.msra.mxu1 %v6419_v39 }
 0x705   :  { %5846 = vmatprep.subr.bf16.mxu1 %v8418_v44 }
 0x708   :  { %5847 = vmatpush3.bf16.msra.mxu1 %v6421_v56 }
 0x79e   :  { %v7473_v60 = vpop.f32.mrb[136].mxu1 }
 0x79f   :  { %v5802_v0 = vpop.f32.mrb[137].mxu1 }
 0x7a0   :  { %v1784_v7 = vpop.f32.mrb[138].mxu1  ;;  %v2100_v6 = vpop.f32.mrb[28].mxu0  ;;  %v6423_v0 = vld [vmem:[%s8405_s1 + $0x1c8] sm:$0xff]  }
 0x7a1   :  { %v5803_v16 = vpop.f32.mrb[139].mxu1  ;;  %v5830_v45 = vpop.f32.mrb[29].mxu0 }
 0x7a2   :  { %v2103_v34 = vpop.f32.mrb[30].mxu0  ;;  %v6424_v16 = vld [vmem:[%s8405_s1 + $0x1d0] sm:$0xff]   ;;  %v8492_v45 = vmov 0.0  }
 0x7a3   :  { %v5831_v55 = vpop.f32.mrb[31].mxu0  ;;  %v6428_v34 = vld [vmem:[%s8405_s1 + $0x1f0] sm:$0xff]  }
 0x7a4   :  { %v6429_v55 = vld [vmem:[%s8405_s1 + $0x1f8] sm:$0xff]  }
 0x7be   :  { %v5417_v59 = vpop.f32.mrb[140].mxu1 }
 0x7bf   :  { %v5418_v1 = vpop.f32.mrb[141].mxu1 }
 0x7c0   :  { %v5419_v32 = vadd.f32 %v5418_v1, %v5417_v59  ;;  %v5420_v39 = vpop.f32.mrb[142].mxu1  ;;  %v6430_v59 = vld [vmem:[%s8405_s1 + $0x200] sm:$0xff]  }
 0x7c1   :  { %v5421_v53 = vpop.f32.mrb[143].mxu1  ;;  %v6431_v1 = vld [vmem:[%s8409_s5 + $0x40] sm:$0xff]  }
 0x7c2   :  { %v2061_v56 = vadd.f32 %v5419_v32, %v5011_v35  ;;  %v5036_v35 = vld [vmem:[%s8406_s2 + $0x40] ss:$0 sm:$0xff] }
 0x7c4   :  { %v2101_v44 = vadd.f32 %v2100_v6, %v2061_v56  ;;  %v6427_v6 = vld [vmem:[%s8405_s1 + $0x1e8] sm:$0xff]  }
 0x7c6   :  { %v2106_v37 = vmax.f32 %v2101_v44, 0.0  ;;  %v6425_v44 = vld [vmem:[%s8405_s1 + $0x1d8] sm:$0xff]  }
 0x7c8   :  { %v2143_v7 = vpack.c.bf16 %v2106_v37, %v2106_v37  ;;  %v6426_v37 = vld [vmem:[%s8405_s1 + $0x1e0] sm:$0xff]  }
 0x7ca   :  { %5849 = vmatmul.mubr.bf16.vlgmr.msra.gmra.mrb[144].mxu1 %v2143_v7  ;;  %5869 = vmatmul.mubr.bf16.vlgmr.msra.gmra.mrb[32].mxu0 %v2143_v7 }
 0x7cb   :  { %5879 = vmatpush3.bf16.msra.mxu0 %v6423_v0  ;;  %5894 = vmatprep.mubr.msk.bf16.mxu0 %vm6630_vm2, %v8492_v45 }
 0x7cc   :  { %5880 = vmatprep.subr.bf16.mxu0 %v8492_v45  ;;  %5874 = vmatprep.mubr.msk.bf16.mxu1 %vm260_vm1, %v6431_v1  ;;  %v2969_v1 = vmul.f32 %v7228_v38, %v7228_v38 }
 0x7cf   :  { %5881 = vmatpush3.bf16.msra.mxu0 %v6424_v16 }
 0x7d0   :  { %5882 = vmatprep.subr.bf16.mxu0 %v8492_v45 }
 0x7d3   :  { %5883 = vmatpush3.bf16.msra.mxu0 %v6425_v44 }
 0x7d4   :  { %5884 = vmatprep.subr.bf16.mxu0 %v8492_v45 }
 0x7d7   :  { %5885 = vmatpush3.bf16.msra.mxu0 %v6426_v37 }
 0x7d8   :  { %5886 = vmatprep.subr.bf16.mxu0 %v8492_v45 }
 0x7db   :  { %5887 = vmatpush3.bf16.msra.mxu0 %v6427_v6  ;;  %v6432_v6 = vld [vmem:[%s8409_s5 + $0x48] sm:$0xff]  }
 0x7dc   :  { %5888 = vmatprep.subr.bf16.mxu0 %v8492_v45 }
 0x7df   :  { %5889 = vmatpush3.bf16.msra.mxu0 %v6428_v34 }
 0x7e0   :  { %5890 = vmatprep.subr.bf16.mxu0 %v8492_v45 }
 0x7e3   :  { %5891 = vmatpush3.bf16.msra.mxu0 %v6429_v55 }
 0x7e4   :  { %5892 = vmatprep.subr.bf16.mxu0 %v8492_v45 }
 0x7e7   :  { %5893 = vmatpush3.bf16.msra.mxu0 %v6430_v59  ;;  %v7530_v59 = vld [vmem:[%s8409_s5] sm:$0xff]  }
 0x7ea   :  { %5895 = vmatmul.mubr.bf16.vlgmr.msra.gmra.mrb[36].mxu0 %v2143_v7 }
 0x89d   :  { %v2231_v32 = vpop.f32.mrb[144].mxu1  ;;  %v2335_v39 = vpop.f32.mrb[32].mxu0 }
 0x89e   :  { %v7518_v53 = vadd.f32 %v5036_v35, %v2231_v32  ;;  %v2341_v56 = vpack.c.bf16 %v2335_v39, %v2335_v39  ;;  %v5870_v0 = vpop.f32.mrb[33].mxu0  ;;  %v5850_v16 = vpop.f32.mrb[145].mxu1 }
 0x89f   :  { %v2338_v45 = vpop.f32.mrb[34].mxu0  ;;  %v2234_v44 = vpop.f32.mrb[146].mxu1 }
 0x8a0   :  { %v2364_v7 = vsel %vm357_vm0, %v2341_v56, 0  ;;  %6263 = vmatprep.subr.msk.bf16.mxu1 %vm357_vm0, %v2341_v56  ;;  %v3047_v37 = vmul.f32 %v7518_v53, %v7518_v53  ;;  %v5871_v34 = vpop.f32.mrb[35].mxu0  ;;  %v5851_v55 = vpop.f32.mrb[147].mxu1  ;;  %v6441_v56 = vld [vmem:[%s8405_s1 + $0x2c8] sm:$0xff]  }
 0x8a1   :  { %5873 = vmatpush3.bf16.msra.mxu1 %v2364_v7  ;;  %v7545_v44 = vld [vmem:[%s8409_s5 + $0x8] sm:$0xff]   ;;  %v7550_v7 = vld [vmem:[%s8409_s5 + $0x10] sm:$0xff]   ;;  %v6445_v55 = vld [vmem:[%s8405_s1 + $0x2d8] sm:$0xff]  }
 0x8a2   :  { %3048 = vadd.xlane.f32.xlu0 %v3047_v37  ;;  %v6442_v37 = vld [vmem:[%s8405_s1 + $0x288] sm:$0xff]   ;;  %v6444_v34 = vld [vmem:[%s8405_s1 + $0x290] sm:$0xff]  }
 0x8a4   :  { %5875 = vmatmul.mubr.msk.bf16.vlgmr.msra.gmra.mrb[148].mxu1 %vm260_vm1, %v6432_v6  ;;  %v6443_v6 = vld [vmem:[%s8405_s1 + $0x2d0] sm:$0xff]  }
 0x8a5   :  { %5900 = vmatprep.mubr.msk.bf16.mxu1 %vm260_vm1, %v7530_v59 }
 0x8a6   :  { %2975 = vadd.xlane.f32.xlu0 %v2969_v1  ;;  %v7571_v1 = vld [vmem:[%s8409_s5 + $0x18] sm:$0xff]  }
 0x8bd   :  { %v2513_v35 = vpop.f32.mrb[36].mxu0 }
 0x8be   :  { %v2519_v32 = vpack.c.bf16 %v2513_v35, %v2513_v35  ;;  %v5896_v39 = vpop.f32.mrb[37].mxu0  ;;  %v7576_v35 = vld [vmem:[%s8409_s5 + $0x20] sm:$0xff]  }
 0x8bf   :  { %v2516_v0 = vpop.f32.mrb[38].mxu0  ;;  %v6447_v39 = vld [vmem:[%s8405_s1 + $0x2e0] sm:$0xff]  }
 0x8c0   :  { %v2590_v16 = vsel %vm357_vm0, %v2519_v32, 0  ;;  %v5897_v45 = vpop.f32.mrb[39].mxu0  ;;  %6264 = vmatprep.subr.msk.bf16.mxu1 %vm357_vm0, %v2519_v32  ;;  %v6446_v32 = vld [vmem:[%s8405_s1 + $0x298] sm:$0xff]   ;;  %v6449_v0 = vld [vmem:[%s8405_s1 + $0x2e8] sm:$0xff]  }
 0x8c1   :  { %5899 = vmatpush3.bf16.msra.mxu1 %v2590_v16  ;;  %v7597_v16 = vld [vmem:[%s8409_s5 + $0x28] sm:$0xff]   ;;  %v7602_v45 = vld [vmem:[%s8409_s5 + $0x30] sm:$0xff]  }
 0x8c2   :  { %5471 = vmatprep.subr.bf16.mxu1 %v6441_v56  ;;  %v6448_v56 = vld [vmem:[%s8405_s1 + $0x2a0] sm:$0xff]  }
 0x8c4   :  { %5901 = vmatmul.mubr.msk.bf16.vlgmr.msra.gmra.mrb[152].mxu1 %vm260_vm1, %v7545_v44 }
 0x8c5   :  { %5904 = vmatprep.mubr.msk.bf16.mxu1 %vm260_vm1, %v7550_v7  ;;  %5472 = vmatpush3.bf16.msra.mxu1 %v6442_v37  ;;  %v6450_v37 = vld [vmem:[%s8405_s1 + $0x2a8] sm:$0xff]  }
 0x8c6   :  { %5473 = vmatprep.subr.bf16.mxu1 %v6443_v6  ;;  %v6451_v6 = vld [vmem:[%s8405_s1 + $0x2f0] sm:$0xff]  }
 0x8c9   :  { %5474 = vmatpush3.bf16.msra.mxu1 %v6444_v34  ;;  %v6452_v34 = vld [vmem:[%s8405_s1 + $0x2b0] sm:$0xff]  }
 0x8ca   :  { %5475 = vmatprep.subr.bf16.mxu1 %v6445_v55  ;;  %v6453_v55 = vld [vmem:[%s8405_s1 + $0x2f8] sm:$0xff]  }
 0x8cc   :  { %5905 = vmatmul.mubr.msk.bf16.gmra.mrb[156].mxu1 %vm260_vm1, %v7571_v1 }
 0x8cd   :  { %5908 = vmatprep.mubr.msk.bf16.mxu1 %vm260_vm1, %v7576_v35  ;;  %5476 = vmatpush3.bf16.msra.mxu1 %v6446_v32  ;;  %v7623_v32 = vld [vmem:[%s8409_s5 + $0x38] sm:$0xff]  }
 0x8ce   :  { %5477 = vmatprep.subr.bf16.mxu1 %v6447_v39  ;;  %v6454_v39 = vld [vmem:[%s8405_s1 + $0x2b8] sm:$0xff]  }
 0x8d1   :  { %5478 = vmatpush3.bf16.msra.mxu1 %v6448_v56  ;;  %v6455_v56 = vld [vmem:[%s8405_s1 + $0x300] sm:$0xff]  }
 0x8d2   :  { %5479 = vmatprep.subr.bf16.mxu1 %v6449_v0  ;;  %v6456_v0 = vld [vmem:[%s8405_s1 + $0x2c0] sm:$0xff]  }
 0x8d4   :  { %5909 = vmatmul.mubr.msk.bf16.gmra.mrb[160].mxu1 %vm260_vm1, %v7597_v16 }
 0x8d5   :  { %5912 = vmatprep.mubr.msk.bf16.mxu1 %vm260_vm1, %v7602_v45  ;;  %5480 = vmatpush3.bf16.msra.mxu1 %v6450_v37  ;;  %v3043_v37 = vpop.xlane.xlu0 %3042 }
 0x8d6   :  { %5481 = vmatprep.subr.bf16.mxu1 %v6451_v6  ;;  %v3044_v6 = vmax.f32 %v3043_v37, 1e-24 }
 0x8d8   :  { %6521 = vrsqrt.f32 %v3044_v6  ;;  %v6458_v6 = vld [vmem:[%s8405_s1 + $0x350] sm:$0xff]  }
 0x8d9   :  { %5482 = vmatpush3.bf16.msra.mxu1 %v6452_v34 }
 0x8da   :  { %5483 = vmatprep.subr.bf16.mxu1 %v6453_v55  ;;  %v5001_v55 = vld [vmem:[%s8406_s2 + $0x20] ss:$0 sm:$0xff] }
 0x8dc   :  { %5913 = vmatmul.mubr.msk.bf16.gmra.mrb[164].mxu1 %vm260_vm1, %v7623_v32 }
 0x8dd   :  { %5484 = vmatpush3.bf16.msra.mxu1 %v6454_v39  ;;  %v1782_v39 = vadd.f32 %v5001_v55, %v7473_v60 }
 0x8de   :  { %5485 = vmatprep.subr.bf16.mxu1 %v6455_v56 }
 0x8e1   :  { %5486 = vmatpush3.bf16.msra.mxu1 %v6456_v0  ;;  %v1787_v0 = vmax.f32 %v1782_v39, 0.0 }
 0x8e2   :  { %v6522_v14 = vpop.eup %6521 }
 0x8e3   :  { %v3046_v52 = vmul.f32 %v6522_v14, %v7354_v18  ;;  %v3099_v60 = vpack.c.bf16 %v1787_v0, %v1787_v0 }
 0x92f   :  { %v3049_v34 = vpop.xlane.xlu0 %3048 }
 0x930   :  { %v3050_v8 = vmax.f32 %v3049_v34, 1e-24 }
 0x932   :  { %6523 = vrsqrt.f32 %v3050_v8  ;;  %v6457_v8 = vld [vmem:[%s8405_s1 + $0x348] sm:$0xff]  }
 0x933   :  { %5916 = vmatprep.subr.bf16.mxu0 %v6457_v8  ;;  %v2976_v27 = vpop.xlane.xlu0 %2975 }
 0x934   :  { %5917 = vmatpush3.bf16.msra.mxu0 %v6457_v8  ;;  %v2689_v8 = vmul.f32 %v7149_v4, %v7149_v4 }
 0x935   :  { %5918 = vmatprep.subr.bf16.mxu0 %v6458_v6 }
 0x938   :  { %5919 = vmatpush3.bf16.msra.mxu0 %v6458_v6  ;;  %v2690_v6 = vmul.f32 %v7153_v20, %v7153_v20 }
 0x93c   :  { %v6524_v50 = vpop.eup %6523 }
 0x93d   :  { %v3052_v23 = vmul.f32 %v6524_v50, %v7518_v53 }
 0x93f   :  { %v3053_v56 = vsub.f32 %v3046_v52, %v3052_v23  ;;  %v5053_v23 = vld [vmem:[%s8406_s2 + $0x38] ss:$0 sm:$0xff] }
 0x941   :  { %v7642_v29 = vmul.f32 %v3053_v56, %v3053_v56 }
 0x943   :  { %8493 = vst [vmem:[#allocation41_spill] sm:$0xff] %v7642_v29  ;;  %v3100_v37 = vpack.c.bf16 %v7642_v29, %v7642_v29 }
 0x945   :  { %3229 = vmatprep.mubr.bf16.mxu1 %v3100_v37 }
 0x946   :  { %3230 = vmatmul.mubr.bf16.vlgmr.msra.gmra.mrb[168].mxu1 %v3099_v60  ;;  %v2691_v60 = vmul.f32 %v7155_v2, %v7155_v2 }
 0x947   :  { %5938 = vmatprep.mubr.msk.bf16.mxu1 %vm260_vm1, %v7530_v59 }
 0x977   :  { %v5876_v50 = vpop.f32.mrb[148].mxu1 }
 0x978   :  { %v2400_v52 = vpop.f32.mrb[149].mxu1  ;;  %v7659_v34 = vadd.f32 %v5876_v50, %v5053_v23  ;;  %v2693_v50 = vmul.f32 %v7161_v15, %v7161_v15 }
 0x979   :  { %v7657_v14 = vadd.f32 %v5053_v23, %v2400_v52  ;;  %v5877_v18 = vpop.f32.mrb[150].mxu1  ;;  %v2694_v52 = vmul.f32 %v7165_v19, %v7165_v19 }
 0x97a   :  { %v2403_v53 = vpop.f32.mrb[151].mxu1  ;;  %v7665_v56 = vadd.f32 %v5877_v18, %v5053_v23  ;;  %v2993_v0 = vmul.f32 %v7659_v34, %v7659_v34  ;;  %v6459_v18 = vld [vmem:[%s8405_s1 + $0x358] sm:$0xff]  }
 0x97b   :  { %v7661_v55 = vadd.f32 %v5053_v23, %v2403_v53  ;;  %v2991_v39 = vmul.f32 %v7657_v14, %v7657_v14  ;;  %v2692_v23 = vmul.f32 %v7151_v17, %v7151_v17  ;;  %v2695_v53 = vmul.f32 %v7167_v33, %v7167_v33  ;;  %5920 = vmatprep.subr.bf16.mxu0 %v6459_v18 }
 0x97c   :  { %v2994_v37 = vmul.f32 %v7665_v56, %v7665_v56  ;;  %5921 = vmatpush3.bf16.msra.mxu0 %v6459_v18 }
 0x97d   :  { %2995 = vadd.xlane.f32.xlu0 %v2991_v39  ;;  %v2992_v59 = vmul.f32 %v7661_v55, %v7661_v55  ;;  %v2696_v39 = vmul.f32 %v7163_v30, %v7163_v30 }
 0x97f   :  { %2997 = vadd.xlane.f32.xlu1 %v2992_v59  ;;  %v6460_v59 = vld [vmem:[%s8405_s1 + $0x360] sm:$0xff]  }
 0x980   :  { %5922 = vmatprep.subr.bf16.mxu0 %v6460_v59 }
 0x981   :  { %2999 = vadd.xlane.f32.xlu0 %v2993_v0  ;;  %v2697_v0 = vmul.f32 %v7173_v40, %v7173_v40  ;;  %5923 = vmatpush3.bf16.msra.mxu0 %v6460_v59 }
 0x983   :  { %3001 = vadd.xlane.f32.xlu1 %v2994_v37  ;;  %v2698_v37 = vmul.f32 %v7177_v51, %v7177_v51 }
 0x985   :  { %2705 = vadd.xlane.f32.xlu0 %v2689_v8  ;;  %v6461_v8 = vld [vmem:[%s8405_s1 + $0x368] sm:$0xff]  }
 0x986   :  { %5924 = vmatprep.subr.bf16.mxu0 %v6461_v8 }
 0x987   :  { %2707 = vadd.xlane.f32.xlu1 %v2690_v6  ;;  %v7705_v6 = vld [vmem:[%s8406_s2 + $0x30] ss:$0 sm:$0xff]  ;;  %5925 = vmatpush3.bf16.msra.mxu0 %v6461_v8 }
 0x989   :  { %2709 = vadd.xlane.f32.xlu0 %v2691_v60  ;;  %v2699_v60 = vmul.f32 %v7179_v54, %v7179_v54 }
 0x98b   :  { %2711 = vadd.xlane.f32.xlu1 %v2692_v23 }
 0x98d   :  { %2713 = vadd.xlane.f32.xlu0 %v2693_v50 }
 0x98f   :  { %2715 = vadd.xlane.f32.xlu1 %v2694_v52  ;;  %v2700_v52 = vmul.f32 %v7175_v43, %v7175_v43 }
 0x991   :  { %2717 = vadd.xlane.f32.xlu0 %v2695_v53 }
 0x993   :  { %2719 = vadd.xlane.f32.xlu1 %v2696_v39  ;;  %v6462_v39 = vld [vmem:[%s8405_s1 + $0x370] sm:$0xff]  }
 0x994   :  { %5926 = vmatprep.subr.bf16.mxu0 %v6462_v39 }
 0x995   :  { %2721 = vadd.xlane.f32.xlu0 %v2697_v0  ;;  %v2701_v0 = vmul.f32 %v7185_v21, %v7185_v21  ;;  %5927 = vmatpush3.bf16.msra.mxu0 %v6462_v39 }
 0x997   :  { %2723 = vadd.xlane.f32.xlu1 %v2698_v37  ;;  %v5902_v23 = vpop.f32.mrb[152].mxu1 }
 0x998   :  { %v2626_v50 = vpop.f32.mrb[153].mxu1  ;;  %v7712_v18 = vadd.f32 %v5902_v23, %v7705_v6 }
 0x999   :  { %2725 = vadd.xlane.f32.xlu0 %v2699_v60  ;;  %v5903_v53 = vpop.f32.mrb[154].mxu1  ;;  %v7723_v8 = vadd.f32 %v7705_v6, %v2626_v50  ;;  %v2702_v60 = vmul.f32 %v7189_v31, %v7189_v31 }
 0x99a   :  { %v2629_v59 = vpop.f32.mrb[155].mxu1  ;;  %v7720_v37 = vadd.f32 %v5903_v53, %v7705_v6  ;;  %v2787_v23 = vmul.f32 %v7712_v18, %v7712_v18 }
 0x99b   :  { %2727 = vadd.xlane.f32.xlu1 %v2700_v52  ;;  %v6463_v52 = vld [vmem:[%s8405_s1 + $0x378] sm:$0xff]   ;;  %v7733_v53 = vadd.f32 %v7705_v6, %v2629_v59  ;;  %v2785_v5 = vmul.f32 %v7723_v8, %v7723_v8  ;;  %v6464_v59 = vld [vmem:[%s8405_s1 + $0x380] sm:$0xff]  }
 0x99c   :  { %v2788_v39 = vmul.f32 %v7720_v37, %v7720_v37  ;;  %5928 = vmatprep.subr.bf16.mxu0 %v6463_v52 }
 0x99d   :  { %2729 = vadd.xlane.f32.xlu0 %v2701_v0  ;;  %5929 = vmatpush3.bf16.msra.mxu0 %v6463_v52  ;;  %v2786_v52 = vmul.f32 %v7733_v53, %v7733_v53 }
 0x99e   :  { %5930 = vmatprep.subr.bf16.mxu0 %v6464_v59 }
 0x99f   :  { %2731 = vadd.xlane.f32.xlu1 %v2702_v60  ;;  %v5906_v50 = vpop.f32.mrb[156].mxu1 }
 0x9a0   :  { %v2642_v0 = vpop.f32.mrb[157].mxu1  ;;  %v7738_v3 = vadd.f32 %v5906_v50, %v7705_v6 }
 0x9a1   :  { %2805 = vadd.xlane.f32.xlu0 %v2787_v23  ;;  %v5907_v46 = vpop.f32.mrb[158].mxu1  ;;  %5931 = vmatpush3.bf16.msra.mxu0 %v6464_v59  ;;  %v7751_v23 = vadd.f32 %v7705_v6, %v2642_v0 }
 0x9a2   :  { %v2645_v60 = vpop.f32.mrb[159].mxu1  ;;  %v7746_v47 = vadd.f32 %v5907_v46, %v7705_v6  ;;  %v2791_v50 = vmul.f32 %v7738_v3, %v7738_v3 }
 0x9a3   :  { %2807 = vadd.xlane.f32.xlu1 %v2788_v39  ;;  %v7756_v25 = vadd.f32 %v7705_v6, %v2645_v60  ;;  %v2789_v0 = vmul.f32 %v7751_v23, %v7751_v23 }
 0x9a4   :  { %v2792_v46 = vmul.f32 %v7746_v47, %v7746_v47 }
 0x9a5   :  { %2801 = vadd.xlane.f32.xlu0 %v2785_v5  ;;  %v2790_v60 = vmul.f32 %v7756_v25, %v7756_v25 }
 0x9a7   :  { %2803 = vadd.xlane.f32.xlu1 %v2786_v52  ;;  %v5910_v39 = vpop.f32.mrb[160].mxu1 }
 0x9a8   :  { %v2658_v28 = vpop.f32.mrb[161].mxu1  ;;  %v7761_v9 = vadd.f32 %v5910_v39, %v7705_v6 }
 0x9a9   :  { %2813 = vadd.xlane.f32.xlu0 %v2791_v50  ;;  %v5911_v5 = vpop.f32.mrb[162].mxu1  ;;  %v7771_v10 = vadd.f32 %v7705_v6, %v2658_v28 }
 0x9aa   :  { %v2661_v59 = vpop.f32.mrb[163].mxu1  ;;  %v7766_v52 = vadd.f32 %v5911_v5, %v7705_v6  ;;  %v2795_v50 = vmul.f32 %v7761_v9, %v7761_v9 }
 0x9ab   :  { %2815 = vadd.xlane.f32.xlu1 %v2792_v46  ;;  %v7776_v39 = vadd.f32 %v7705_v6, %v2661_v59  ;;  %v2793_v58 = vmul.f32 %v7771_v10, %v7771_v10  ;;  %v2703_v59 = vmul.f32 %v7191_v61, %v7191_v61 }
 0x9ac   :  { %v2796_v46 = vmul.f32 %v7766_v52, %v7766_v52 }
 0x9ad   :  { %2809 = vadd.xlane.f32.xlu0 %v2789_v0  ;;  %v2794_v0 = vmul.f32 %v7776_v39, %v7776_v39 }
 0x9af   :  { %2811 = vadd.xlane.f32.xlu1 %v2790_v60  ;;  %v5914_v57 = vpop.f32.mrb[164].mxu1 }
 0x9b0   :  { %v2674_v5 = vpop.f32.mrb[165].mxu1 }
 0x9b1   :  { %2821 = vadd.xlane.f32.xlu0 %v2795_v50  ;;  %v5915_v41 = vpop.f32.mrb[166].mxu1  ;;  %v7785_v60 = vadd.f32 %v7705_v6, %v2674_v5  ;;  %v7793_v50 = vadd.f32 %v5914_v57, %v7705_v6 }
 0x9b2   :  { %v2677_v28 = vpop.f32.mrb[167].mxu1  ;;  %v7800_v5 = vadd.f32 %v5915_v41, %v7705_v6 }
 0x9b3   :  { %2823 = vadd.xlane.f32.xlu1 %v2796_v46  ;;  %8494 = vst [vmem:[#allocation42_spill] sm:$0xff] %v7785_v60  ;;  %v7790_v42 = vadd.f32 %v7705_v6, %v2677_v28  ;;  %8496 = vst [vmem:[#allocation44_spill] sm:$0xff] %v7793_v50  ;;  %v2704_v46 = vmul.f32 %v7187_v24, %v7187_v24  ;;  %v2799_v28 = vmul.f32 %v7793_v50, %v7793_v50 }
 0x9b4   :  { %8497 = vst [vmem:[#allocation45_spill] sm:$0xff] %v7800_v5  ;;  %v2800_v57 = vmul.f32 %v7800_v5, %v7800_v5 }
 0x9b5   :  { %2817 = vadd.xlane.f32.xlu0 %v2793_v58  ;;  %8495 = vst [vmem:[#allocation43_spill] sm:$0xff] %v7790_v42  ;;  %v2797_v58 = vmul.f32 %v7785_v60, %v7785_v60 }
 0x9b7   :  { %2819 = vadd.xlane.f32.xlu1 %v2794_v0  ;;  %v2798_v0 = vmul.f32 %v7790_v42, %v7790_v42 }
 0x9b9   :  { %2733 = vadd.xlane.f32.xlu0 %v2703_v59  ;;  %v2972_v59 = vpop.xlane.xlu1 %2971 }
 0x9ba   :  { %v2979_v12 = vmax.f32 %v2972_v59, 1e-24 }
 0x9bb   :  { %2735 = vadd.xlane.f32.xlu1 %v2704_v46  ;;  %v2981_v46 = vmax.f32 %v2976_v27, 1e-24 }
 0x9bc   :  { %6525 = vrsqrt.f32 %v2979_v12 }
 0x9bd   :  { %2825 = vadd.xlane.f32.xlu0 %v2797_v58  ;;  %v2974_v26 = vpop.xlane.xlu1 %2973 }
 0x9be   :  { %v2980_v41 = vmax.f32 %v2974_v26, 1e-24 }
 0x9bf   :  { %2827 = vadd.xlane.f32.xlu1 %v2798_v0 }
 0x9c0   :  { %6527 = vrsqrt.f32 %v2980_v41 }
 0x9c1   :  { %2829 = vadd.xlane.f32.xlu0 %v2799_v28  ;;  %v2978_v6 = vpop.xlane.xlu1 %2977 }
 0x9c2   :  { %v2982_v58 = vmax.f32 %v2978_v6, 1e-24 }
 0x9c3   :  { %2831 = vadd.xlane.f32.xlu1 %v2800_v57 }
 0x9c6   :  { %v6526_v12 = vpop.eup %6525 }
 0x9c7   :  { %v2987_v6 = vmul.f32 %v6526_v12, %v7218_v11 }
 0xa0a   :  { %v2996_v13 = vpop.xlane.xlu0 %2995 }
 0xa0b   :  { %v3003_v62 = vmax.f32 %v2996_v13, 1e-24  ;;  %v6528_v13 = vpop.eup %6527 }
 0xa0c   :  { %v2998_v63 = vpop.xlane.xlu1 %2997 }
 0xa0d   :  { %6529 = vrsqrt.f32 %v3003_v62  ;;  %v3004_v0 = vmax.f32 %v2998_v63, 1e-24 }
 0xa0e   :  { %6531 = vrsqrt.f32 %v2981_v46  ;;  %v3000_v48 = vpop.xlane.xlu0 %2999 }
 0xa0f   :  { %6533 = vrsqrt.f32 %v3004_v0  ;;  %v3005_v28 = vmax.f32 %v3000_v48, 1e-24 }
 0xa10   :  { %6535 = vrsqrt.f32 %v2982_v58  ;;  %v3002_v57 = vpop.xlane.xlu1 %3001 }
 0xa11   :  { %6537 = vrsqrt.f32 %v3005_v28  ;;  %v3006_v49 = vmax.f32 %v3002_v57, 1e-24 }
 0xa12   :  { %v7808_v59 = vpop.xlane.xlu0 %2705 }
 0xa13   :  { %6539 = vrsqrt.f32 %v3006_v49  ;;  %v2988_v49 = vmul.f32 %v6528_v13, %v7220_v22  ;;  %v6465_v22 = vld [vmem:[%s8405_s1 + $0x308] sm:$0xff]  }
 0xa14   :  { %v7810_v26 = vpop.xlane.xlu1 %2707 }
 0xa16   :  { %v7812_v27 = vpop.xlane.xlu0 %2709 }
 0xa17   :  { %v6530_v41 = vpop.eup %6529 }
 0xa18   :  { %v6532_v62 = vpop.eup %6531  ;;  %v7814_v63 = vpop.xlane.xlu1 %2711  ;;  %v3011_v48 = vmul.f32 %v6530_v41, %v7657_v14 }
 0xa19   :  { %v6534_v46 = vpop.eup %6533  ;;  %v5487_v58 = vpop.f32.mrb[168].mxu1  ;;  %v2989_v14 = vmul.f32 %v6532_v62, %v7228_v38 }
 0xa1a   :  { %v6536_v0 = vpop.eup %6535  ;;  %v5488_v28 = vpop.f32.mrb[169].mxu1  ;;  %v3012_v29 = vmul.f32 %v6534_v46, %v7661_v55  ;;  %v3015_v5 = vsub.f32 %v2987_v6, %v3011_v48  ;;  %v6467_v6 = vld [vmem:[%s8405_s1 + $0x318] sm:$0xff]  }
 0xa1b   :  { %v7818_v57 = vpop.xlane.xlu0 %2713  ;;  %v6538_v24 = vpop.eup %6537  ;;  %v5489_v50 = vadd.f32 %v5488_v28, %v5487_v58  ;;  %v2990_v21 = vmul.f32 %v6536_v0, %v7224_v36  ;;  %v2737_v58 = vmax.f32 %v7808_v59, 1e-24  ;;  %v2740_v28 = vmax.f32 %v7814_v63, 1e-24  ;;  %v6469_v59 = vld [vmem:[%s8405_s1 + $0x328] sm:$0xff]  }
 0xa1c   :  { %v5490_v61 = vpop.f32.mrb[170].mxu1  ;;  %v7822_v31 = vpop.xlane.xlu1 %2715  ;;  %v3016_v11 = vsub.f32 %v2988_v49, %v3012_v29  ;;  %v3013_v12 = vmul.f32 %v6538_v24, %v7659_v34  ;;  %v7832_v13 = vmul.f32 %v3015_v5, %v3015_v5 }
 0xa1d   :  { %v5491_v42 = vpop.f32.mrb[171].mxu1  ;;  %v6540_v41 = vpop.eup %6539  ;;  %v3392_v60 = vpack.c.bf16 %v5489_v50, %v5489_v50  ;;  %v6466_v50 = vld [vmem:[%s8405_s1 + $0x310] sm:$0xff]   ;;  %6541 = vrsqrt.f32 %v2737_v58 }
 0xa1e   :  { %v7834_v42 = vmul.f32 %v3016_v11, %v3016_v11  ;;  %v3014_v29 = vmul.f32 %v6540_v41, %v7665_v56  ;;  %v3017_v61 = vsub.f32 %v2989_v14, %v3013_v12  ;;  %v2738_v11 = vmax.f32 %v7810_v26, 1e-24 }
 0xa1f   :  { %v7830_v55 = vpop.xlane.xlu0 %2717  ;;  %v3394_v38 = vsel %vm357_vm0, %v3392_v60, 0  ;;  %6265 = vmatprep.subr.msk.bf16.mxu1 %vm357_vm0, %v3392_v60 }
 0xa20   :  { %5937 = vmatpush3.bf16.msra.mxu1 %v3394_v38  ;;  %v7839_v24 = vpop.xlane.xlu1 %2719  ;;  %v3277_v36 = vpack.c.bf16 %v7834_v42, %v7832_v13  ;;  %v3018_v34 = vsub.f32 %v2990_v21, %v3014_v29  ;;  %v7848_v56 = vmul.f32 %v3017_v61, %v3017_v61  ;;  %v2743_v41 = vmax.f32 %v7830_v55, 1e-24  ;;  %v6471_v55 = vld [vmem:[%s8405_s1 + $0x338] sm:$0xff]  }
 0xa21   :  { %5954 = vmatprep.subr.bf16.mxu1 %v6465_v22  ;;  %v2742_v38 = vmax.f32 %v7822_v31, 1e-24 }
 0xa22   :  { %5932 = vmatprep.mubr.bf16.mxu0 %v3277_v36  ;;  %v7850_v62 = vmul.f32 %v3018_v34, %v3018_v34 }
 0xa23   :  { %v7846_v5 = vpop.xlane.xlu0 %2721  ;;  %5939 = vmatmul.mubr.msk.bf16.vlgmr.msra.gmra.mrb[172].mxu1 %vm260_vm1, %v7545_v44  ;;  %v6468_v44 = vld [vmem:[%s8405_s1 + $0x320] sm:$0xff]  }
 0xa24   :  { %v7854_v60 = vpop.xlane.xlu1 %2723  ;;  %v3278_v21 = vpack.c.bf16 %v7850_v62, %v7848_v56  ;;  %5955 = vmatpush3.bf16.msra.mxu1 %v6465_v22  ;;  %5942 = vmatprep.mubr.msk.bf16.mxu1 %vm260_vm1, %v7550_v7  ;;  %v2739_v7 = vmax.f32 %v7812_v27, 1e-24 }
 0xa25   :  { %5956 = vmatprep.subr.bf16.mxu1 %v6466_v50 }
 0xa26   :  { %5933 = vmatmul.mubr.bf16.vlgmr.msra.gmra.mrb[40].mxu0 %v3278_v21  ;;  %6543 = vrsqrt.f32 %v2739_v7 }
 0xa27   :  { %v7863_v48 = vpop.xlane.xlu0 %2725  ;;  %6545 = vrsqrt.f32 %v2740_v28  ;;  %v6542_v34 = vpop.eup %6541 }
 0xa28   :  { %v7865_v46 = vpop.xlane.xlu1 %2727  ;;  %5957 = vmatpush3.bf16.msra.mxu1 %v6466_v50  ;;  %v2747_v31 = vmax.f32 %v7863_v48, 1e-24 }
 0xa29   :  { %5958 = vmatprep.subr.bf16.mxu1 %v6467_v6 }
 0xa2b   :  { %v7871_v0 = vpop.xlane.xlu0 %2729  ;;  %5943 = vmatmul.mubr.msk.bf16.gmra.mrb[176].mxu1 %vm260_vm1, %v7571_v1  ;;  %v2741_v1 = vmax.f32 %v7818_v57, 1e-24  ;;  %v2744_v57 = vmax.f32 %v7839_v24, 1e-24  ;;  %v2745_v24 = vmax.f32 %v7846_v5, 1e-24 }
 0xa2c   :  { %v7877_v49 = vpop.xlane.xlu1 %2731  ;;  %5959 = vmatpush3.bf16.msra.mxu1 %v6467_v6  ;;  %5946 = vmatprep.mubr.msk.bf16.mxu1 %vm260_vm1, %v7576_v35  ;;  %v6470_v35 = vld [vmem:[%s8405_s1 + $0x330] sm:$0xff]   ;;  %v6472_v6 = vld [vmem:[%s8405_s1 + $0x340] sm:$0xff]  }
 0xa2d   :  { %5960 = vmatprep.subr.bf16.mxu1 %v6468_v44 }
 0xa2f   :  { %v2806_v27 = vpop.xlane.xlu0 %2805 }
 0xa30   :  { %v2835_v14 = vmax.f32 %v2806_v27, 1e-24  ;;  %v2808_v63 = vpop.xlane.xlu1 %2807  ;;  %5961 = vmatpush3.bf16.msra.mxu1 %v6468_v44 }
 0xa31   :  { %v2836_v12 = vmax.f32 %v2808_v63, 1e-24  ;;  %5962 = vmatprep.subr.bf16.mxu1 %v6469_v59 }
 0xa32   :  { %6547 = vrsqrt.f32 %v2835_v14 }
 0xa33   :  { %6549 = vrsqrt.f32 %v2738_v11  ;;  %v2802_v22 = vpop.xlane.xlu0 %2801  ;;  %5947 = vmatmul.mubr.msk.bf16.gmra.mrb[180].mxu1 %vm260_vm1, %v7597_v16 }
 0xa34   :  { %6551 = vrsqrt.f32 %v2836_v12  ;;  %v2833_v26 = vmax.f32 %v2802_v22, 1e-24  ;;  %v2804_v29 = vpop.xlane.xlu1 %2803  ;;  %5963 = vmatpush3.bf16.msra.mxu1 %v6469_v59  ;;  %5950 = vmatprep.mubr.msk.bf16.mxu1 %vm260_vm1, %v7602_v45  ;;  %v6544_v45 = vpop.eup %6543  ;;  %v2746_v59 = vmax.f32 %v7854_v60, 1e-24 }
 0xa35   :  { %6553 = vrsqrt.f32 %v2741_v1  ;;  %v2834_v61 = vmax.f32 %v2804_v29, 1e-24  ;;  %5964 = vmatprep.subr.bf16.mxu1 %v6470_v35  ;;  %v6546_v44 = vpop.eup %6545  ;;  %v2771_v27 = vmul.f32 %v6544_v45, %v7155_v2 }
 0xa36   :  { %6555 = vrsqrt.f32 %v2833_v26  ;;  %v2772_v63 = vmul.f32 %v6546_v44, %v7151_v17 }
 0xa37   :  { %6557 = vrsqrt.f32 %v2743_v41  ;;  %v2814_v36 = vpop.xlane.xlu0 %2813 }
 0xa38   :  { %6559 = vrsqrt.f32 %v2834_v61  ;;  %v2839_v16 = vmax.f32 %v2814_v36, 1e-24  ;;  %v2816_v50 = vpop.xlane.xlu1 %2815  ;;  %5965 = vmatpush3.bf16.msra.mxu1 %v6470_v35 }
 0xa39   :  { %6561 = vrsqrt.f32 %v2744_v57  ;;  %v2840_v21 = vmax.f32 %v2816_v50, 1e-24  ;;  %5966 = vmatprep.subr.bf16.mxu1 %v6471_v55 }
 0xa3a   :  { %6563 = vrsqrt.f32 %v2839_v16 }
 0xa3b   :  { %6565 = vrsqrt.f32 %v2742_v38  ;;  %v2810_v58 = vpop.xlane.xlu0 %2809  ;;  %5951 = vmatmul.mubr.msk.bf16.gmra.mrb[184].mxu1 %vm260_vm1, %v7623_v32  ;;  %v2748_v32 = vmax.f32 %v7865_v46, 1e-24 }
 0xa3c   :  { %v6548_v7 = vpop.eup %6547  ;;  %6567 = vrsqrt.f32 %v2840_v21  ;;  %v2837_v28 = vmax.f32 %v2810_v58, 1e-24  ;;  %v2812_v11 = vpop.xlane.xlu1 %2811  ;;  %5967 = vmatpush3.bf16.msra.mxu1 %v6471_v55  ;;  %v2749_v58 = vmax.f32 %v7871_v0, 1e-24 }
 0xa3d   :  { %v6550_v5 = vpop.eup %6549  ;;  %6569 = vrsqrt.f32 %v2745_v24  ;;  %v2867_v14 = vmul.f32 %v6548_v7, %v7712_v18  ;;  %v2838_v48 = vmax.f32 %v2812_v11, 1e-24  ;;  %5968 = vmatprep.subr.bf16.mxu1 %v6472_v6  ;;  %v2769_v18 = vmul.f32 %v6542_v34, %v7149_v4 }
 0xa3e   :  { %v6552_v1 = vpop.eup %6551  ;;  %6571 = vrsqrt.f32 %v2837_v28  ;;  %v2770_v38 = vmul.f32 %v6550_v5, %v7153_v20 }
 0xa3f   :  { %v6554_v12 = vpop.eup %6553  ;;  %6573 = vrsqrt.f32 %v2747_v31  ;;  %v2822_v35 = vpop.xlane.xlu0 %2821  ;;  %v2883_v41 = vsub.f32 %v2771_v27, %v2867_v14  ;;  %v2868_v60 = vmul.f32 %v6552_v1, %v7720_v37  ;;  %v2750_v1 = vmax.f32 %v7877_v49, 1e-24 }
 0xa40   :  { %v6556_v22 = vpop.eup %6555  ;;  %6575 = vrsqrt.f32 %v2838_v48  ;;  %v2843_v2 = vmax.f32 %v2822_v35, 1e-24  ;;  %v2824_v57 = vpop.xlane.xlu1 %2823  ;;  %5969 = vmatpush3.bf16.msra.mxu1 %v6472_v6 }
 0xa41   :  { %v6558_v26 = vpop.eup %6557  ;;  %6577 = vrsqrt.f32 %v2746_v59  ;;  %v2899_v29 = vmul.f32 %v2883_v41, %v2883_v41  ;;  %v2884_v61 = vsub.f32 %v2772_v63, %v2868_v60  ;;  %v2865_v17 = vmul.f32 %v6556_v22, %v7723_v8 }
 0xa42   :  { %v6560_v55 = vpop.eup %6559  ;;  %6579 = vrsqrt.f32 %v2843_v2  ;;  %v2844_v46 = vmax.f32 %v2824_v57, 1e-24  ;;  %v2775_v44 = vmul.f32 %v6558_v26, %v7167_v33 }
 0xa43   :  { %v6562_v36 = vpop.eup %6561  ;;  %6581 = vrsqrt.f32 %v2748_v32  ;;  %2917 = vadd.xlane.f32.xlu0 %v2899_v29  ;;  %v2818_v37 = vpop.xlane.xlu0 %2817  ;;  %v2900_v16 = vmul.f32 %v2884_v61, %v2884_v61  ;;  %v2881_v24 = vsub.f32 %v2769_v18, %v2865_v17  ;;  %v2866_v4 = vmul.f32 %v6560_v55, %v7733_v53 }
 0xa44   :  { %v6564_v34 = vpop.eup %6563  ;;  %6583 = vrsqrt.f32 %v2844_v46  ;;  %v2841_v50 = vmax.f32 %v2818_v37, 1e-24  ;;  %v2820_v8 = vpop.xlane.xlu1 %2819  ;;  %v2776_v11 = vmul.f32 %v6562_v36, %v7163_v30 }
 0xa45   :  { %v6566_v45 = vpop.eup %6565  ;;  %2919 = vadd.xlane.f32.xlu1 %v2900_v16  ;;  %v2897_v21 = vmul.f32 %v2881_v24, %v2881_v24  ;;  %v2882_v6 = vsub.f32 %v2770_v38, %v2866_v4  ;;  %v2871_v20 = vmul.f32 %v6564_v34, %v7738_v3  ;;  %v2842_v7 = vmax.f32 %v2820_v8, 1e-24 }
 0xa46   :  { %v6568_v31 = vpop.eup %6567  ;;  %6585 = vrsqrt.f32 %v2841_v50  ;;  %v2773_v3 = vmul.f32 %v6554_v12, %v7161_v15  ;;  %v3254_v60 = vpack.c.bf16 %v2900_v16, %v2899_v29  ;;  %v2774_v30 = vmul.f32 %v6566_v45, %v7165_v19 }
 0xa47   :  { %v6570_v28 = vpop.eup %6569  ;;  %2913 = vadd.xlane.f32.xlu0 %v2897_v21  ;;  %v2734_v53 = vpop.xlane.xlu0 %2733  ;;  %v2898_v5 = vmul.f32 %v2882_v6, %v2882_v6  ;;  %v2887_v59 = vsub.f32 %v2775_v44, %v2871_v20  ;;  %v2872_v27 = vmul.f32 %v6568_v31, %v7746_v47  ;;  %6587 = vrsqrt.f32 %v2842_v7 }
 0xa48   :  { %v6572_v14 = vpop.eup %6571  ;;  %v2736_v48 = vpop.xlane.xlu1 %2735  ;;  %6589 = vrsqrt.f32 %v2749_v58  ;;  %v2751_v22 = vmax.f32 %v2734_v53, 1e-24  ;;  %v2777_v4 = vmul.f32 %v6570_v28, %v7173_v40 }
 0xa49   :  { %v6574_v33 = vpop.eup %6573  ;;  %2915 = vadd.xlane.f32.xlu1 %v2898_v5  ;;  %v3253_v0 = vpack.c.bf16 %v2898_v5, %v2897_v21  ;;  %v2903_v63 = vmul.f32 %v2887_v59, %v2887_v59  ;;  %v2888_v32 = vsub.f32 %v2776_v11, %v2872_v27  ;;  %v2869_v35 = vmul.f32 %v6572_v14, %v7751_v23  ;;  %v8498_v27 = vld [vmem:[#allocation37_spill] sm:$0xff]  ;;  %v8499_v14 = vld [vmem:[#allocation42_spill] sm:$0xff] }
 0xa4a   :  { %v6576_v41 = vpop.eup %6575  ;;  %6591 = vrsqrt.f32 %v2750_v1  ;;  %v2779_v23 = vmul.f32 %v6574_v33, %v7179_v54  ;;  %v2752_v61 = vmax.f32 %v2736_v48, 1e-24  ;;  %v8501_v48 = vld [vmem:[#allocation43_spill] sm:$0xff] }
 0xa4b   :  { %v6578_v47 = vpop.eup %6577  ;;  %5970 = vmatprep.mubr.bf16.mxu1 %v3253_v0  ;;  %2925 = vadd.xlane.f32.xlu0 %v2903_v63  ;;  %v2826_v49 = vpop.xlane.xlu0 %2825  ;;  %v2904_v2 = vmul.f32 %v2888_v32, %v2888_v32  ;;  %v2885_v15 = vsub.f32 %v2773_v3, %v2869_v35  ;;  %v2870_v12 = vmul.f32 %v6576_v41, %v7756_v25 }
 0xa4c   :  { %v6580_v18 = vpop.eup %6579  ;;  %v2845_v26 = vmax.f32 %v2826_v49, 1e-24  ;;  %5971 = vmatmul.mubr.bf16.vlgmr.msra.gmra.mrb[172].mxu1 %v3254_v60  ;;  %v2828_v29 = vpop.xlane.xlu1 %2827 }
 0xa4d   :  { %v6582_v57 = vpop.eup %6581  ;;  %2927 = vadd.xlane.f32.xlu1 %v2904_v2  ;;  %v2901_v19 = vmul.f32 %v2885_v15, %v2885_v15  ;;  %v2886_v17 = vsub.f32 %v2774_v30, %v2870_v12  ;;  %v2875_v55 = vmul.f32 %v6580_v18, %v7761_v9  ;;  %v2846_v38 = vmax.f32 %v2828_v29, 1e-24  ;;  %v8502_v30 = vld [vmem:[#allocation40_spill] sm:$0xff] }
 0xa4e   :  { %v6584_v46 = vpop.eup %6583  ;;  %6593 = vrsqrt.f32 %v2845_v26  ;;  %v2780_v34 = vmul.f32 %v6582_v57, %v7175_v43  ;;  %v3256_v6 = vpack.c.bf16 %v2904_v2, %v2903_v63  ;;  %v8505_v26 = vld [vmem:[#allocation45_spill] sm:$0xff] }
 0xa4f   :  { %6595 = vrsqrt.f32 %v2751_v22  ;;  %2921 = vadd.xlane.f32.xlu0 %v2901_v19  ;;  %v2830_v25 = vpop.xlane.xlu0 %2829  ;;  %v2902_v36 = vmul.f32 %v2886_v17, %v2886_v17  ;;  %v2891_v37 = vsub.f32 %v2779_v23, %v2875_v55  ;;  %v2876_v16 = vmul.f32 %v6584_v46, %v7766_v52  ;;  %v8503_v22 = vld [vmem:[#allocation44_spill] sm:$0xff]  ;;  %v8506_v55 = vld [vmem:[#allocation41_spill] sm:$0xff] }
 0xa50   :  { %v6586_v24 = vpop.eup %6585  ;;  %6597 = vrsqrt.f32 %v2846_v38  ;;  %v2847_v54 = vmax.f32 %v2830_v25, 1e-24  ;;  %v2832_v50 = vpop.xlane.xlu1 %2831  ;;  %v2778_v52 = vmul.f32 %v6578_v47, %v7177_v51  ;;  %v6473_v46 = vld [vmem:[%s8408_s4] sm:$0xff]  }
 0xa51   :  { %6599 = vrsqrt.f32 %v2752_v61  ;;  %2923 = vadd.xlane.f32.xlu1 %v2902_v36  ;;  %v3255_v9 = vpack.c.bf16 %v2902_v36, %v2901_v19  ;;  %v2907_v45 = vmul.f32 %v2891_v37, %v2891_v37  ;;  %v2873_v8 = vmul.f32 %v6586_v24, %v7771_v10  ;;  %v6588_v21 = vpop.eup %6587 }
 0xa52   :  { %6601 = vrsqrt.f32 %v2847_v54  ;;  %v2848_v44 = vmax.f32 %v2832_v50, 1e-24  ;;  %v2892_v20 = vsub.f32 %v2780_v34, %v2876_v16  ;;  %v2874_v40 = vmul.f32 %v6588_v21, %v7776_v39  ;;  %v6590_v43 = vpop.eup %6589 }
 0xa53   :  { %5974 = vmatprep.mubr.bf16.mxu1 %v3255_v9  ;;  %2933 = vadd.xlane.f32.xlu0 %v2907_v45  ;;  %v2889_v31 = vsub.f32 %v2777_v4, %v2873_v8  ;;  %v2781_v51 = vmul.f32 %v6590_v43, %v8498_v27 }
 0xa54   :  { %6603 = vrsqrt.f32 %v2848_v44  ;;  %5975 = vmatmul.mubr.bf16.gmra.mrb[176].mxu1 %v3256_v6  ;;  %v2890_v58 = vsub.f32 %v2778_v52, %v2874_v40  ;;  %v6592_v10 = vpop.eup %6591  ;;  %v2908_v28 = vmul.f32 %v2892_v20, %v2892_v20 }
 0xa55   :  { %3025 = vadd.xlane.f32.xlu1 %v7834_v42  ;;  %v2905_v7 = vmul.f32 %v2889_v31, %v2889_v31  ;;  %v8500_v42 = vld [vmem:[#allocation39_spill] sm:$0xff] }
 0xa56   :  { %v2906_v53 = vmul.f32 %v2890_v58, %v2890_v58  ;;  %v3258_v3 = vpack.c.bf16 %v2908_v28, %v2907_v45  ;;  %v2782_v0 = vmul.f32 %v6592_v10, %v8500_v42 }
 0xa57   :  { %2929 = vadd.xlane.f32.xlu0 %v2905_v7 }
 0xa58   :  { %v6594_v5 = vpop.eup %6593  ;;  %v3257_v11 = vpack.c.bf16 %v2906_v53, %v2905_v7 }
 0xa59   :  { %v6596_v59 = vpop.eup %6595  ;;  %2935 = vadd.xlane.f32.xlu1 %v2908_v28  ;;  %v2877_v39 = vmul.f32 %v6594_v5, %v8499_v14 }
 0xa5a   :  { %v6598_v1 = vpop.eup %6597  ;;  %5978 = vmatprep.mubr.bf16.mxu1 %v3257_v11  ;;  %v2783_v47 = vmul.f32 %v6596_v59, %v8502_v30 }
 0xa5b   :  { %v6600_v33 = vpop.eup %6599  ;;  %3023 = vadd.xlane.f32.xlu0 %v7832_v13  ;;  %v2878_v63 = vmul.f32 %v6598_v1, %v8501_v48  ;;  %v2893_v32 = vsub.f32 %v2781_v51, %v2877_v39  ;;  %v8504_v13 = vld [vmem:[#allocation38_spill] sm:$0xff] }
 0xa5c   :  { %v6602_v35 = vpop.eup %6601  ;;  %5979 = vmatmul.mubr.bf16.gmra.mrb[180].mxu1 %v3258_v3  ;;  %v2784_v18 = vmul.f32 %v6600_v33, %v8504_v13 }
 0xa5d   :  { %2931 = vadd.xlane.f32.xlu1 %v2906_v53  ;;  %v2894_v41 = vsub.f32 %v2782_v0, %v2878_v63  ;;  %v2909_v60 = vmul.f32 %v2893_v32, %v2893_v32  ;;  %v2879_v49 = vmul.f32 %v6602_v35, %v8503_v22 }
 0xa5e   :  { %v6604_v2 = vpop.eup %6603 }
 0xa5f   :  { %v2910_v15 = vmul.f32 %v2894_v41, %v2894_v41  ;;  %2937 = vadd.xlane.f32.xlu0 %v2909_v60  ;;  %v2895_v12 = vsub.f32 %v2783_v47, %v2879_v49  ;;  %v2880_v23 = vmul.f32 %v6604_v2, %v8505_v26 }
 0xa61   :  { %v3259_v57 = vpack.c.bf16 %v2910_v15, %v2909_v60  ;;  %3027 = vadd.xlane.f32.xlu1 %v7848_v56  ;;  %v2911_v61 = vmul.f32 %v2895_v12, %v2895_v12  ;;  %v2896_v29 = vsub.f32 %v2784_v18, %v2880_v23 }
 0xa63   :  { %5982 = vmatprep.mubr.bf16.mxu1 %v3259_v57  ;;  %2941 = vadd.xlane.f32.xlu0 %v2911_v61  ;;  %v2912_v19 = vmul.f32 %v2896_v29, %v2896_v29 }
 0xa65   :  { %2939 = vadd.xlane.f32.xlu1 %v2910_v15  ;;  %v3260_v17 = vpack.c.bf16 %v2912_v19, %v2911_v61 }
 0xa67   :  { %2943 = vadd.xlane.f32.xlu0 %v2912_v19  ;;  %5983 = vmatmul.mubr.bf16.gmra.mrb[184].mxu1 %v3260_v17 }
 0xa68   :  { %5990 = vmatprep.mubr.msk.bf16.mxu1 %vm1522_vm3, %v6473_v46  ;;  %v6474_v46 = vld [vmem:[%s8408_s4 + $0x8] sm:$0xff]  }
 0xa69   :  { %3029 = vadd.xlane.f32.xlu1 %v7850_v62 }
 0xa6b   :  { %3055 = vadd.xlane.f32.xlu0 %v8506_v55 }
 0xad0   :  { %v2918_v56 = vpop.xlane.xlu0 %2917 }
 0xad2   :  { %v2920_v38 = vpop.xlane.xlu1 %2919 }
 0xad4   :  { %v2914_v25 = vpop.xlane.xlu0 %2913 }
 0xad6   :  { %v2916_v36 = vpop.xlane.xlu1 %2915 }
 0xad7   :  { %v2945_v37 = vadd.f32 %v2916_v36, %v2914_v25 }
 0xad8   :  { %v2926_v16 = vpop.xlane.xlu0 %2925 }
 0xad9   :  { %v2946_v24 = vadd.f32 %v2945_v37, %v2918_v56  ;;  %v6475_v56 = vld [vmem:[%s8408_s4 + $0x10] sm:$0xff]  }
 0xada   :  { %v2928_v54 = vpop.xlane.xlu1 %2927 }
 0xadb   :  { %v2947_v4 = vadd.f32 %v2946_v24, %v2920_v38  ;;  %v6476_v24 = vld [vmem:[%s8408_s4 + $0x18] sm:$0xff]  }
 0xadc   :  { %v2922_v34 = vpop.xlane.xlu0 %2921 }
 0xadd   :  { %v2948_v9 = vadd.f32 %v2947_v4, %v2922_v34  ;;  %v6478_v4 = vld [vmem:[%s8408_s4 + $0x28] sm:$0xff]   ;;  %v6479_v34 = vld [vmem:[%s8408_s4 + $0x30] sm:$0xff]  }
 0xade   :  { %v2924_v62 = vpop.xlane.xlu1 %2923 }
 0xadf   :  { %v2949_v50 = vadd.f32 %v2948_v9, %v2924_v62  ;;  %v6480_v9 = vld [vmem:[%s8408_s4 + $0x38] sm:$0xff]   ;;  %v6481_v62 = vld [vmem:[%s8407_s3] sm:$0xff]  }
 0xae0   :  { %v2934_v45 = vpop.xlane.xlu0 %2933  ;;  %6022 = vmatprep.mubr.bf16.mxu0 %v6481_v62  ;;  %v8507_v62 = vld [vmem:[#allocation6_spill] sm:$0xff] }
 0xae1   :  { %v2950_v8 = vadd.f32 %v2949_v50, %v2926_v16 }
 0xae2   :  { %v3026_v21 = vpop.xlane.xlu1 %3025 }
 0xae3   :  { %v2951_v44 = vadd.f32 %v2950_v8, %v2928_v54  ;;  %v6477_v54 = vld [vmem:[%s8408_s4 + $0x20] sm:$0xff]  }
 0xae4   :  { %v2930_v6 = vpop.xlane.xlu0 %2929 }
 0xae5   :  { %v2952_v40 = vadd.f32 %v2951_v44, %v2930_v6 }
 0xae6   :  { %v2936_v20 = vpop.xlane.xlu1 %2935 }
 0xae8   :  { %v3024_v52 = vpop.xlane.xlu0 %3023 }
 0xae9   :  { %v3031_v11 = vadd.f32 %v3026_v21, %v3024_v52 }
 0xaea   :  { %v2932_v31 = vpop.xlane.xlu1 %2931 }
 0xaeb   :  { %v2953_v43 = vadd.f32 %v2952_v40, %v2932_v31 }
 0xaec   :  { %v2938_v58 = vpop.xlane.xlu0 %2937 }
 0xaed   :  { %v2954_v7 = vadd.f32 %v2953_v43, %v2934_v45 }
 0xaee   :  { %v3028_v10 = vpop.xlane.xlu1 %3027 }
 0xaef   :  { %v2955_v28 = vadd.f32 %v2954_v7, %v2936_v20  ;;  %v3032_v14 = vadd.f32 %v3031_v11, %v3028_v10 }
 0xaf0   :  { %v2942_v53 = vpop.xlane.xlu0 %2941 }
 0xaf1   :  { %v2956_v5 = vadd.f32 %v2955_v28, %v2938_v58 }
 0xaf2   :  { %v2940_v59 = vpop.xlane.xlu1 %2939 }
 0xaf3   :  { %v2957_v27 = vadd.f32 %v2956_v5, %v2940_v59 }
 0xaf4   :  { %v2944_v51 = vpop.xlane.xlu0 %2943 }
 0xaf5   :  { %v2958_v39 = vadd.f32 %v2957_v27, %v2942_v53 }
 0xaf6   :  { %v3030_v1 = vpop.xlane.xlu1 %3029 }
 0xaf7   :  { %v2959_v3 = vadd.f32 %v2958_v39, %v2944_v51  ;;  %v3033_v33 = vadd.f32 %v3032_v14, %v3030_v1 }
 0xaf8   :  { %v3056_v42 = vpop.xlane.xlu0 %3055 }
 0xaf9   :  { %v2960_v0 = vrot.slane %v2959_v3, 4  ;;  %v3034_v48 = vrot.slane %v3033_v33, 4  ;;  %v3057_v63 = vrot.slane %v3056_v42, 4  ;;  %v5934_v32 = vpop.f32.mrb[40].mxu0 }
 0xafa   :  { %v3361_v30 = vpop.f32.mrb[41].mxu0 }
 0xafb   :  { %v2961_v35 = vadd.f32 %v2960_v0, %v2959_v3  ;;  %v3035_v41 = vadd.f32 %v3034_v48, %v3033_v33  ;;  %v3058_v60 = vadd.f32 %v3057_v63, %v3056_v42  ;;  %v5935_v47 = vpop.f32.mrb[42].mxu0  ;;  %v6507_v3 = vld [vmem:[%s8405_s1 + $0x388] sm:$0xff]   ;;  %v6483_v42 = vld [vmem:[%s8407_s3 + $0x10] sm:$0xff]   ;;  %v6511_v48 = vld [vmem:[%s8405_s1 + $0x398] sm:$0xff]  }
 0xafc   :  { %v3639_v15 = vpack.c.bf16 %v5935_v47, %v5934_v32  ;;  %v3364_v12 = vpop.f32.mrb[43].mxu0  ;;  %v6482_v33 = vld [vmem:[%s8407_s3 + $0x8] sm:$0xff]   ;;  %v6508_v0 = vld [vmem:[%s8405_s1 + $0x390] sm:$0xff]   ;;  %v6484_v63 = vld [vmem:[%s8407_s3 + $0x18] sm:$0xff]  }
 0xafd   :  { %v2962_v22 = vrot.slane %v2961_v35, 2  ;;  %v3036_v49 = vrot.slane %v3035_v41, 2  ;;  %v3059_v2 = vrot.slane %v3058_v60, 2  ;;  %v3638_v13 = vpack.c.bf16 %v3364_v12, %v3361_v30  ;;  %v6485_v32 = vld [vmem:[%s8407_s3 + $0x20] sm:$0xff]   ;;  %v6487_v30 = vld [vmem:[%s8407_s3 + $0x30] sm:$0xff]   ;;  %v6490_v12 = vld [vmem:[%s8407_s3 + $0x48] sm:$0xff]  }
 0xafe   :  { %v6516_v47 = vld [vmem:[%s8405_s1 + $0x3b0] sm:$0xff]  }
 0xaff   :  { %v2963_v18 = vadd.f32 %v2962_v22, %v2961_v35  ;;  %v3037_v26 = vadd.f32 %v3036_v49, %v3035_v41  ;;  %v3060_v23 = vadd.f32 %v3059_v2, %v3058_v60  ;;  %5986 = vmatprep.subr.bf16.mxu1 %v3638_v13  ;;  %v6512_v35 = vld [vmem:[%s8405_s1 + $0x3a0] sm:$0xff]   ;;  %v6515_v41 = vld [vmem:[%s8405_s1 + $0x3a8] sm:$0xff]   ;;  %v6519_v22 = vld [vmem:[%s8405_s1 + $0x3b8] sm:$0xff]  }
 0xb00   :  { %5987 = vmatpush3.bf16.msra.mxu1 %v3638_v13  ;;  %v6486_v60 = vld [vmem:[%s8407_s3 + $0x28] sm:$0xff]   ;;  %v6488_v49 = vld [vmem:[%s8407_s3 + $0x38] sm:$0xff]   ;;  %v6489_v2 = vld [vmem:[%s8407_s3 + $0x40] sm:$0xff]  }
 0xb01   :  { %v2964_v57 = vrot.slane %v2963_v18, 1  ;;  %v3038_v61 = vrot.slane %v3037_v26, 1  ;;  %v3061_v29 = vrot.slane %v3060_v23, 1  ;;  %5988 = vmatprep.subr.bf16.mxu1 %v3639_v15  ;;  %v6491_v13 = vld [vmem:[%s8407_s3 + $0x50] sm:$0xff]  }
 0xb03   :  { %v2965_v19 = vadd.f32 %v2964_v57, %v2963_v18  ;;  %v3039_v17 = vadd.f32 %v3038_v61, %v3037_v26  ;;  %v3062_v55 = vadd.f32 %v3061_v29, %v3060_v23  ;;  %v6492_v18 = vld [vmem:[%s8407_s3 + $0x58] sm:$0xff]   ;;  %v6493_v26 = vld [vmem:[%s8407_s3 + $0x60] sm:$0xff]   ;;  %v6494_v23 = vld [vmem:[%s8407_s3 + $0x68] sm:$0xff]  }
 0xb04   :  { %5989 = vmatpush3.bf16.msra.mxu1 %v3639_v15  ;;  %v6520_v15 = vld [vmem:[%s8405_s1 + $0x3c0] sm:$0xff]   ;;  %v6495_v57 = vld [vmem:[%s8407_s3 + $0x70] sm:$0xff]   ;;  %v6496_v61 = vld [vmem:[%s8407_s3 + $0x78] sm:$0xff]  }
 0xb05   :  { %v2966_v38 = vmul.f32 0.00024414063, %v2965_v19  ;;  %v3040_v25 = vmul.f32 0.00048828125, %v3039_v17  ;;  %v3063_v36 = vmul.f32 0.0009765625, %v3062_v55  ;;  %v6497_v29 = vld [vmem:[%s8407_s3 + $0x80] sm:$0xff]   ;;  %v6498_v19 = vld [vmem:[%s8407_s3 + $0x88] sm:$0xff]   ;;  %v6499_v17 = vld [vmem:[%s8407_s3 + $0x90] sm:$0xff]  }
 0xb06   :  { %v6500_v55 = vld [vmem:[%s8407_s3 + $0x98] sm:$0xff]  }
 0xb07   :  { %v3064_v37 = vadd.f32 %v3040_v25, %v2966_v38  ;;  %5991 = vmatmul.mubr.msk.bf16.vlgmr.msra.gmra.mrb[172].mxu1 %vm1522_vm3, %v6474_v46  ;;  %v6501_v46 = vld [vmem:[%s8407_s3 + $0xa0] sm:$0xff]   ;;  %v6503_v38 = vld [vmem:[%s8407_s3 + $0xb0] sm:$0xff]   ;;  %v6504_v25 = vld [vmem:[%s8407_s3 + $0xb8] sm:$0xff]  }
 0xb08   :  { %5994 = vmatprep.mubr.msk.bf16.mxu1 %vm1522_vm3, %v6475_v56  ;;  %v6502_v56 = vld [vmem:[%s8407_s3 + $0xa8] sm:$0xff]  }
 0xb09   :  { %v3065_v16 = vadd.f32 %v3064_v37, %v3063_v36  ;;  %v6505_v36 = vld [vmem:[%s8407_s3 + $0xc0] sm:$0xff]   ;;  %v6506_v37 = vld [vmem:[%s8407_s3 + $0xc8] sm:$0xff]  }
 0xb0b   :  { %3066 = vst [vmem:[#allocation2] sm:$0x1] %v3065_v16  ;;  %v6509_v16 = vld [vmem:[%s8407_s3 + $0xd0] sm:$0xff]  }
 0xb0f   :  { %5995 = vmatmul.mubr.msk.bf16.gmra.mrb[176].mxu1 %vm1522_vm3, %v6476_v24  ;;  %v6510_v24 = vld [vmem:[%s8407_s3 + $0xd8] sm:$0xff]  }
 0xb10   :  { %5998 = vmatprep.mubr.msk.bf16.mxu1 %vm1522_vm3, %v6477_v54  ;;  %v6513_v54 = vld [vmem:[%s8407_s3 + $0xe0] sm:$0xff]  }
 0xb17   :  { %5999 = vmatmul.mubr.msk.bf16.gmra.mrb[180].mxu1 %vm1522_vm3, %v6478_v4  ;;  %v6514_v4 = vld [vmem:[%s8407_s3 + $0xe8] sm:$0xff]  }
 0xb18   :  { %6002 = vmatprep.mubr.msk.bf16.mxu1 %vm1522_vm3, %v6479_v34  ;;  %v6517_v34 = vld [vmem:[%s8407_s3 + $0xf0] sm:$0xff]  }
 0xb1f   :  { %6003 = vmatmul.mubr.msk.bf16.gmra.mrb[184].mxu1 %vm1522_vm3, %v6480_v9  ;;  %v6518_v9 = vld [vmem:[%s8407_s3 + $0xf8] sm:$0xff]   ;;  %s6631_s3 = smov [#allocation2]  }
 0xb20   :  { %s4864_s15 = sshll.u32 %s6631_s3, 4  ;;  %s4865_s15 = int_to_ptr.vmem [resolvable:$true] %s4864_s15 }
 0xb21   :  { %s6605_s17 = scalar_lea.vmem %s4865_s15, 16  ;;  %s6609_s18 = scalar_lea.vmem %s4865_s15, 32 }
 0xb22   :  { %p6606_p0 = scmp.ne.s32.totalorder %s4865_s15, %s6605_s17  ;;  %p6610_p1 = scmp.lt.s32.totalorder %s4865_s15, %s4865_s15 }
 0xb23   :  { %p6611_p2 = scmp.lt.s32.totalorder %s6609_s18, %s6605_s17 }
 0xb25   :  { %p6612_p3 = por %p6611_p2, %p6610_p1 }
 0xb27   :  { %p6613_p4 = pnand %p6612_p3, %p6606_p0 }
 0xbda   :  { %v5992_v50 = vpop.f32.mrb[172].mxu1 }
 0xbdb   :  { %v3738_v45 = vpop.f32.mrb[173].mxu1 }
 0xbdc   :  { %v5993_v8 = vpop.f32.mrb[174].mxu1 }
 0xbdd   :  { %v3898_v21 = vpack.c.bf16 %v5993_v8, %v5992_v50  ;;  %v3741_v6 = vpop.f32.mrb[175].mxu1  ;;  %v8508_v50 = vld [vmem:[#allocation5_spill] sm:$0xff]  ;;  %v8510_v8 = vld [vmem:[#allocation7_spill] sm:$0xff] }
 0xbde   :  { %v3897_v44 = vpack.c.bf16 %v3741_v6, %v3738_v45  ;;  %v8509_v45 = vld [vmem:[#allocation8_spill] sm:$0xff]  ;;  %v8512_v6 = vld [vmem:[#allocation9_spill] sm:$0xff] }
 0xbe0   :  { %6006 = vmatprep.subr.bf16.mxu0 %v3897_v44 }
 0xbe1   :  { %6007 = vmatpush3.bf16.msra.mxu0 %v3897_v44  ;;  %v8513_v44 = vld [vmem:[#allocation12_spill] sm:$0xff] }
 0xbe2   :  { %v5996_v20 = vpop.f32.mrb[176].mxu1  ;;  %6008 = vmatprep.subr.bf16.mxu0 %v3898_v21 }
 0xbe3   :  { %v3754_v52 = vpop.f32.mrb[177].mxu1 }
 0xbe4   :  { %v5997_v40 = vpop.f32.mrb[178].mxu1 }
 0xbe5   :  { %v3900_v31 = vpack.c.bf16 %v5997_v40, %v5996_v20  ;;  %v3757_v43 = vpop.f32.mrb[179].mxu1  ;;  %6009 = vmatpush3.bf16.msra.mxu0 %v3898_v21  ;;  %v8511_v21 = vld [vmem:[#allocation10_spill] sm:$0xff]  ;;  %v8514_v20 = vld [vmem:[#allocation11_spill] sm:$0xff]  ;;  %v8516_v40 = vld [vmem:[#allocation13_spill] sm:$0xff] }
 0xbe6   :  { %v3899_v58 = vpack.c.bf16 %v3757_v43, %v3754_v52  ;;  %v8515_v52 = vld [vmem:[#allocation14_spill] sm:$0xff]  ;;  %v8518_v43 = vld [vmem:[#allocation15_spill] sm:$0xff] }
 0xbe8   :  { %6010 = vmatprep.subr.bf16.mxu0 %v3899_v58 }
 0xbe9   :  { %6011 = vmatpush3.bf16.msra.mxu0 %v3899_v58  ;;  %v8519_v58 = vld [vmem:[#allocation18_spill] sm:$0xff] }
 0xbea   :  { %v6000_v7 = vpop.f32.mrb[180].mxu1  ;;  %6012 = vmatprep.subr.bf16.mxu0 %v3900_v31 }
 0xbeb   :  { %v3770_v10 = vpop.f32.mrb[181].mxu1 }
 0xbec   :  { %v6001_v28 = vpop.f32.mrb[182].mxu1 }
 0xbed   :  { %v3902_v53 = vpack.c.bf16 %v6001_v28, %v6000_v7  ;;  %v3773_v5 = vpop.f32.mrb[183].mxu1  ;;  %6013 = vmatpush3.bf16.msra.mxu0 %v3900_v31  ;;  %v8517_v31 = vld [vmem:[#allocation16_spill] sm:$0xff]  ;;  %v8520_v7 = vld [vmem:[#allocation17_spill] sm:$0xff]  ;;  %v8522_v28 = vld [vmem:[#allocation19_spill] sm:$0xff] }
 0xbee   :  { %v3901_v59 = vpack.c.bf16 %v3773_v5, %v3770_v10  ;;  %v8521_v10 = vld [vmem:[#allocation20_spill] sm:$0xff]  ;;  %v8524_v5 = vld [vmem:[#allocation21_spill] sm:$0xff] }
 0xbf0   :  { %6014 = vmatprep.subr.bf16.mxu0 %v3901_v59 }
 0xbf1   :  { %6015 = vmatpush3.bf16.msra.mxu0 %v3901_v59  ;;  %v8525_v59 = vld [vmem:[#allocation24_spill] sm:$0xff] }
 0xbf2   :  { %v6004_v11 = vpop.f32.mrb[184].mxu1  ;;  %6016 = vmatprep.subr.bf16.mxu0 %v3902_v53 }
 0xbf3   :  { %v3786_v27 = vpop.f32.mrb[185].mxu1 }
 0xbf4   :  { %v6005_v51 = vpop.f32.mrb[186].mxu1 }
 0xbf5   :  { %v3904_v14 = vpack.c.bf16 %v6005_v51, %v6004_v11  ;;  %v3789_v39 = vpop.f32.mrb[187].mxu1  ;;  %6017 = vmatpush3.bf16.msra.mxu0 %v3902_v53  ;;  %v8523_v53 = vld [vmem:[#allocation22_spill] sm:$0xff]  ;;  %v8526_v11 = vld [vmem:[#allocation23_spill] sm:$0xff]  ;;  %v8528_v51 = vld [vmem:[#allocation25_spill] sm:$0xff] }
 0xbf6   :  { %v3903_v1 = vpack.c.bf16 %v3789_v39, %v3786_v27  ;;  %v8527_v27 = vld [vmem:[#allocation26_spill] sm:$0xff]  ;;  %v8530_v39 = vld [vmem:[#allocation27_spill] sm:$0xff] }
 0xbf8   :  { %6018 = vmatprep.subr.bf16.mxu0 %v3903_v1 }
 0xbf9   :  { %6019 = vmatpush3.bf16.msra.mxu0 %v3903_v1  ;;  %v8531_v1 = vld [vmem:[#allocation30_spill] sm:$0xff] }
 0xbfa   :  { %6020 = vmatprep.subr.bf16.mxu0 %v3904_v14 }
 0xbfd   :  { %6021 = vmatpush3.bf16.msra.mxu0 %v3904_v14  ;;  %v8529_v14 = vld [vmem:[#allocation28_spill] sm:$0xff] }
 0xbfe   :  { %6086 = vmatprep.subr.bf16.mxu0 %v6507_v3 }
 0xc00   :  { %6023 = vmatmul.mubr.bf16.vlgmr.msra.gmra.mrb[44].mxu0 %v6482_v33  ;;  %v8533_v33 = vld [vmem:[#allocation32_spill] sm:$0xff] }
 0xc01   :  { %6026 = vmatprep.mubr.bf16.mxu0 %v6483_v42  ;;  %6087 = vmatpush3.bf16.msra.mxu0 %v6507_v3  ;;  %v8532_v3 = vld [vmem:[#allocation29_spill] sm:$0xff]  ;;  %v8534_v42 = vld [vmem:[#allocation31_spill] sm:$0xff] }
 0xc02   :  { %6088 = vmatprep.subr.bf16.mxu0 %v6508_v0 }
 0xc05   :  { %6089 = vmatpush3.bf16.msra.mxu0 %v6508_v0  ;;  %v8535_v0 = vld [vmem:[#allocation34_spill] sm:$0xff] }
 0xc06   :  { %6090 = vmatprep.subr.bf16.mxu0 %v6511_v48 }
 0xc08   :  { %6027 = vmatmul.mubr.bf16.gmra.mrb[48].mxu0 %v6484_v63  ;;  %v8537_v63 = vld [vmem:[#allocation36_spill] sm:$0xff] }
 0xc09   :  { %6030 = vmatprep.mubr.bf16.mxu0 %v6485_v32  ;;  %6091 = vmatpush3.bf16.msra.mxu0 %v6511_v48  ;;  %v8536_v48 = vld [vmem:[#allocation33_spill] sm:$0xff]  ;;  %v8538_v32 = vld [vmem:[#allocation35_spill] sm:$0xff] }
 0xc0a   :  { %6092 = vmatprep.subr.bf16.mxu0 %v6512_v35 }
 0xc0d   :  { %6093 = vmatpush3.bf16.msra.mxu0 %v6512_v35  ;;  %v8134_v35 = vld [vmem:[%s8406_s2 + $0x48] ss:$0 sm:$0xff] }
 0xc0e   :  { %6094 = vmatprep.subr.bf16.mxu0 %v6515_v41 }
 0xc10   :  { %6031 = vmatmul.mubr.bf16.gmra.mrb[52].mxu0 %v6486_v60 }
 0xc11   :  { %6034 = vmatprep.mubr.bf16.mxu0 %v6487_v30  ;;  %6095 = vmatpush3.bf16.msra.mxu0 %v6515_v41 }
 0xc12   :  { %6096 = vmatprep.subr.bf16.mxu0 %v6516_v47 }
 0xc15   :  { %6097 = vmatpush3.bf16.msra.mxu0 %v6516_v47 }
 0xc16   :  { %6098 = vmatprep.subr.bf16.mxu0 %v6519_v22 }
 0xc18   :  { %6035 = vmatmul.mubr.bf16.gmra.mrb[56].mxu0 %v6488_v49 }
 0xc19   :  { %6038 = vmatprep.mubr.bf16.mxu0 %v6489_v2  ;;  %6099 = vmatpush3.bf16.msra.mxu0 %v6519_v22 }
 0xc1a   :  { %6100 = vmatprep.subr.bf16.mxu0 %v6520_v15 }
 0xc1d   :  { %6101 = vmatpush3.bf16.msra.mxu0 %v6520_v15 }
 0xc20   :  { %6039 = vmatmul.mubr.bf16.gmra.mrb[60].mxu0 %v6490_v12 }
 0xc21   :  { %6042 = vmatprep.mubr.bf16.mxu0 %v6491_v13 }
 0xc28   :  { %6043 = vmatmul.mubr.bf16.gmra.mrb[64].mxu0 %v6492_v18 }
 0xc29   :  { %6046 = vmatprep.mubr.bf16.mxu0 %v6493_v26 }
 0xc30   :  { %6047 = vmatmul.mubr.bf16.gmra.mrb[68].mxu0 %v6494_v23 }
 0xc31   :  { %6050 = vmatprep.mubr.bf16.mxu0 %v6495_v57 }
 0xc38   :  { %6051 = vmatmul.mubr.bf16.gmra.mrb[72].mxu0 %v6496_v61 }
 0xc39   :  { %6054 = vmatprep.mubr.bf16.mxu0 %v6497_v29 }
 0xc40   :  { %6055 = vmatmul.mubr.bf16.gmra.mrb[76].mxu0 %v6498_v19 }
 0xc41   :  { %6058 = vmatprep.mubr.bf16.mxu0 %v6499_v17 }
 0xc48   :  { %6059 = vmatmul.mubr.bf16.gmra.mrb[80].mxu0 %v6500_v55 }
 0xc49   :  { %6062 = vmatprep.mubr.bf16.mxu0 %v6501_v46 }
 0xc50   :  { %6063 = vmatmul.mubr.bf16.gmra.mrb[84].mxu0 %v6502_v56 }
 0xc51   :  { %6066 = vmatprep.mubr.bf16.mxu0 %v6503_v38 }
 0xc58   :  { %6067 = vmatmul.mubr.bf16.gmra.mrb[88].mxu0 %v6504_v25 }
 0xc59   :  { %6070 = vmatprep.mubr.bf16.mxu0 %v6505_v36 }
 0xc60   :  { %6071 = vmatmul.mubr.bf16.gmra.mrb[92].mxu0 %v6506_v37 }
 0xc61   :  { %6074 = vmatprep.mubr.bf16.mxu0 %v6509_v16 }
 0xc68   :  { %6075 = vmatmul.mubr.bf16.gmra.mrb[96].mxu0 %v6510_v24 }
 0xc69   :  { %6078 = vmatprep.mubr.bf16.mxu0 %v6513_v54 }
 0xc70   :  { %6079 = vmatmul.mubr.bf16.gmra.mrb[100].mxu0 %v6514_v4 }
 0xc71   :  { %6082 = vmatprep.mubr.bf16.mxu0 %v6517_v34 }
 0xc78   :  { %6083 = vmatmul.mubr.bf16.gmra.mrb[104].mxu0 %v6518_v9 }
 0xc79   :  { %6102 = vmatprep.mubr.bf16.mxu0 %v8507_v62 }
 0xc80   :  { %6103 = vmatmul.mubr.bf16.vlgmr.msra.gmra.mrb[44].mxu0 %v8508_v50 }
 0xc81   :  { %6106 = vmatprep.mubr.bf16.mxu0 %v8509_v45 }
 0xc88   :  { %6107 = vmatmul.mubr.bf16.gmra.mrb[48].mxu0 %v8510_v8 }
 0xc89   :  { %6110 = vmatprep.mubr.bf16.mxu0 %v8511_v21 }
 0xc90   :  { %6111 = vmatmul.mubr.bf16.gmra.mrb[52].mxu0 %v8512_v6 }
 0xc91   :  { %6114 = vmatprep.mubr.bf16.mxu0 %v8513_v44 }
 0xc98   :  { %6115 = vmatmul.mubr.bf16.gmra.mrb[56].mxu0 %v8514_v20 }
 0xc99   :  { %6118 = vmatprep.mubr.bf16.mxu0 %v8515_v52 }
 0xca0   :  { %6119 = vmatmul.mubr.bf16.gmra.mrb[60].mxu0 %v8516_v40 }
 0xca1   :  { %6122 = vmatprep.mubr.bf16.mxu0 %v8517_v31 }
 0xca8   :  { %6123 = vmatmul.mubr.bf16.gmra.mrb[64].mxu0 %v8518_v43 }
 0xca9   :  { %6126 = vmatprep.mubr.bf16.mxu0 %v8519_v58 }
 0xcb0   :  { %6127 = vmatmul.mubr.bf16.gmra.mrb[68].mxu0 %v8520_v7 }
 0xcb1   :  { %6130 = vmatprep.mubr.bf16.mxu0 %v8521_v10 }
 0xcb8   :  { %6131 = vmatmul.mubr.bf16.gmra.mrb[72].mxu0 %v8522_v28 }
 0xcb9   :  { %6134 = vmatprep.mubr.bf16.mxu0 %v8523_v53 }
 0xcc0   :  { %6135 = vmatmul.mubr.bf16.gmra.mrb[76].mxu0 %v8524_v5 }
 0xcc1   :  { %6138 = vmatprep.mubr.bf16.mxu0 %v8525_v59 }
 0xcc8   :  { %6139 = vmatmul.mubr.bf16.gmra.mrb[80].mxu0 %v8526_v11 }
 0xcc9   :  { %6142 = vmatprep.mubr.bf16.mxu0 %v8527_v27 }
 0xcd0   :  { %6143 = vmatmul.mubr.bf16.gmra.mrb[84].mxu0 %v8528_v51 }
 0xcd1   :  { %6146 = vmatprep.mubr.bf16.mxu0 %v8529_v14 }
 0xcd8   :  { %6147 = vmatmul.mubr.bf16.gmra.mrb[88].mxu0 %v8530_v39 }
 0xcd9   :  { %6150 = vmatprep.mubr.bf16.mxu0 %v8531_v1 }
 0xce0   :  { %6151 = vmatmul.mubr.bf16.gmra.mrb[92].mxu0 %v8532_v3 }
 0xce1   :  { %6154 = vmatprep.mubr.bf16.mxu0 %v8533_v33 }
 0xce8   :  { %6155 = vmatmul.mubr.bf16.gmra.mrb[96].mxu0 %v8534_v42 }
 0xce9   :  { %6158 = vmatprep.mubr.bf16.mxu0 %v8535_v0 }
 0xcf0   :  { %6159 = vmatmul.mubr.bf16.gmra.mrb[100].mxu0 %v8536_v48 }
 0xcf1   :  { %6162 = vmatprep.mubr.bf16.mxu0 %v8537_v63 }
 0xcf8   :  { %6163 = vmatmul.mubr.bf16.gmra.mrb[104].mxu0 %v8538_v32 }
 0xcf9   :  { %6616 = shalt.err (!%p6613_p4)
}
 0xcfa   :  { %s6617_s21 = scalar_lea.hbm %s8412_s8, 16 }
 0xcfb   :  { %p6618_p5 = scmp.ne.s32.totalorder %s8412_s8, %s6617_s21  ;;  %p6621_p6 = scmp.lt.u32.totalorder %s6617_s21, %s8412_s8 }
 0xcfd   :  { %p6623_p7 = pnand %p6621_p6, %p6618_p5 }
 0xcff   :  { %6626 = shalt.err (!%p6623_p7)
}
 0xd00   :  { %4867 = dma.vmem_to_hbm [thread:$0]  %s4865_s15, 16, %s8412_s8, [#allocation3]  }
 0xd53   :  { %v6104_v41 = vpop.f32.mrb[44].mxu0 }
 0xd54   :  { %v4730_v60 = vadd.f32 %v6104_v41, %v8134_v35  ;;  %v4468_v30 = vpop.f32.mrb[45].mxu0 }
 0xd55   :  { %v4728_v47 = vadd.f32 %v8134_v35, %v4468_v30  ;;  %v6105_v22 = vpop.f32.mrb[46].mxu0 }
 0xd56   :  { %4794 = vst [vmem:[%s8411_s7 + $0x10] sm:$0xff] %v4730_v60  ;;  %v4731_v49 = vadd.f32 %v6105_v22, %v8134_v35  ;;  %v4471_v2 = vpop.f32.mrb[47].mxu0 }
 0xd57   :  { %4792 = vst [vmem:[%s8411_s7] sm:$0xff] %v4728_v47  ;;  %v4729_v15 = vadd.f32 %v8134_v35, %v4471_v2 }
 0xd58   :  { %4795 = vst [vmem:[%s8411_s7 + $0x18] sm:$0xff] %v4731_v49 }
 0xd59   :  { %4793 = vst [vmem:[%s8411_s7 + $0x8] sm:$0xff] %v4729_v15 }
 0xd5b   :  { %v6108_v12 = vpop.f32.mrb[48].mxu0 }
 0xd5c   :  { %v4734_v13 = vadd.f32 %v6108_v12, %v8134_v35  ;;  %v4484_v18 = vpop.f32.mrb[49].mxu0 }
 0xd5d   :  { %v4732_v26 = vadd.f32 %v8134_v35, %v4484_v18  ;;  %v6109_v23 = vpop.f32.mrb[50].mxu0 }
 0xd5e   :  { %4798 = vst [vmem:[%s8411_s7 + $0x30] sm:$0xff] %v4734_v13  ;;  %v4735_v57 = vadd.f32 %v6109_v23, %v8134_v35  ;;  %v4487_v61 = vpop.f32.mrb[51].mxu0 }
 0xd5f   :  { %4796 = vst [vmem:[%s8411_s7 + $0x20] sm:$0xff] %v4732_v26  ;;  %v4733_v29 = vadd.f32 %v8134_v35, %v4487_v61 }
 0xd60   :  { %4799 = vst [vmem:[%s8411_s7 + $0x38] sm:$0xff] %v4735_v57 }
 0xd61   :  { %4797 = vst [vmem:[%s8411_s7 + $0x28] sm:$0xff] %v4733_v29 }
 0xd63   :  { %v6112_v19 = vpop.f32.mrb[52].mxu0 }
 0xd64   :  { %v4738_v17 = vadd.f32 %v6112_v19, %v8134_v35  ;;  %v4500_v55 = vpop.f32.mrb[53].mxu0 }
 0xd65   :  { %v4736_v46 = vadd.f32 %v8134_v35, %v4500_v55  ;;  %v6113_v56 = vpop.f32.mrb[54].mxu0 }
 0xd66   :  { %4802 = vst [vmem:[%s8411_s7 + $0x50] sm:$0xff] %v4738_v17  ;;  %v4739_v38 = vadd.f32 %v6113_v56, %v8134_v35  ;;  %v4503_v25 = vpop.f32.mrb[55].mxu0 }
 0xd67   :  { %4800 = vst [vmem:[%s8411_s7 + $0x40] sm:$0xff] %v4736_v46  ;;  %v4737_v36 = vadd.f32 %v8134_v35, %v4503_v25 }
 0xd68   :  { %4803 = vst [vmem:[%s8411_s7 + $0x58] sm:$0xff] %v4739_v38 }
 0xd69   :  { %4801 = vst [vmem:[%s8411_s7 + $0x48] sm:$0xff] %v4737_v36 }
 0xd6b   :  { %v6116_v37 = vpop.f32.mrb[56].mxu0 }
 0xd6c   :  { %v4742_v16 = vadd.f32 %v6116_v37, %v8134_v35  ;;  %v4516_v24 = vpop.f32.mrb[57].mxu0 }
 0xd6d   :  { %v4740_v54 = vadd.f32 %v8134_v35, %v4516_v24  ;;  %v6117_v4 = vpop.f32.mrb[58].mxu0 }
 0xd6e   :  { %4806 = vst [vmem:[%s8411_s7 + $0x70] sm:$0xff] %v4742_v16  ;;  %v4743_v34 = vadd.f32 %v6117_v4, %v8134_v35  ;;  %v4519_v9 = vpop.f32.mrb[59].mxu0 }
 0xd6f   :  { %4804 = vst [vmem:[%s8411_s7 + $0x60] sm:$0xff] %v4740_v54  ;;  %v4741_v62 = vadd.f32 %v8134_v35, %v4519_v9 }
 0xd70   :  { %4807 = vst [vmem:[%s8411_s7 + $0x78] sm:$0xff] %v4743_v34 }
 0xd71   :  { %4805 = vst [vmem:[%s8411_s7 + $0x68] sm:$0xff] %v4741_v62 }
 0xd73   :  { %v6120_v50 = vpop.f32.mrb[60].mxu0 }
 0xd74   :  { %v4746_v45 = vadd.f32 %v6120_v50, %v8134_v35  ;;  %v4532_v8 = vpop.f32.mrb[61].mxu0 }
 0xd75   :  { %v4744_v21 = vadd.f32 %v8134_v35, %v4532_v8  ;;  %v6121_v6 = vpop.f32.mrb[62].mxu0 }
 0xd76   :  { %4810 = vst [vmem:[%s8411_s7 + $0x90] sm:$0xff] %v4746_v45  ;;  %v4747_v44 = vadd.f32 %v6121_v6, %v8134_v35  ;;  %v4535_v20 = vpop.f32.mrb[63].mxu0 }
 0xd77   :  { %4808 = vst [vmem:[%s8411_s7 + $0x80] sm:$0xff] %v4744_v21  ;;  %v4745_v52 = vadd.f32 %v8134_v35, %v4535_v20 }
 0xd78   :  { %4811 = vst [vmem:[%s8411_s7 + $0x98] sm:$0xff] %v4747_v44 }
 0xd79   :  { %4809 = vst [vmem:[%s8411_s7 + $0x88] sm:$0xff] %v4745_v52 }
 0xd7b   :  { %v6124_v40 = vpop.f32.mrb[64].mxu0 }
 0xd7c   :  { %v4750_v31 = vadd.f32 %v6124_v40, %v8134_v35  ;;  %v4548_v43 = vpop.f32.mrb[65].mxu0 }
 0xd7d   :  { %v4748_v58 = vadd.f32 %v8134_v35, %v4548_v43  ;;  %v6125_v7 = vpop.f32.mrb[66].mxu0 }
 0xd7e   :  { %4814 = vst [vmem:[%s8411_s7 + $0xb0] sm:$0xff] %v4750_v31  ;;  %v4751_v10 = vadd.f32 %v6125_v7, %v8134_v35  ;;  %v4551_v28 = vpop.f32.mrb[67].mxu0 }
 0xd7f   :  { %4812 = vst [vmem:[%s8411_s7 + $0xa0] sm:$0xff] %v4748_v58  ;;  %v4749_v53 = vadd.f32 %v8134_v35, %v4551_v28 }
 0xd80   :  { %4815 = vst [vmem:[%s8411_s7 + $0xb8] sm:$0xff] %v4751_v10 }
 0xd81   :  { %4813 = vst [vmem:[%s8411_s7 + $0xa8] sm:$0xff] %v4749_v53 }
 0xd83   :  { %v6128_v5 = vpop.f32.mrb[68].mxu0 }
 0xd84   :  { %v4754_v59 = vadd.f32 %v6128_v5, %v8134_v35  ;;  %v4564_v11 = vpop.f32.mrb[69].mxu0 }
 0xd85   :  { %v4752_v27 = vadd.f32 %v8134_v35, %v4564_v11  ;;  %v6129_v51 = vpop.f32.mrb[70].mxu0 }
 0xd86   :  { %4818 = vst [vmem:[%s8411_s7 + $0xd0] sm:$0xff] %v4754_v59  ;;  %v4755_v14 = vadd.f32 %v6129_v51, %v8134_v35  ;;  %v4567_v39 = vpop.f32.mrb[71].mxu0 }
 0xd87   :  { %4816 = vst [vmem:[%s8411_s7 + $0xc0] sm:$0xff] %v4752_v27  ;;  %v4753_v1 = vadd.f32 %v8134_v35, %v4567_v39 }
 0xd88   :  { %4819 = vst [vmem:[%s8411_s7 + $0xd8] sm:$0xff] %v4755_v14 }
 0xd89   :  { %4817 = vst [vmem:[%s8411_s7 + $0xc8] sm:$0xff] %v4753_v1 }
 0xd8b   :  { %v6132_v3 = vpop.f32.mrb[72].mxu0 }
 0xd8c   :  { %v4758_v33 = vadd.f32 %v6132_v3, %v8134_v35  ;;  %v4580_v42 = vpop.f32.mrb[73].mxu0 }
 0xd8d   :  { %v4756_v0 = vadd.f32 %v8134_v35, %v4580_v42  ;;  %v6133_v48 = vpop.f32.mrb[74].mxu0 }
 0xd8e   :  { %4822 = vst [vmem:[%s8411_s7 + $0xf0] sm:$0xff] %v4758_v33  ;;  %v4759_v63 = vadd.f32 %v6133_v48, %v8134_v35  ;;  %v4583_v32 = vpop.f32.mrb[75].mxu0 }
 0xd8f   :  { %4820 = vst [vmem:[%s8411_s7 + $0xe0] sm:$0xff] %v4756_v0  ;;  %v4757_v41 = vadd.f32 %v8134_v35, %v4583_v32 }
 0xd90   :  { %4823 = vst [vmem:[%s8411_s7 + $0xf8] sm:$0xff] %v4759_v63 }
 0xd91   :  { %4821 = vst [vmem:[%s8411_s7 + $0xe8] sm:$0xff] %v4757_v41 }
 0xd93   :  { %v6136_v60 = vpop.f32.mrb[76].mxu0 }
 0xd94   :  { %v4762_v30 = vadd.f32 %v6136_v60, %v8134_v35  ;;  %v4596_v47 = vpop.f32.mrb[77].mxu0 }
 0xd95   :  { %v4760_v22 = vadd.f32 %v8134_v35, %v4596_v47  ;;  %v6137_v49 = vpop.f32.mrb[78].mxu0 }
 0xd96   :  { %4826 = vst [vmem:[%s8411_s7 + $0x110] sm:$0xff] %v4762_v30  ;;  %v4763_v2 = vadd.f32 %v6137_v49, %v8134_v35  ;;  %v4599_v15 = vpop.f32.mrb[79].mxu0 }
 0xd97   :  { %4824 = vst [vmem:[%s8411_s7 + $0x100] sm:$0xff] %v4760_v22  ;;  %v4761_v12 = vadd.f32 %v8134_v35, %v4599_v15 }
 0xd98   :  { %4827 = vst [vmem:[%s8411_s7 + $0x118] sm:$0xff] %v4763_v2 }
 0xd99   :  { %4825 = vst [vmem:[%s8411_s7 + $0x108] sm:$0xff] %v4761_v12 }
 0xd9b   :  { %v6140_v13 = vpop.f32.mrb[80].mxu0 }
 0xd9c   :  { %v4766_v18 = vadd.f32 %v6140_v13, %v8134_v35  ;;  %v4612_v26 = vpop.f32.mrb[81].mxu0 }
 0xd9d   :  { %v4764_v23 = vadd.f32 %v8134_v35, %v4612_v26  ;;  %v6141_v57 = vpop.f32.mrb[82].mxu0 }
 0xd9e   :  { %4830 = vst [vmem:[%s8411_s7 + $0x130] sm:$0xff] %v4766_v18  ;;  %v4767_v61 = vadd.f32 %v6141_v57, %v8134_v35  ;;  %v4615_v29 = vpop.f32.mrb[83].mxu0 }
 0xd9f   :  { %4828 = vst [vmem:[%s8411_s7 + $0x120] sm:$0xff] %v4764_v23  ;;  %v4765_v19 = vadd.f32 %v8134_v35, %v4615_v29 }
 0xda0   :  { %4831 = vst [vmem:[%s8411_s7 + $0x138] sm:$0xff] %v4767_v61 }
 0xda1   :  { %4829 = vst [vmem:[%s8411_s7 + $0x128] sm:$0xff] %v4765_v19 }
 0xda3   :  { %v6144_v17 = vpop.f32.mrb[84].mxu0 }
 0xda4   :  { %v4770_v55 = vadd.f32 %v6144_v17, %v8134_v35  ;;  %v4628_v46 = vpop.f32.mrb[85].mxu0 }
 0xda5   :  { %v4768_v56 = vadd.f32 %v8134_v35, %v4628_v46  ;;  %v6145_v38 = vpop.f32.mrb[86].mxu0 }
 0xda6   :  { %4834 = vst [vmem:[%s8411_s7 + $0x150] sm:$0xff] %v4770_v55  ;;  %v4771_v25 = vadd.f32 %v6145_v38, %v8134_v35  ;;  %v4631_v36 = vpop.f32.mrb[87].mxu0 }
 0xda7   :  { %4832 = vst [vmem:[%s8411_s7 + $0x140] sm:$0xff] %v4768_v56  ;;  %v4769_v37 = vadd.f32 %v8134_v35, %v4631_v36 }
 0xda8   :  { %4835 = vst [vmem:[%s8411_s7 + $0x158] sm:$0xff] %v4771_v25 }
 0xda9   :  { %4833 = vst [vmem:[%s8411_s7 + $0x148] sm:$0xff] %v4769_v37 }
 0xdab   :  { %v6148_v16 = vpop.f32.mrb[88].mxu0 }
 0xdac   :  { %v4774_v24 = vadd.f32 %v6148_v16, %v8134_v35  ;;  %v4644_v54 = vpop.f32.mrb[89].mxu0 }
 0xdad   :  { %v4772_v4 = vadd.f32 %v8134_v35, %v4644_v54  ;;  %v6149_v34 = vpop.f32.mrb[90].mxu0 }
 0xdae   :  { %4838 = vst [vmem:[%s8411_s7 + $0x170] sm:$0xff] %v4774_v24  ;;  %v4775_v9 = vadd.f32 %v6149_v34, %v8134_v35  ;;  %v4647_v62 = vpop.f32.mrb[91].mxu0 }
 0xdaf   :  { %4836 = vst [vmem:[%s8411_s7 + $0x160] sm:$0xff] %v4772_v4  ;;  %v4773_v50 = vadd.f32 %v8134_v35, %v4647_v62 }
 0xdb0   :  { %4839 = vst [vmem:[%s8411_s7 + $0x178] sm:$0xff] %v4775_v9 }
 0xdb1   :  { %4837 = vst [vmem:[%s8411_s7 + $0x168] sm:$0xff] %v4773_v50 }
 0xdb3   :  { %v6152_v45 = vpop.f32.mrb[92].mxu0 }
 0xdb4   :  { %v4778_v8 = vadd.f32 %v6152_v45, %v8134_v35  ;;  %v4660_v21 = vpop.f32.mrb[93].mxu0 }
 0xdb5   :  { %v4776_v6 = vadd.f32 %v8134_v35, %v4660_v21  ;;  %v6153_v44 = vpop.f32.mrb[94].mxu0 }
 0xdb6   :  { %4842 = vst [vmem:[%s8411_s7 + $0x190] sm:$0xff] %v4778_v8  ;;  %v4779_v20 = vadd.f32 %v6153_v44, %v8134_v35  ;;  %v4663_v52 = vpop.f32.mrb[95].mxu0 }
 0xdb7   :  { %4840 = vst [vmem:[%s8411_s7 + $0x180] sm:$0xff] %v4776_v6  ;;  %v4777_v40 = vadd.f32 %v8134_v35, %v4663_v52 }
 0xdb8   :  { %4843 = vst [vmem:[%s8411_s7 + $0x198] sm:$0xff] %v4779_v20 }
 0xdb9   :  { %4841 = vst [vmem:[%s8411_s7 + $0x188] sm:$0xff] %v4777_v40 }
 0xdbb   :  { %v6156_v31 = vpop.f32.mrb[96].mxu0 }
 0xdbc   :  { %v4782_v43 = vadd.f32 %v6156_v31, %v8134_v35  ;;  %v4676_v58 = vpop.f32.mrb[97].mxu0 }
 0xdbd   :  { %v4780_v7 = vadd.f32 %v8134_v35, %v4676_v58  ;;  %v6157_v10 = vpop.f32.mrb[98].mxu0 }
 0xdbe   :  { %4846 = vst [vmem:[%s8411_s7 + $0x1b0] sm:$0xff] %v4782_v43  ;;  %v4783_v28 = vadd.f32 %v6157_v10, %v8134_v35  ;;  %v4679_v53 = vpop.f32.mrb[99].mxu0 }
 0xdbf   :  { %4844 = vst [vmem:[%s8411_s7 + $0x1a0] sm:$0xff] %v4780_v7  ;;  %v4781_v5 = vadd.f32 %v8134_v35, %v4679_v53 }
 0xdc0   :  { %4847 = vst [vmem:[%s8411_s7 + $0x1b8] sm:$0xff] %v4783_v28 }
 0xdc1   :  { %4845 = vst [vmem:[%s8411_s7 + $0x1a8] sm:$0xff] %v4781_v5 }
 0xdc3   :  { %v6160_v59 = vpop.f32.mrb[100].mxu0 }
 0xdc4   :  { %v4786_v11 = vadd.f32 %v6160_v59, %v8134_v35  ;;  %v4692_v27 = vpop.f32.mrb[101].mxu0 }
 0xdc5   :  { %v4784_v51 = vadd.f32 %v8134_v35, %v4692_v27  ;;  %v6161_v14 = vpop.f32.mrb[102].mxu0 }
 0xdc6   :  { %4850 = vst [vmem:[%s8411_s7 + $0x1d0] sm:$0xff] %v4786_v11  ;;  %v4787_v39 = vadd.f32 %v6161_v14, %v8134_v35  ;;  %v4695_v1 = vpop.f32.mrb[103].mxu0 }
 0xdc7   :  { %4848 = vst [vmem:[%s8411_s7 + $0x1c0] sm:$0xff] %v4784_v51  ;;  %v4785_v3 = vadd.f32 %v8134_v35, %v4695_v1 }
 0xdc8   :  { %4851 = vst [vmem:[%s8411_s7 + $0x1d8] sm:$0xff] %v4787_v39 }
 0xdc9   :  { %4849 = vst [vmem:[%s8411_s7 + $0x1c8] sm:$0xff] %v4785_v3 }
 0xdcb   :  { %v6164_v33 = vpop.f32.mrb[104].mxu0 }
 0xdcc   :  { %v4790_v42 = vadd.f32 %v6164_v33, %v8134_v35  ;;  %v4708_v0 = vpop.f32.mrb[105].mxu0 }
 0xdcd   :  { %v4788_v48 = vadd.f32 %v8134_v35, %v4708_v0  ;;  %v6165_v63 = vpop.f32.mrb[106].mxu0 }
 0xdce   :  { %4854 = vst [vmem:[%s8411_s7 + $0x1f0] sm:$0xff] %v4790_v42  ;;  %v4791_v32 = vadd.f32 %v6165_v63, %v8134_v35  ;;  %v4711_v41 = vpop.f32.mrb[107].mxu0 }
 0xdcf   :  { %4852 = vst [vmem:[%s8411_s7 + $0x1e0] sm:$0xff] %v4788_v48  ;;  %v4789_v60 = vadd.f32 %v8134_v35, %v4711_v41 }
 0xdd0   :  { %4855 = vst [vmem:[%s8411_s7 + $0x1f8] sm:$0xff] %v4791_v32 }
 0xdd1   :  { %4853 = vst [vmem:[%s8411_s7 + $0x1e8] sm:$0xff] %v4789_v60 }
 0xdd2   :  { %6627 = dma.done.wait [#allocation3], 16  }
 0xdd3   :  { %6628 = vsyncadd [#allocation3], 4294967280 }
 0xdd4   :  { %4873 = vsyncpa [#allocation3], 1 }

</bundles_post_ra>
